<compile_context>
chip_gen: v7x
topology: tpu7x:2x2x1
jax: 0.10.0
libtpu: 0.0.40
codegen_flags: <defaults>
</compile_context>

<pallas_src>
import functools

import jax
import jax.numpy as jnp
from jax.experimental import pallas as pl
from jax.experimental.pallas import tpu as pltpu

LANE = 128      # f32 lane tile
SUBLANE = 8     # f32 sublane tile

_VMEM = pl.BlockSpec(memory_space=pltpu.MemorySpace.VMEM)
_ANY = pl.BlockSpec(memory_space=pl.ANY)


def _round_up(x, m):
    return (x + m - 1) // m * m


# ----------------------------------------------------------------------------
# Fused kernel
# ----------------------------------------------------------------------------
def _make_fused_kernel(layer_dim):
    """L-layer LSTM over the full sequence + MLP classifier + softmax."""
    n_def_lstm = 2 * (layer_dim - 1)      # deferred (pl.ANY) LSTM weight mats
    n_def = n_def_lstm + 3                # + classifier w1, w2, w3

    def kernel(*refs):
        x_ref, h0_ref, c0_ref = refs[:3]
        lstm_refs = refs[3:3 + 3 * layer_dim]
        ci = 3 + 3 * layer_dim
        (w1_hbm, b1_ref, w2_hbm, b2_ref, w3_hbm, b3_ref) = refs[ci:ci + 6]
        out_ref = refs[ci + 6]
        sc = refs[ci + 7:]
        xp_sc, seq_sc = sc[0], sc[1]          # hoisted proj / inter-layer seq
        def_bufs = sc[2:2 + n_def]            # VMEM landing buffers
        sem = sc[2 + n_def]                   # DMA semaphores

        T, Bp, _ = x_ref.shape
        Hp = h0_ref.shape[-1]
        bf16 = jnp.bfloat16
        dot = functools.partial(jnp.dot, preferred_element_type=jnp.float32)

        # ---- Kick off HBM->VMEM DMA of all deferred weights up front so the
        # transfers overlap with layer-0 compute (P4 manual overlap).
        def_srcs = []
        for layer in range(1, layer_dim):
            def_srcs += [lstm_refs[3 * layer], lstm_refs[3 * layer + 1]]
        def_srcs += [w1_hbm, w2_hbm, w3_hbm]
        copies = [pltpu.make_async_copy(src, dst, sem.at[i])
                  for i, (src, dst) in enumerate(zip(def_srcs, def_bufs))]
        for cp in copies:
            cp.start()

        h_last = None
        for layer in range(layer_dim):
            b_ref = lstm_refs[3 * layer + 2]
            if layer == 0:
                wih = lstm_refs[0][...]                 # VMEM in_spec (bf16)
                whh = lstm_refs[1][...]
            else:
                copies[2 * (layer - 1)].wait()          # arrive just-in-time
                copies[2 * (layer - 1) + 1].wait()
                wih = def_bufs[2 * (layer - 1)][...]
                whh = def_bufs[2 * (layer - 1) + 1][...]

            # Hoisted time-invariant projection: one big MXU matmul + a single
            # bias broadcast, off the serial recurrence path.
            xin = x_ref[...] if layer == 0 else seq_sc[...]
            f_in = xin.shape[-1]
            xp = dot(xin.reshape(T * Bp, f_in).astype(bf16), wih) + b_ref[...]
            xp_sc[...] = xp.reshape(T, Bp, 4 * Hp)

            store_seq = layer != layer_dim - 1   # last layer: only h_T is used
            h = h0_ref[layer]                    # (Bp, Hp) f32
            c = c0_ref[layer]

            # T is small & static: fully unroll the recurrence.
            for t in range(T):
                gates = xp_sc[t] + dot(h.astype(bf16), whh)    # (Bp, 4*Hp) f32
                # Gate blocks are 128-lane aligned -> free slices.
                # PyTorch gate order: i, f, g, o.
                i_g = jax.nn.sigmoid(gates[:, 0 * Hp:1 * Hp])
                f_g = jax.nn.sigmoid(gates[:, 1 * Hp:2 * Hp])
                g_g = jnp.tanh(gates[:, 2 * Hp:3 * Hp])
                o_g = jax.nn.sigmoid(gates[:, 3 * Hp:4 * Hp])
                c = f_g * c + i_g * g_g
                h = o_g * jnp.tanh(c)
                if store_seq:
                    seq_sc[t] = h                               # VMEM, aligned
            h_last = h

        # ---- Classifier (Dropout(0.3) == identity at inference time).
        for i in range(n_def_lstm, n_def):
            copies[i].wait()
        w1 = def_bufs[n_def_lstm][...]
        w2 = def_bufs[n_def_lstm + 1][...]
        w3 = def_bufs[n_def_lstm + 2][...]

        y = jnp.maximum(dot(h_last.astype(bf16), w1) + b1_ref[...], 0.0)
        y = jnp.maximum(dot(y.astype(bf16), w2) + b2_ref[...], 0.0)
        # Padded logit lanes carry b3 = -1e30 -> exp underflows to exactly 0.
        logits = dot(y.astype(bf16), w3) + b3_ref[...]
        m = jnp.max(logits, axis=-1, keepdims=True)
        e = jnp.exp(logits - m)
        denom = jnp.sum(e, axis=-1, keepdims=True)
        out_ref[...] = e / denom          # exact divide (torch.softmax parity)

    return kernel


def _fused_forward(x, h0, c0, lstm_params, clf_params):
    T, Bp, _ = x.shape
    L, _, Hp = h0.shape
    Op = clf_params["w3"].shape[-1]

    inputs = [x, h0, c0]
    in_specs = [_VMEM, _VMEM, _VMEM]
    deferred = []                          # arrays landing via manual DMA

    for layer, lp in enumerate(lstm_params):
        inputs += [lp["w_ih_t"], lp["w_hh_t"], lp["b"]]
        if layer == 0:
            in_specs += [_VMEM, _VMEM, _VMEM]
        else:
            in_specs += [_ANY, _ANY, _VMEM]
            deferred += [lp["w_ih_t"], lp["w_hh_t"]]

    inputs += [clf_params["w1"], clf_params["b1"], clf_params["w2"],
               clf_params["b2"], clf_params["w3"], clf_params["b3"]]
    in_specs += [_ANY, _VMEM, _ANY, _VMEM, _ANY, _VMEM]
    deferred += [clf_params["w1"], clf_params["w2"], clf_params["w3"]]

    scratch_shapes = [
        pltpu.VMEM((T, Bp, 4 * Hp), jnp.float32),   # hoisted projections
        pltpu.VMEM((T, Bp, Hp), jnp.float32),       # inter-layer h sequence
    ]
    scratch_shapes += [pltpu.VMEM(w.shape, w.dtype) for w in deferred]
    scratch_shapes += [pltpu.SemaphoreType.DMA((len(deferred),))]

    return pl.pallas_call(
        _make_fused_kernel(L),
        out_shape=jax.ShapeDtypeStruct((Bp, Op), jnp.float32),
        in_specs=in_specs,
        out_specs=_VMEM,
        scratch_shapes=scratch_shapes,
    )(*inputs)


# ----------------------------------------------------------------------------
# JAX wrapper: embedding lookup + padding to TPU-friendly layout
# ----------------------------------------------------------------------------
@functools.partial(jax.jit, static_argnames=("output_dim",))
def neural_network_forward(x_tokens, kparams, hidden, *, output_dim):
    """Matches NeuralNetwork.forward: embed -> LSTM stack -> out[:, -1, :]
    -> classifier -> softmax."""
    h0, c0 = hidden                                   # (L, B, H) each
    _, B, H = h0.shape
    emb = kparams["embedding"]
    E = emb.shape[1]
    Hp = _round_up(H, LANE)
    Bp = _round_up(B, SUBLANE)
    Ep = _round_up(E, LANE)

    # Time-major embedding gather directly: (T, B, E), no transpose pass.
    x = jnp.take(emb, jnp.transpose(x_tokens), axis=0)
    x = jnp.pad(x, ((0, 0), (0, Bp - B), (0, Ep - E))).astype(jnp.float32)
    h0p = jnp.pad(h0.astype(jnp.float32), ((0, 0), (0, Bp - B), (0, Hp - H)))
    c0p = jnp.pad(c0.astype(jnp.float32), ((0, 0), (0, Bp - B), (0, Hp - H)))

    out_p = _fused_forward(x, h0p, c0p, kparams["lstm"], kparams["classifier"])
    return out_p[:B, :output_dim]        # drop padded batch rows / logit lanes


# ----------------------------------------------------------------------------
# Parameter construction (PyTorch-shaped) + conversion to kernel layout
# ----------------------------------------------------------------------------
def make_params(key, vocab_size, emb_dim, hidden_dim, layer_dim, output_dim):
    keys = jax.random.split(key, 1 + 4 * layer_dim + 6)
    k_iter = iter(keys)

    def unif(k, shape, scale):
        return jax.random.uniform(k, shape, jnp.float32, -scale, scale)

    params = {"embedding": jax.random.normal(
        next(k_iter), (vocab_size, emb_dim), jnp.float32) * 0.1}

    s = 1.0 / float(hidden_dim) ** 0.5
    lstm = []
    for layer in range(layer_dim):
        in_dim = emb_dim if layer == 0 else hidden_dim
        lstm.append({
            "w_ih": unif(next(k_iter), (4 * hidden_dim, in_dim), s),
            "w_hh": unif(next(k_iter), (4 * hidden_dim, hidden_dim), s),
            "b_ih": unif(next(k_iter), (4 * hidden_dim,), s),
            "b_hh": unif(next(k_iter), (4 * hidden_dim,), s),
        })
    params["lstm"] = lstm

    def linear(kw, kb, fan_in, fan_out):
        sc = 1.0 / float(fan_in) ** 0.5
        return unif(kw, (fan_in, fan_out), sc), unif(kb, (1, fan_out), sc)

    w1, b1 = linear(next(k_iter), next(k_iter), hidden_dim, 256)
    w2, b2 = linear(next(k_iter), next(k_iter), 256, 128)
    w3, b3 = linear(next(k_iter), next(k_iter), 128, output_dim)
    params["classifier"] = {"w1": w1, "b1": b1, "w2": w2, "b2": b2,
                            "w3": w3, "b3": b3}
    return params


def _pad_gate_matrix(w_t, f_in_pad, h, h_pad):
    """(f_in, 4h) -> (f_in_pad, 4*h_pad); each gate block lane-tile aligned,
    padded weights are exactly zero so padded gate lanes stay inert."""
    f_in = w_t.shape[0]
    blocks = []
    for g in range(4):
        blk = w_t[:, g * h:(g + 1) * h]
        blocks.append(jnp.pad(blk, ((0, f_in_pad - f_in), (0, h_pad - h))))
    return jnp.concatenate(blocks, axis=1)


def _pad_gate_bias(b, h, h_pad):
    blocks = [jnp.pad(b[g * h:(g + 1) * h], (0, h_pad - h)) for g in range(4)]
    return jnp.concatenate(blocks)[None, :]


def prepare_params(raw, hidden_dim, output_dim):
    """Convert PyTorch-shaped params into the padded, pre-transposed kernel
    layout: bf16 weights (MXU-native), gate columns aligned to 128-lane tiles,
    combined LSTM bias, and a lane-dense (128-wide) classifier output with
    -1e30 bias on padded logit lanes so softmax zeroes them."""
    H = hidden_dim
    Hp = _round_up(H, LANE)
    E = raw["embedding"].shape[1]
    Ep = _round_up(E, LANE)
    O = output_dim
    Op = _round_up(O, LANE)
    bf16 = jnp.bfloat16

    lstm = []
    for layer, lp in enumerate(raw["lstm"]):
        f_in_pad = Ep if layer == 0 else Hp
        lstm.append({
            "w_ih_t": _pad_gate_matrix(jnp.transpose(lp["w_ih"]),
                                       f_in_pad, H, Hp).astype(bf16),
            "w_hh_t": _pad_gate_matrix(jnp.transpose(lp["w_hh"]),
                                       Hp, H, Hp).astype(bf16),
            "b": _pad_gate_bias(lp["b_ih"] + lp["b_hh"], H, Hp),   # f32
        })

    clf = raw["classifier"]
    classifier = {
        "w1": jnp.pad(clf["w1"], ((0, Hp - H), (0, 0))).astype(bf16),
        "b1": clf["b1"],                                           # f32
        "w2": clf["w2"].astype(bf16),
        "b2": clf["b2"],                                           # f32
        "w3": jnp.pad(clf["w3"], ((0, 0), (0, Op - O))).astype(bf16),
        "b3": jnp.pad(clf["b3"], ((0, 0), (0, Op - O)),
                      constant_values=-1e30),                      # f32
    }
    return {"embedding": raw["embedding"], "lstm": lstm, "classifier": classifier}


if __name__ == "__main__":
    BATCH, SEQ = 2, 8
    VOCAB, EMB_DIM = 50, 32
    HIDDEN_DIM, LAYER_DIM, OUTPUT_DIM = 32, 2, 8

    root = jax.random.PRNGKey(0)
    k_param, k_tok, k_h, k_c = jax.random.split(root, 4)

    raw_params = make_params(k_param, VOCAB, EMB_DIM, HIDDEN_DIM, LAYER_DIM,
                             OUTPUT_DIM)
    kparams = prepare_params(raw_params, HIDDEN_DIM, OUTPUT_DIM)

    x_tokens = jax.random.randint(k_tok, (BATCH, SEQ), 0, VOCAB, jnp.int32)
    # forward() draws the initial (h0, c0) from randn each call.
    hidden = (jax.random.normal(k_h, (LAYER_DIM, BATCH, HIDDEN_DIM), jnp.float32),
              jax.random.normal(k_c, (LAYER_DIM, BATCH, HIDDEN_DIM), jnp.float32))

    out = neural_network_forward(x_tokens, kparams, hidden,
                                 output_dim=OUTPUT_DIM)
    out = jax.block_until_ready(out)

    assert out.shape == (BATCH, OUTPUT_DIM)
    assert bool(jnp.all(jnp.isfinite(out)))
    # Exact softmax divide: rows sum to 1 up to f32 rounding.
    assert bool(jnp.allclose(jnp.sum(out, axis=-1), 1.0, atol=1e-4))
    print("KERNEL_OK")
</pallas_src>

<mosaic_0001>
module attributes {stable_mosaic.version = 11 : i64} {
  func.func @kernel(%arg0: memref<8x8x128xf32, #tpu.memory_space<vmem>>, %arg1: memref<2x8x128xf32, #tpu.memory_space<vmem>>, %arg2: memref<2x8x128xf32, #tpu.memory_space<vmem>>, %arg3: memref<128x512xbf16, #tpu.memory_space<vmem>>, %arg4: memref<128x512xbf16, #tpu.memory_space<vmem>>, %arg5: memref<1x512xf32, #tpu.memory_space<vmem>>, %arg6: memref<128x512xbf16, #tpu.memory_space<any>>, %arg7: memref<128x512xbf16, #tpu.memory_space<any>>, %arg8: memref<1x512xf32, #tpu.memory_space<vmem>>, %arg9: memref<128x256xbf16, #tpu.memory_space<any>>, %arg10: memref<1x256xf32, #tpu.memory_space<vmem>>, %arg11: memref<256x128xbf16, #tpu.memory_space<any>>, %arg12: memref<1x128xf32, #tpu.memory_space<vmem>>, %arg13: memref<128x128xbf16, #tpu.memory_space<any>>, %arg14: memref<1x128xf32, #tpu.memory_space<vmem>>, %arg15: memref<8x128xf32, #tpu.memory_space<vmem>>, %arg16: memref<8x8x512xf32, #tpu.memory_space<vmem>>, %arg17: memref<8x8x128xf32, #tpu.memory_space<vmem>>, %arg18: memref<128x512xbf16, #tpu.memory_space<vmem>>, %arg19: memref<128x512xbf16, #tpu.memory_space<vmem>>, %arg20: memref<128x256xbf16, #tpu.memory_space<vmem>>, %arg21: memref<256x128xbf16, #tpu.memory_space<vmem>>, %arg22: memref<128x128xbf16, #tpu.memory_space<vmem>>, %arg23: memref<5x!tpu.dma_semaphore, #tpu.memory_space<semaphore_mem>>) attributes {dimension_semantics = [], scalar_prefetch = 0 : i64, scratch_operands = 8 : i64, tpu.core_type = #tpu.core_type<tc>} {
    %c0_i32 = arith.constant 0 : i32
    %0 = tpu.memref_slice %arg23[%c0_i32] : memref<5x!tpu.dma_semaphore, #tpu.memory_space<semaphore_mem>> -> memref<1x!tpu.dma_semaphore, #tpu.memory_space<semaphore_mem>>
    %1 = tpu.memref_squeeze %0 : memref<1x!tpu.dma_semaphore, #tpu.memory_space<semaphore_mem>> -> memref<!tpu.dma_semaphore, #tpu.memory_space<semaphore_mem>>
    tpu.enqueue_dma source(%arg6 : memref<128x512xbf16, #tpu.memory_space<any>>) target(%arg18 : memref<128x512xbf16, #tpu.memory_space<vmem>>) target_semaphore(%1 : memref<!tpu.dma_semaphore, #tpu.memory_space<semaphore_mem>>)
    %c1_i32 = arith.constant 1 : i32
    %2 = tpu.memref_slice %arg23[%c1_i32] : memref<5x!tpu.dma_semaphore, #tpu.memory_space<semaphore_mem>> -> memref<1x!tpu.dma_semaphore, #tpu.memory_space<semaphore_mem>>
    %3 = tpu.memref_squeeze %2 : memref<1x!tpu.dma_semaphore, #tpu.memory_space<semaphore_mem>> -> memref<!tpu.dma_semaphore, #tpu.memory_space<semaphore_mem>>
    tpu.enqueue_dma source(%arg7 : memref<128x512xbf16, #tpu.memory_space<any>>) target(%arg19 : memref<128x512xbf16, #tpu.memory_space<vmem>>) target_semaphore(%3 : memref<!tpu.dma_semaphore, #tpu.memory_space<semaphore_mem>>)
    %c2_i32 = arith.constant 2 : i32
    %4 = tpu.memref_slice %arg23[%c2_i32] : memref<5x!tpu.dma_semaphore, #tpu.memory_space<semaphore_mem>> -> memref<1x!tpu.dma_semaphore, #tpu.memory_space<semaphore_mem>>
    %5 = tpu.memref_squeeze %4 : memref<1x!tpu.dma_semaphore, #tpu.memory_space<semaphore_mem>> -> memref<!tpu.dma_semaphore, #tpu.memory_space<semaphore_mem>>
    tpu.enqueue_dma source(%arg9 : memref<128x256xbf16, #tpu.memory_space<any>>) target(%arg20 : memref<128x256xbf16, #tpu.memory_space<vmem>>) target_semaphore(%5 : memref<!tpu.dma_semaphore, #tpu.memory_space<semaphore_mem>>)
    %c3_i32 = arith.constant 3 : i32
    %6 = tpu.memref_slice %arg23[%c3_i32] : memref<5x!tpu.dma_semaphore, #tpu.memory_space<semaphore_mem>> -> memref<1x!tpu.dma_semaphore, #tpu.memory_space<semaphore_mem>>
    %7 = tpu.memref_squeeze %6 : memref<1x!tpu.dma_semaphore, #tpu.memory_space<semaphore_mem>> -> memref<!tpu.dma_semaphore, #tpu.memory_space<semaphore_mem>>
    tpu.enqueue_dma source(%arg11 : memref<256x128xbf16, #tpu.memory_space<any>>) target(%arg21 : memref<256x128xbf16, #tpu.memory_space<vmem>>) target_semaphore(%7 : memref<!tpu.dma_semaphore, #tpu.memory_space<semaphore_mem>>)
    %c4_i32 = arith.constant 4 : i32
    %8 = tpu.memref_slice %arg23[%c4_i32] : memref<5x!tpu.dma_semaphore, #tpu.memory_space<semaphore_mem>> -> memref<1x!tpu.dma_semaphore, #tpu.memory_space<semaphore_mem>>
    %9 = tpu.memref_squeeze %8 : memref<1x!tpu.dma_semaphore, #tpu.memory_space<semaphore_mem>> -> memref<!tpu.dma_semaphore, #tpu.memory_space<semaphore_mem>>
    tpu.enqueue_dma source(%arg13 : memref<128x128xbf16, #tpu.memory_space<any>>) target(%arg22 : memref<128x128xbf16, #tpu.memory_space<vmem>>) target_semaphore(%9 : memref<!tpu.dma_semaphore, #tpu.memory_space<semaphore_mem>>)
    %c0 = arith.constant 0 : index
    %c0_0 = arith.constant 0 : index
    %10 = vector.load %arg3[%c0, %c0_0] : memref<128x512xbf16, #tpu.memory_space<vmem>>, vector<128x512xbf16>
    %c0_1 = arith.constant 0 : index
    %c0_2 = arith.constant 0 : index
    %11 = vector.load %arg4[%c0_1, %c0_2] : memref<128x512xbf16, #tpu.memory_space<vmem>>, vector<128x512xbf16>
    %c0_3 = arith.constant 0 : index
    %c0_4 = arith.constant 0 : index
    %c0_5 = arith.constant 0 : index
    %12 = vector.load %arg0[%c0_3, %c0_4, %c0_5] : memref<8x8x128xf32, #tpu.memory_space<vmem>>, vector<8x8x128xf32>
    %13 = vector.shape_cast %12 : vector<8x8x128xf32> to vector<64x128xf32>
    %14 = arith.truncf %13 : vector<64x128xf32> to vector<64x128xbf16>
    %cst = arith.constant dense<0.000000e+00> : vector<64x512xf32>
    %15 = tpu.matmul %14, %10, %cst {dimension_numbers = #tpu.dot_dimension_numbers<[1], [0], [0], [1], [0, 0, 1, 1], [], []>} : vector<64x128xbf16>, vector<128x512xbf16>, vector<64x512xf32> -> vector<64x512xf32>
    %c0_6 = arith.constant 0 : index
    %c0_7 = arith.constant 0 : index
    %16 = vector.load %arg5[%c0_6, %c0_7] : memref<1x512xf32, #tpu.memory_space<vmem>>, vector<1x512xf32>
    %17 = vector.broadcast %16 : vector<1x512xf32> to vector<64x512xf32>
    %18 = arith.addf %15, %17 : vector<64x512xf32>
    %19 = vector.shape_cast %18 : vector<64x512xf32> to vector<8x8x512xf32>
    %c0_8 = arith.constant 0 : index
    %c0_9 = arith.constant 0 : index
    %c0_10 = arith.constant 0 : index
    %20 = vector.load %arg16[%c0_8, %c0_9, %c0_10] : memref<8x8x512xf32, #tpu.memory_space<vmem>>, vector<8x8x512xf32>
    tpu.vector_store %arg16[%c0_8, %c0_9, %c0_10], %19 {strides = array<i32>} : memref<8x8x512xf32, #tpu.memory_space<vmem>>, vector<8x8x512xf32>,
    %c0_11 = arith.constant 0 : index
    %c0_12 = arith.constant 0 : index
    %c0_13 = arith.constant 0 : index
    %21 = vector.load %arg1[%c0_11, %c0_12, %c0_13] : memref<2x8x128xf32, #tpu.memory_space<vmem>>, vector<1x8x128xf32>
    %22 = vector.shape_cast %21 : vector<1x8x128xf32> to vector<8x128xf32>
    %c0_14 = arith.constant 0 : index
    %c0_15 = arith.constant 0 : index
    %c0_16 = arith.constant 0 : index
    %23 = vector.load %arg2[%c0_14, %c0_15, %c0_16] : memref<2x8x128xf32, #tpu.memory_space<vmem>>, vector<1x8x128xf32>
    %24 = vector.shape_cast %23 : vector<1x8x128xf32> to vector<8x128xf32>
    %c0_17 = arith.constant 0 : index
    %c0_18 = arith.constant 0 : index
    %c0_19 = arith.constant 0 : index
    %25 = vector.load %arg16[%c0_17, %c0_18, %c0_19] : memref<8x8x512xf32, #tpu.memory_space<vmem>>, vector<1x8x512xf32>
    %26 = vector.shape_cast %25 : vector<1x8x512xf32> to vector<8x512xf32>
    %27 = arith.truncf %22 : vector<8x128xf32> to vector<8x128xbf16>
    %cst_20 = arith.constant dense<0.000000e+00> : vector<8x512xf32>
    %28 = tpu.matmul %27, %11, %cst_20 {dimension_numbers = #tpu.dot_dimension_numbers<[1], [0], [0], [1], [0, 0, 1, 1], [], []>} : vector<8x128xbf16>, vector<128x512xbf16>, vector<8x512xf32> -> vector<8x512xf32>
    %29 = arith.addf %26, %28 : vector<8x512xf32>
    %30 = vector.extract_strided_slice %29 {offsets = [0, 0], sizes = [8, 128], strides = [1, 1]} : vector<8x512xf32> to vector<8x128xf32>
    %31 = arith.negf %30 : vector<8x128xf32>
    %32 = math.exp %31 : vector<8x128xf32>
    %cst_21 = arith.constant 1.000000e+00 : f32
    %33 = vector.broadcast %cst_21 : f32 to vector<8x128xf32>
    %34 = arith.addf %33, %32 : vector<8x128xf32>
    %35 = arith.divf %33, %34 : vector<8x128xf32>
    %36 = vector.extract_strided_slice %29 {offsets = [0, 128], sizes = [8, 128], strides = [1, 1]} : vector<8x512xf32> to vector<8x128xf32>
    %37 = arith.negf %36 : vector<8x128xf32>
    %38 = math.exp %37 : vector<8x128xf32>
    %cst_22 = arith.constant 1.000000e+00 : f32
    %39 = vector.broadcast %cst_22 : f32 to vector<8x128xf32>
    %40 = arith.addf %39, %38 : vector<8x128xf32>
    %41 = arith.divf %39, %40 : vector<8x128xf32>
    %42 = vector.extract_strided_slice %29 {offsets = [0, 256], sizes = [8, 128], strides = [1, 1]} : vector<8x512xf32> to vector<8x128xf32>
    %43 = math.tanh %42 : vector<8x128xf32>
    %44 = vector.extract_strided_slice %29 {offsets = [0, 384], sizes = [8, 128], strides = [1, 1]} : vector<8x512xf32> to vector<8x128xf32>
    %45 = arith.negf %44 : vector<8x128xf32>
    %46 = math.exp %45 : vector<8x128xf32>
    %cst_23 = arith.constant 1.000000e+00 : f32
    %47 = vector.broadcast %cst_23 : f32 to vector<8x128xf32>
    %48 = arith.addf %47, %46 : vector<8x128xf32>
    %49 = arith.divf %47, %48 : vector<8x128xf32>
    %50 = arith.mulf %41, %24 : vector<8x128xf32>
    %51 = arith.mulf %35, %43 : vector<8x128xf32>
    %52 = arith.addf %50, %51 : vector<8x128xf32>
    %53 = math.tanh %52 : vector<8x128xf32>
    %54 = arith.mulf %49, %53 : vector<8x128xf32>
    %c0_24 = arith.constant 0 : index
    %c0_25 = arith.constant 0 : index
    %c0_26 = arith.constant 0 : index
    %55 = vector.load %arg17[%c0_24, %c0_25, %c0_26] : memref<8x8x128xf32, #tpu.memory_space<vmem>>, vector<1x8x128xf32>
    %56 = vector.shape_cast %55 : vector<1x8x128xf32> to vector<8x128xf32>
    %57 = vector.shape_cast %54 : vector<8x128xf32> to vector<1x8x128xf32>
    tpu.vector_store %arg17[%c0_24, %c0_25, %c0_26], %57 {strides = array<i32>} : memref<8x8x128xf32, #tpu.memory_space<vmem>>, vector<1x8x128xf32>,
    %c1 = arith.constant 1 : index
    %c0_27 = arith.constant 0 : index
    %c0_28 = arith.constant 0 : index
    %58 = vector.load %arg16[%c1, %c0_27, %c0_28] : memref<8x8x512xf32, #tpu.memory_space<vmem>>, vector<1x8x512xf32>
    %59 = vector.shape_cast %58 : vector<1x8x512xf32> to vector<8x512xf32>
    %60 = arith.truncf %54 : vector<8x128xf32> to vector<8x128xbf16>
    %cst_29 = arith.constant dense<0.000000e+00> : vector<8x512xf32>
    %61 = tpu.matmul %60, %11, %cst_29 {dimension_numbers = #tpu.dot_dimension_numbers<[1], [0], [0], [1], [0, 0, 1, 1], [], []>} : vector<8x128xbf16>, vector<128x512xbf16>, vector<8x512xf32> -> vector<8x512xf32>
    %62 = arith.addf %59, %61 : vector<8x512xf32>
    %63 = vector.extract_strided_slice %62 {offsets = [0, 0], sizes = [8, 128], strides = [1, 1]} : vector<8x512xf32> to vector<8x128xf32>
    %64 = arith.negf %63 : vector<8x128xf32>
    %65 = math.exp %64 : vector<8x128xf32>
    %cst_30 = arith.constant 1.000000e+00 : f32
    %66 = vector.broadcast %cst_30 : f32 to vector<8x128xf32>
    %67 = arith.addf %66, %65 : vector<8x128xf32>
    %68 = arith.divf %66, %67 : vector<8x128xf32>
    %69 = vector.extract_strided_slice %62 {offsets = [0, 128], sizes = [8, 128], strides = [1, 1]} : vector<8x512xf32> to vector<8x128xf32>
    %70 = arith.negf %69 : vector<8x128xf32>
    %71 = math.exp %70 : vector<8x128xf32>
    %cst_31 = arith.constant 1.000000e+00 : f32
    %72 = vector.broadcast %cst_31 : f32 to vector<8x128xf32>
    %73 = arith.addf %72, %71 : vector<8x128xf32>
    %74 = arith.divf %72, %73 : vector<8x128xf32>
    %75 = vector.extract_strided_slice %62 {offsets = [0, 256], sizes = [8, 128], strides = [1, 1]} : vector<8x512xf32> to vector<8x128xf32>
    %76 = math.tanh %75 : vector<8x128xf32>
    %77 = vector.extract_strided_slice %62 {offsets = [0, 384], sizes = [8, 128], strides = [1, 1]} : vector<8x512xf32> to vector<8x128xf32>
    %78 = arith.negf %77 : vector<8x128xf32>
    %79 = math.exp %78 : vector<8x128xf32>
    %cst_32 = arith.constant 1.000000e+00 : f32
    %80 = vector.broadcast %cst_32 : f32 to vector<8x128xf32>
    %81 = arith.addf %80, %79 : vector<8x128xf32>
    %82 = arith.divf %80, %81 : vector<8x128xf32>
    %83 = arith.mulf %74, %52 : vector<8x128xf32>
    %84 = arith.mulf %68, %76 : vector<8x128xf32>
    %85 = arith.addf %83, %84 : vector<8x128xf32>
    %86 = math.tanh %85 : vector<8x128xf32>
    %87 = arith.mulf %82, %86 : vector<8x128xf32>
    %c1_33 = arith.constant 1 : index
    %c0_34 = arith.constant 0 : index
    %c0_35 = arith.constant 0 : index
    %88 = vector.load %arg17[%c1_33, %c0_34, %c0_35] : memref<8x8x128xf32, #tpu.memory_space<vmem>>, vector<1x8x128xf32>
    %89 = vector.shape_cast %88 : vector<1x8x128xf32> to vector<8x128xf32>
    %90 = vector.shape_cast %87 : vector<8x128xf32> to vector<1x8x128xf32>
    tpu.vector_store %arg17[%c1_33, %c0_34, %c0_35], %90 {strides = array<i32>} : memref<8x8x128xf32, #tpu.memory_space<vmem>>, vector<1x8x128xf32>,
    %c2 = arith.constant 2 : index
    %c0_36 = arith.constant 0 : index
    %c0_37 = arith.constant 0 : index
    %91 = vector.load %arg16[%c2, %c0_36, %c0_37] : memref<8x8x512xf32, #tpu.memory_space<vmem>>, vector<1x8x512xf32>
    %92 = vector.shape_cast %91 : vector<1x8x512xf32> to vector<8x512xf32>
    %93 = arith.truncf %87 : vector<8x128xf32> to vector<8x128xbf16>
    %cst_38 = arith.constant dense<0.000000e+00> : vector<8x512xf32>
    %94 = tpu.matmul %93, %11, %cst_38 {dimension_numbers = #tpu.dot_dimension_numbers<[1], [0], [0], [1], [0, 0, 1, 1], [], []>} : vector<8x128xbf16>, vector<128x512xbf16>, vector<8x512xf32> -> vector<8x512xf32>
    %95 = arith.addf %92, %94 : vector<8x512xf32>
    %96 = vector.extract_strided_slice %95 {offsets = [0, 0], sizes = [8, 128], strides = [1, 1]} : vector<8x512xf32> to vector<8x128xf32>
    %97 = arith.negf %96 : vector<8x128xf32>
    %98 = math.exp %97 : vector<8x128xf32>
    %cst_39 = arith.constant 1.000000e+00 : f32
    %99 = vector.broadcast %cst_39 : f32 to vector<8x128xf32>
    %100 = arith.addf %99, %98 : vector<8x128xf32>
    %101 = arith.divf %99, %100 : vector<8x128xf32>
    %102 = vector.extract_strided_slice %95 {offsets = [0, 128], sizes = [8, 128], strides = [1, 1]} : vector<8x512xf32> to vector<8x128xf32>
    %103 = arith.negf %102 : vector<8x128xf32>
    %104 = math.exp %103 : vector<8x128xf32>
    %cst_40 = arith.constant 1.000000e+00 : f32
    %105 = vector.broadcast %cst_40 : f32 to vector<8x128xf32>
    %106 = arith.addf %105, %104 : vector<8x128xf32>
    %107 = arith.divf %105, %106 : vector<8x128xf32>
    %108 = vector.extract_strided_slice %95 {offsets = [0, 256], sizes = [8, 128], strides = [1, 1]} : vector<8x512xf32> to vector<8x128xf32>
    %109 = math.tanh %108 : vector<8x128xf32>
    %110 = vector.extract_strided_slice %95 {offsets = [0, 384], sizes = [8, 128], strides = [1, 1]} : vector<8x512xf32> to vector<8x128xf32>
    %111 = arith.negf %110 : vector<8x128xf32>
    %112 = math.exp %111 : vector<8x128xf32>
    %cst_41 = arith.constant 1.000000e+00 : f32
    %113 = vector.broadcast %cst_41 : f32 to vector<8x128xf32>
    %114 = arith.addf %113, %112 : vector<8x128xf32>
    %115 = arith.divf %113, %114 : vector<8x128xf32>
    %116 = arith.mulf %107, %85 : vector<8x128xf32>
    %117 = arith.mulf %101, %109 : vector<8x128xf32>
    %118 = arith.addf %116, %117 : vector<8x128xf32>
    %119 = math.tanh %118 : vector<8x128xf32>
    %120 = arith.mulf %115, %119 : vector<8x128xf32>
    %c2_42 = arith.constant 2 : index
    %c0_43 = arith.constant 0 : index
    %c0_44 = arith.constant 0 : index
    %121 = vector.load %arg17[%c2_42, %c0_43, %c0_44] : memref<8x8x128xf32, #tpu.memory_space<vmem>>, vector<1x8x128xf32>
    %122 = vector.shape_cast %121 : vector<1x8x128xf32> to vector<8x128xf32>
    %123 = vector.shape_cast %120 : vector<8x128xf32> to vector<1x8x128xf32>
    tpu.vector_store %arg17[%c2_42, %c0_43, %c0_44], %123 {strides = array<i32>} : memref<8x8x128xf32, #tpu.memory_space<vmem>>, vector<1x8x128xf32>,
    %c3 = arith.constant 3 : index
    %c0_45 = arith.constant 0 : index
    %c0_46 = arith.constant 0 : index
    %124 = vector.load %arg16[%c3, %c0_45, %c0_46] : memref<8x8x512xf32, #tpu.memory_space<vmem>>, vector<1x8x512xf32>
    %125 = vector.shape_cast %124 : vector<1x8x512xf32> to vector<8x512xf32>
    %126 = arith.truncf %120 : vector<8x128xf32> to vector<8x128xbf16>
    %cst_47 = arith.constant dense<0.000000e+00> : vector<8x512xf32>
    %127 = tpu.matmul %126, %11, %cst_47 {dimension_numbers = #tpu.dot_dimension_numbers<[1], [0], [0], [1], [0, 0, 1, 1], [], []>} : vector<8x128xbf16>, vector<128x512xbf16>, vector<8x512xf32> -> vector<8x512xf32>
    %128 = arith.addf %125, %127 : vector<8x512xf32>
    %129 = vector.extract_strided_slice %128 {offsets = [0, 0], sizes = [8, 128], strides = [1, 1]} : vector<8x512xf32> to vector<8x128xf32>
    %130 = arith.negf %129 : vector<8x128xf32>
    %131 = math.exp %130 : vector<8x128xf32>
    %cst_48 = arith.constant 1.000000e+00 : f32
    %132 = vector.broadcast %cst_48 : f32 to vector<8x128xf32>
    %133 = arith.addf %132, %131 : vector<8x128xf32>
    %134 = arith.divf %132, %133 : vector<8x128xf32>
    %135 = vector.extract_strided_slice %128 {offsets = [0, 128], sizes = [8, 128], strides = [1, 1]} : vector<8x512xf32> to vector<8x128xf32>
    %136 = arith.negf %135 : vector<8x128xf32>
    %137 = math.exp %136 : vector<8x128xf32>
    %cst_49 = arith.constant 1.000000e+00 : f32
    %138 = vector.broadcast %cst_49 : f32 to vector<8x128xf32>
    %139 = arith.addf %138, %137 : vector<8x128xf32>
    %140 = arith.divf %138, %139 : vector<8x128xf32>
    %141 = vector.extract_strided_slice %128 {offsets = [0, 256], sizes = [8, 128], strides = [1, 1]} : vector<8x512xf32> to vector<8x128xf32>
    %142 = math.tanh %141 : vector<8x128xf32>
    %143 = vector.extract_strided_slice %128 {offsets = [0, 384], sizes = [8, 128], strides = [1, 1]} : vector<8x512xf32> to vector<8x128xf32>
    %144 = arith.negf %143 : vector<8x128xf32>
    %145 = math.exp %144 : vector<8x128xf32>
    %cst_50 = arith.constant 1.000000e+00 : f32
    %146 = vector.broadcast %cst_50 : f32 to vector<8x128xf32>
    %147 = arith.addf %146, %145 : vector<8x128xf32>
    %148 = arith.divf %146, %147 : vector<8x128xf32>
    %149 = arith.mulf %140, %118 : vector<8x128xf32>
    %150 = arith.mulf %134, %142 : vector<8x128xf32>
    %151 = arith.addf %149, %150 : vector<8x128xf32>
    %152 = math.tanh %151 : vector<8x128xf32>
    %153 = arith.mulf %148, %152 : vector<8x128xf32>
    %c3_51 = arith.constant 3 : index
    %c0_52 = arith.constant 0 : index
    %c0_53 = arith.constant 0 : index
    %154 = vector.load %arg17[%c3_51, %c0_52, %c0_53] : memref<8x8x128xf32, #tpu.memory_space<vmem>>, vector<1x8x128xf32>
    %155 = vector.shape_cast %154 : vector<1x8x128xf32> to vector<8x128xf32>
    %156 = vector.shape_cast %153 : vector<8x128xf32> to vector<1x8x128xf32>
    tpu.vector_store %arg17[%c3_51, %c0_52, %c0_53], %156 {strides = array<i32>} : memref<8x8x128xf32, #tpu.memory_space<vmem>>, vector<1x8x128xf32>,
    %c4 = arith.constant 4 : index
    %c0_54 = arith.constant 0 : index
    %c0_55 = arith.constant 0 : index
    %157 = vector.load %arg16[%c4, %c0_54, %c0_55] : memref<8x8x512xf32, #tpu.memory_space<vmem>>, vector<1x8x512xf32>
    %158 = vector.shape_cast %157 : vector<1x8x512xf32> to vector<8x512xf32>
    %159 = arith.truncf %153 : vector<8x128xf32> to vector<8x128xbf16>
    %cst_56 = arith.constant dense<0.000000e+00> : vector<8x512xf32>
    %160 = tpu.matmul %159, %11, %cst_56 {dimension_numbers = #tpu.dot_dimension_numbers<[1], [0], [0], [1], [0, 0, 1, 1], [], []>} : vector<8x128xbf16>, vector<128x512xbf16>, vector<8x512xf32> -> vector<8x512xf32>
    %161 = arith.addf %158, %160 : vector<8x512xf32>
    %162 = vector.extract_strided_slice %161 {offsets = [0, 0], sizes = [8, 128], strides = [1, 1]} : vector<8x512xf32> to vector<8x128xf32>
    %163 = arith.negf %162 : vector<8x128xf32>
    %164 = math.exp %163 : vector<8x128xf32>
    %cst_57 = arith.constant 1.000000e+00 : f32
    %165 = vector.broadcast %cst_57 : f32 to vector<8x128xf32>
    %166 = arith.addf %165, %164 : vector<8x128xf32>
    %167 = arith.divf %165, %166 : vector<8x128xf32>
    %168 = vector.extract_strided_slice %161 {offsets = [0, 128], sizes = [8, 128], strides = [1, 1]} : vector<8x512xf32> to vector<8x128xf32>
    %169 = arith.negf %168 : vector<8x128xf32>
    %170 = math.exp %169 : vector<8x128xf32>
    %cst_58 = arith.constant 1.000000e+00 : f32
    %171 = vector.broadcast %cst_58 : f32 to vector<8x128xf32>
    %172 = arith.addf %171, %170 : vector<8x128xf32>
    %173 = arith.divf %171, %172 : vector<8x128xf32>
    %174 = vector.extract_strided_slice %161 {offsets = [0, 256], sizes = [8, 128], strides = [1, 1]} : vector<8x512xf32> to vector<8x128xf32>
    %175 = math.tanh %174 : vector<8x128xf32>
    %176 = vector.extract_strided_slice %161 {offsets = [0, 384], sizes = [8, 128], strides = [1, 1]} : vector<8x512xf32> to vector<8x128xf32>
    %177 = arith.negf %176 : vector<8x128xf32>
    %178 = math.exp %177 : vector<8x128xf32>
    %cst_59 = arith.constant 1.000000e+00 : f32
    %179 = vector.broadcast %cst_59 : f32 to vector<8x128xf32>
    %180 = arith.addf %179, %178 : vector<8x128xf32>
    %181 = arith.divf %179, %180 : vector<8x128xf32>
    %182 = arith.mulf %173, %151 : vector<8x128xf32>
    %183 = arith.mulf %167, %175 : vector<8x128xf32>
    %184 = arith.addf %182, %183 : vector<8x128xf32>
    %185 = math.tanh %184 : vector<8x128xf32>
    %186 = arith.mulf %181, %185 : vector<8x128xf32>
    %c4_60 = arith.constant 4 : index
    %c0_61 = arith.constant 0 : index
    %c0_62 = arith.constant 0 : index
    %187 = vector.load %arg17[%c4_60, %c0_61, %c0_62] : memref<8x8x128xf32, #tpu.memory_space<vmem>>, vector<1x8x128xf32>
    %188 = vector.shape_cast %187 : vector<1x8x128xf32> to vector<8x128xf32>
    %189 = vector.shape_cast %186 : vector<8x128xf32> to vector<1x8x128xf32>
    tpu.vector_store %arg17[%c4_60, %c0_61, %c0_62], %189 {strides = array<i32>} : memref<8x8x128xf32, #tpu.memory_space<vmem>>, vector<1x8x128xf32>,
    %c5 = arith.constant 5 : index
    %c0_63 = arith.constant 0 : index
    %c0_64 = arith.constant 0 : index
    %190 = vector.load %arg16[%c5, %c0_63, %c0_64] : memref<8x8x512xf32, #tpu.memory_space<vmem>>, vector<1x8x512xf32>
    %191 = vector.shape_cast %190 : vector<1x8x512xf32> to vector<8x512xf32>
    %192 = arith.truncf %186 : vector<8x128xf32> to vector<8x128xbf16>
    %cst_65 = arith.constant dense<0.000000e+00> : vector<8x512xf32>
    %193 = tpu.matmul %192, %11, %cst_65 {dimension_numbers = #tpu.dot_dimension_numbers<[1], [0], [0], [1], [0, 0, 1, 1], [], []>} : vector<8x128xbf16>, vector<128x512xbf16>, vector<8x512xf32> -> vector<8x512xf32>
    %194 = arith.addf %191, %193 : vector<8x512xf32>
    %195 = vector.extract_strided_slice %194 {offsets = [0, 0], sizes = [8, 128], strides = [1, 1]} : vector<8x512xf32> to vector<8x128xf32>
    %196 = arith.negf %195 : vector<8x128xf32>
    %197 = math.exp %196 : vector<8x128xf32>
    %cst_66 = arith.constant 1.000000e+00 : f32
    %198 = vector.broadcast %cst_66 : f32 to vector<8x128xf32>
    %199 = arith.addf %198, %197 : vector<8x128xf32>
    %200 = arith.divf %198, %199 : vector<8x128xf32>
    %201 = vector.extract_strided_slice %194 {offsets = [0, 128], sizes = [8, 128], strides = [1, 1]} : vector<8x512xf32> to vector<8x128xf32>
    %202 = arith.negf %201 : vector<8x128xf32>
    %203 = math.exp %202 : vector<8x128xf32>
    %cst_67 = arith.constant 1.000000e+00 : f32
    %204 = vector.broadcast %cst_67 : f32 to vector<8x128xf32>
    %205 = arith.addf %204, %203 : vector<8x128xf32>
    %206 = arith.divf %204, %205 : vector<8x128xf32>
    %207 = vector.extract_strided_slice %194 {offsets = [0, 256], sizes = [8, 128], strides = [1, 1]} : vector<8x512xf32> to vector<8x128xf32>
    %208 = math.tanh %207 : vector<8x128xf32>
    %209 = vector.extract_strided_slice %194 {offsets = [0, 384], sizes = [8, 128], strides = [1, 1]} : vector<8x512xf32> to vector<8x128xf32>
    %210 = arith.negf %209 : vector<8x128xf32>
    %211 = math.exp %210 : vector<8x128xf32>
    %cst_68 = arith.constant 1.000000e+00 : f32
    %212 = vector.broadcast %cst_68 : f32 to vector<8x128xf32>
    %213 = arith.addf %212, %211 : vector<8x128xf32>
    %214 = arith.divf %212, %213 : vector<8x128xf32>
    %215 = arith.mulf %206, %184 : vector<8x128xf32>
    %216 = arith.mulf %200, %208 : vector<8x128xf32>
    %217 = arith.addf %215, %216 : vector<8x128xf32>
    %218 = math.tanh %217 : vector<8x128xf32>
    %219 = arith.mulf %214, %218 : vector<8x128xf32>
    %c5_69 = arith.constant 5 : index
    %c0_70 = arith.constant 0 : index
    %c0_71 = arith.constant 0 : index
    %220 = vector.load %arg17[%c5_69, %c0_70, %c0_71] : memref<8x8x128xf32, #tpu.memory_space<vmem>>, vector<1x8x128xf32>
    %221 = vector.shape_cast %220 : vector<1x8x128xf32> to vector<8x128xf32>
    %222 = vector.shape_cast %219 : vector<8x128xf32> to vector<1x8x128xf32>
    tpu.vector_store %arg17[%c5_69, %c0_70, %c0_71], %222 {strides = array<i32>} : memref<8x8x128xf32, #tpu.memory_space<vmem>>, vector<1x8x128xf32>,
    %c6 = arith.constant 6 : index
    %c0_72 = arith.constant 0 : index
    %c0_73 = arith.constant 0 : index
    %223 = vector.load %arg16[%c6, %c0_72, %c0_73] : memref<8x8x512xf32, #tpu.memory_space<vmem>>, vector<1x8x512xf32>
    %224 = vector.shape_cast %223 : vector<1x8x512xf32> to vector<8x512xf32>
    %225 = arith.truncf %219 : vector<8x128xf32> to vector<8x128xbf16>
    %cst_74 = arith.constant dense<0.000000e+00> : vector<8x512xf32>
    %226 = tpu.matmul %225, %11, %cst_74 {dimension_numbers = #tpu.dot_dimension_numbers<[1], [0], [0], [1], [0, 0, 1, 1], [], []>} : vector<8x128xbf16>, vector<128x512xbf16>, vector<8x512xf32> -> vector<8x512xf32>
    %227 = arith.addf %224, %226 : vector<8x512xf32>
    %228 = vector.extract_strided_slice %227 {offsets = [0, 0], sizes = [8, 128], strides = [1, 1]} : vector<8x512xf32> to vector<8x128xf32>
    %229 = arith.negf %228 : vector<8x128xf32>
    %230 = math.exp %229 : vector<8x128xf32>
    %cst_75 = arith.constant 1.000000e+00 : f32
    %231 = vector.broadcast %cst_75 : f32 to vector<8x128xf32>
    %232 = arith.addf %231, %230 : vector<8x128xf32>
    %233 = arith.divf %231, %232 : vector<8x128xf32>
    %234 = vector.extract_strided_slice %227 {offsets = [0, 128], sizes = [8, 128], strides = [1, 1]} : vector<8x512xf32> to vector<8x128xf32>
    %235 = arith.negf %234 : vector<8x128xf32>
    %236 = math.exp %235 : vector<8x128xf32>
    %cst_76 = arith.constant 1.000000e+00 : f32
    %237 = vector.broadcast %cst_76 : f32 to vector<8x128xf32>
    %238 = arith.addf %237, %236 : vector<8x128xf32>
    %239 = arith.divf %237, %238 : vector<8x128xf32>
    %240 = vector.extract_strided_slice %227 {offsets = [0, 256], sizes = [8, 128], strides = [1, 1]} : vector<8x512xf32> to vector<8x128xf32>
    %241 = math.tanh %240 : vector<8x128xf32>
    %242 = vector.extract_strided_slice %227 {offsets = [0, 384], sizes = [8, 128], strides = [1, 1]} : vector<8x512xf32> to vector<8x128xf32>
    %243 = arith.negf %242 : vector<8x128xf32>
    %244 = math.exp %243 : vector<8x128xf32>
    %cst_77 = arith.constant 1.000000e+00 : f32
    %245 = vector.broadcast %cst_77 : f32 to vector<8x128xf32>
    %246 = arith.addf %245, %244 : vector<8x128xf32>
    %247 = arith.divf %245, %246 : vector<8x128xf32>
    %248 = arith.mulf %239, %217 : vector<8x128xf32>
    %249 = arith.mulf %233, %241 : vector<8x128xf32>
    %250 = arith.addf %248, %249 : vector<8x128xf32>
    %251 = math.tanh %250 : vector<8x128xf32>
    %252 = arith.mulf %247, %251 : vector<8x128xf32>
    %c6_78 = arith.constant 6 : index
    %c0_79 = arith.constant 0 : index
    %c0_80 = arith.constant 0 : index
    %253 = vector.load %arg17[%c6_78, %c0_79, %c0_80] : memref<8x8x128xf32, #tpu.memory_space<vmem>>, vector<1x8x128xf32>
    %254 = vector.shape_cast %253 : vector<1x8x128xf32> to vector<8x128xf32>
    %255 = vector.shape_cast %252 : vector<8x128xf32> to vector<1x8x128xf32>
    tpu.vector_store %arg17[%c6_78, %c0_79, %c0_80], %255 {strides = array<i32>} : memref<8x8x128xf32, #tpu.memory_space<vmem>>, vector<1x8x128xf32>,
    %c7 = arith.constant 7 : index
    %c0_81 = arith.constant 0 : index
    %c0_82 = arith.constant 0 : index
    %256 = vector.load %arg16[%c7, %c0_81, %c0_82] : memref<8x8x512xf32, #tpu.memory_space<vmem>>, vector<1x8x512xf32>
    %257 = vector.shape_cast %256 : vector<1x8x512xf32> to vector<8x512xf32>
    %258 = arith.truncf %252 : vector<8x128xf32> to vector<8x128xbf16>
    %cst_83 = arith.constant dense<0.000000e+00> : vector<8x512xf32>
    %259 = tpu.matmul %258, %11, %cst_83 {dimension_numbers = #tpu.dot_dimension_numbers<[1], [0], [0], [1], [0, 0, 1, 1], [], []>} : vector<8x128xbf16>, vector<128x512xbf16>, vector<8x512xf32> -> vector<8x512xf32>
    %260 = arith.addf %257, %259 : vector<8x512xf32>
    %261 = vector.extract_strided_slice %260 {offsets = [0, 0], sizes = [8, 128], strides = [1, 1]} : vector<8x512xf32> to vector<8x128xf32>
    %262 = arith.negf %261 : vector<8x128xf32>
    %263 = math.exp %262 : vector<8x128xf32>
    %cst_84 = arith.constant 1.000000e+00 : f32
    %264 = vector.broadcast %cst_84 : f32 to vector<8x128xf32>
    %265 = arith.addf %264, %263 : vector<8x128xf32>
    %266 = arith.divf %264, %265 : vector<8x128xf32>
    %267 = vector.extract_strided_slice %260 {offsets = [0, 128], sizes = [8, 128], strides = [1, 1]} : vector<8x512xf32> to vector<8x128xf32>
    %268 = arith.negf %267 : vector<8x128xf32>
    %269 = math.exp %268 : vector<8x128xf32>
    %cst_85 = arith.constant 1.000000e+00 : f32
    %270 = vector.broadcast %cst_85 : f32 to vector<8x128xf32>
    %271 = arith.addf %270, %269 : vector<8x128xf32>
    %272 = arith.divf %270, %271 : vector<8x128xf32>
    %273 = vector.extract_strided_slice %260 {offsets = [0, 256], sizes = [8, 128], strides = [1, 1]} : vector<8x512xf32> to vector<8x128xf32>
    %274 = math.tanh %273 : vector<8x128xf32>
    %275 = vector.extract_strided_slice %260 {offsets = [0, 384], sizes = [8, 128], strides = [1, 1]} : vector<8x512xf32> to vector<8x128xf32>
    %276 = arith.negf %275 : vector<8x128xf32>
    %277 = math.exp %276 : vector<8x128xf32>
    %cst_86 = arith.constant 1.000000e+00 : f32
    %278 = vector.broadcast %cst_86 : f32 to vector<8x128xf32>
    %279 = arith.addf %278, %277 : vector<8x128xf32>
    %280 = arith.divf %278, %279 : vector<8x128xf32>
    %281 = arith.mulf %272, %250 : vector<8x128xf32>
    %282 = arith.mulf %266, %274 : vector<8x128xf32>
    %283 = arith.addf %281, %282 : vector<8x128xf32>
    %284 = math.tanh %283 : vector<8x128xf32>
    %285 = arith.mulf %280, %284 : vector<8x128xf32>
    %c7_87 = arith.constant 7 : index
    %c0_88 = arith.constant 0 : index
    %c0_89 = arith.constant 0 : index
    %286 = vector.load %arg17[%c7_87, %c0_88, %c0_89] : memref<8x8x128xf32, #tpu.memory_space<vmem>>, vector<1x8x128xf32>
    %287 = vector.shape_cast %286 : vector<1x8x128xf32> to vector<8x128xf32>
    %288 = vector.shape_cast %285 : vector<8x128xf32> to vector<1x8x128xf32>
    tpu.vector_store %arg17[%c7_87, %c0_88, %c0_89], %288 {strides = array<i32>} : memref<8x8x128xf32, #tpu.memory_space<vmem>>, vector<1x8x128xf32>,
    %c0_i32_90 = arith.constant 0 : i32
    %289 = tpu.memref_slice %arg23[%c0_i32_90] : memref<5x!tpu.dma_semaphore, #tpu.memory_space<semaphore_mem>> -> memref<1x!tpu.dma_semaphore, #tpu.memory_space<semaphore_mem>>
    %290 = tpu.memref_squeeze %289 : memref<1x!tpu.dma_semaphore, #tpu.memory_space<semaphore_mem>> -> memref<!tpu.dma_semaphore, #tpu.memory_space<semaphore_mem>>
    tpu.wait_dma2 semaphore(%290 : memref<!tpu.dma_semaphore, #tpu.memory_space<semaphore_mem>>) src(%arg6 : memref<128x512xbf16, #tpu.memory_space<any>>) dst(%arg18 : memref<128x512xbf16, #tpu.memory_space<vmem>>)
    %c1_i32_91 = arith.constant 1 : i32
    %291 = tpu.memref_slice %arg23[%c1_i32_91] : memref<5x!tpu.dma_semaphore, #tpu.memory_space<semaphore_mem>> -> memref<1x!tpu.dma_semaphore, #tpu.memory_space<semaphore_mem>>
    %292 = tpu.memref_squeeze %291 : memref<1x!tpu.dma_semaphore, #tpu.memory_space<semaphore_mem>> -> memref<!tpu.dma_semaphore, #tpu.memory_space<semaphore_mem>>
    tpu.wait_dma2 semaphore(%292 : memref<!tpu.dma_semaphore, #tpu.memory_space<semaphore_mem>>) src(%arg7 : memref<128x512xbf16, #tpu.memory_space<any>>) dst(%arg19 : memref<128x512xbf16, #tpu.memory_space<vmem>>)
    %c0_92 = arith.constant 0 : index
    %c0_93 = arith.constant 0 : index
    %293 = vector.load %arg18[%c0_92, %c0_93] : memref<128x512xbf16, #tpu.memory_space<vmem>>, vector<128x512xbf16>
    %c0_94 = arith.constant 0 : index
    %c0_95 = arith.constant 0 : index
    %294 = vector.load %arg19[%c0_94, %c0_95] : memref<128x512xbf16, #tpu.memory_space<vmem>>, vector<128x512xbf16>
    %c0_96 = arith.constant 0 : index
    %c0_97 = arith.constant 0 : index
    %c0_98 = arith.constant 0 : index
    %295 = vector.load %arg17[%c0_96, %c0_97, %c0_98] : memref<8x8x128xf32, #tpu.memory_space<vmem>>, vector<8x8x128xf32>
    %296 = vector.shape_cast %295 : vector<8x8x128xf32> to vector<64x128xf32>
    %297 = arith.truncf %296 : vector<64x128xf32> to vector<64x128xbf16>
    %cst_99 = arith.constant dense<0.000000e+00> : vector<64x512xf32>
    %298 = tpu.matmul %297, %293, %cst_99 {dimension_numbers = #tpu.dot_dimension_numbers<[1], [0], [0], [1], [0, 0, 1, 1], [], []>} : vector<64x128xbf16>, vector<128x512xbf16>, vector<64x512xf32> -> vector<64x512xf32>
    %c0_100 = arith.constant 0 : index
    %c0_101 = arith.constant 0 : index
    %299 = vector.load %arg8[%c0_100, %c0_101] : memref<1x512xf32, #tpu.memory_space<vmem>>, vector<1x512xf32>
    %300 = vector.broadcast %299 : vector<1x512xf32> to vector<64x512xf32>
    %301 = arith.addf %298, %300 : vector<64x512xf32>
    %302 = vector.shape_cast %301 : vector<64x512xf32> to vector<8x8x512xf32>
    %c0_102 = arith.constant 0 : index
    %c0_103 = arith.constant 0 : index
    %c0_104 = arith.constant 0 : index
    %303 = vector.load %arg16[%c0_102, %c0_103, %c0_104] : memref<8x8x512xf32, #tpu.memory_space<vmem>>, vector<8x8x512xf32>
    tpu.vector_store %arg16[%c0_102, %c0_103, %c0_104], %302 {strides = array<i32>} : memref<8x8x512xf32, #tpu.memory_space<vmem>>, vector<8x8x512xf32>,
    %c1_105 = arith.constant 1 : index
    %c0_106 = arith.constant 0 : index
    %c0_107 = arith.constant 0 : index
    %304 = vector.load %arg1[%c1_105, %c0_106, %c0_107] : memref<2x8x128xf32, #tpu.memory_space<vmem>>, vector<1x8x128xf32>
    %305 = vector.shape_cast %304 : vector<1x8x128xf32> to vector<8x128xf32>
    %c1_108 = arith.constant 1 : index
    %c0_109 = arith.constant 0 : index
    %c0_110 = arith.constant 0 : index
    %306 = vector.load %arg2[%c1_108, %c0_109, %c0_110] : memref<2x8x128xf32, #tpu.memory_space<vmem>>, vector<1x8x128xf32>
    %307 = vector.shape_cast %306 : vector<1x8x128xf32> to vector<8x128xf32>
    %c0_111 = arith.constant 0 : index
    %c0_112 = arith.constant 0 : index
    %c0_113 = arith.constant 0 : index
    %308 = vector.load %arg16[%c0_111, %c0_112, %c0_113] : memref<8x8x512xf32, #tpu.memory_space<vmem>>, vector<1x8x512xf32>
    %309 = vector.shape_cast %308 : vector<1x8x512xf32> to vector<8x512xf32>
    %310 = arith.truncf %305 : vector<8x128xf32> to vector<8x128xbf16>
    %cst_114 = arith.constant dense<0.000000e+00> : vector<8x512xf32>
    %311 = tpu.matmul %310, %294, %cst_114 {dimension_numbers = #tpu.dot_dimension_numbers<[1], [0], [0], [1], [0, 0, 1, 1], [], []>} : vector<8x128xbf16>, vector<128x512xbf16>, vector<8x512xf32> -> vector<8x512xf32>
    %312 = arith.addf %309, %311 : vector<8x512xf32>
    %313 = vector.extract_strided_slice %312 {offsets = [0, 0], sizes = [8, 128], strides = [1, 1]} : vector<8x512xf32> to vector<8x128xf32>
    %314 = arith.negf %313 : vector<8x128xf32>
    %315 = math.exp %314 : vector<8x128xf32>
    %cst_115 = arith.constant 1.000000e+00 : f32
    %316 = vector.broadcast %cst_115 : f32 to vector<8x128xf32>
    %317 = arith.addf %316, %315 : vector<8x128xf32>
    %318 = arith.divf %316, %317 : vector<8x128xf32>
    %319 = vector.extract_strided_slice %312 {offsets = [0, 128], sizes = [8, 128], strides = [1, 1]} : vector<8x512xf32> to vector<8x128xf32>
    %320 = arith.negf %319 : vector<8x128xf32>
    %321 = math.exp %320 : vector<8x128xf32>
    %cst_116 = arith.constant 1.000000e+00 : f32
    %322 = vector.broadcast %cst_116 : f32 to vector<8x128xf32>
    %323 = arith.addf %322, %321 : vector<8x128xf32>
    %324 = arith.divf %322, %323 : vector<8x128xf32>
    %325 = vector.extract_strided_slice %312 {offsets = [0, 256], sizes = [8, 128], strides = [1, 1]} : vector<8x512xf32> to vector<8x128xf32>
    %326 = math.tanh %325 : vector<8x128xf32>
    %327 = vector.extract_strided_slice %312 {offsets = [0, 384], sizes = [8, 128], strides = [1, 1]} : vector<8x512xf32> to vector<8x128xf32>
    %328 = arith.negf %327 : vector<8x128xf32>
    %329 = math.exp %328 : vector<8x128xf32>
    %cst_117 = arith.constant 1.000000e+00 : f32
    %330 = vector.broadcast %cst_117 : f32 to vector<8x128xf32>
    %331 = arith.addf %330, %329 : vector<8x128xf32>
    %332 = arith.divf %330, %331 : vector<8x128xf32>
    %333 = arith.mulf %324, %307 : vector<8x128xf32>
    %334 = arith.mulf %318, %326 : vector<8x128xf32>
    %335 = arith.addf %333, %334 : vector<8x128xf32>
    %336 = math.tanh %335 : vector<8x128xf32>
    %337 = arith.mulf %332, %336 : vector<8x128xf32>
    %c1_118 = arith.constant 1 : index
    %c0_119 = arith.constant 0 : index
    %c0_120 = arith.constant 0 : index
    %338 = vector.load %arg16[%c1_118, %c0_119, %c0_120] : memref<8x8x512xf32, #tpu.memory_space<vmem>>, vector<1x8x512xf32>
    %339 = vector.shape_cast %338 : vector<1x8x512xf32> to vector<8x512xf32>
    %340 = arith.truncf %337 : vector<8x128xf32> to vector<8x128xbf16>
    %cst_121 = arith.constant dense<0.000000e+00> : vector<8x512xf32>
    %341 = tpu.matmul %340, %294, %cst_121 {dimension_numbers = #tpu.dot_dimension_numbers<[1], [0], [0], [1], [0, 0, 1, 1], [], []>} : vector<8x128xbf16>, vector<128x512xbf16>, vector<8x512xf32> -> vector<8x512xf32>
    %342 = arith.addf %339, %341 : vector<8x512xf32>
    %343 = vector.extract_strided_slice %342 {offsets = [0, 0], sizes = [8, 128], strides = [1, 1]} : vector<8x512xf32> to vector<8x128xf32>
    %344 = arith.negf %343 : vector<8x128xf32>
    %345 = math.exp %344 : vector<8x128xf32>
    %cst_122 = arith.constant 1.000000e+00 : f32
    %346 = vector.broadcast %cst_122 : f32 to vector<8x128xf32>
    %347 = arith.addf %346, %345 : vector<8x128xf32>
    %348 = arith.divf %346, %347 : vector<8x128xf32>
    %349 = vector.extract_strided_slice %342 {offsets = [0, 128], sizes = [8, 128], strides = [1, 1]} : vector<8x512xf32> to vector<8x128xf32>
    %350 = arith.negf %349 : vector<8x128xf32>
    %351 = math.exp %350 : vector<8x128xf32>
    %cst_123 = arith.constant 1.000000e+00 : f32
    %352 = vector.broadcast %cst_123 : f32 to vector<8x128xf32>
    %353 = arith.addf %352, %351 : vector<8x128xf32>
    %354 = arith.divf %352, %353 : vector<8x128xf32>
    %355 = vector.extract_strided_slice %342 {offsets = [0, 256], sizes = [8, 128], strides = [1, 1]} : vector<8x512xf32> to vector<8x128xf32>
    %356 = math.tanh %355 : vector<8x128xf32>
    %357 = vector.extract_strided_slice %342 {offsets = [0, 384], sizes = [8, 128], strides = [1, 1]} : vector<8x512xf32> to vector<8x128xf32>
    %358 = arith.negf %357 : vector<8x128xf32>
    %359 = math.exp %358 : vector<8x128xf32>
    %cst_124 = arith.constant 1.000000e+00 : f32
    %360 = vector.broadcast %cst_124 : f32 to vector<8x128xf32>
    %361 = arith.addf %360, %359 : vector<8x128xf32>
    %362 = arith.divf %360, %361 : vector<8x128xf32>
    %363 = arith.mulf %354, %335 : vector<8x128xf32>
    %364 = arith.mulf %348, %356 : vector<8x128xf32>
    %365 = arith.addf %363, %364 : vector<8x128xf32>
    %366 = math.tanh %365 : vector<8x128xf32>
    %367 = arith.mulf %362, %366 : vector<8x128xf32>
    %c2_125 = arith.constant 2 : index
    %c0_126 = arith.constant 0 : index
    %c0_127 = arith.constant 0 : index
    %368 = vector.load %arg16[%c2_125, %c0_126, %c0_127] : memref<8x8x512xf32, #tpu.memory_space<vmem>>, vector<1x8x512xf32>
    %369 = vector.shape_cast %368 : vector<1x8x512xf32> to vector<8x512xf32>
    %370 = arith.truncf %367 : vector<8x128xf32> to vector<8x128xbf16>
    %cst_128 = arith.constant dense<0.000000e+00> : vector<8x512xf32>
    %371 = tpu.matmul %370, %294, %cst_128 {dimension_numbers = #tpu.dot_dimension_numbers<[1], [0], [0], [1], [0, 0, 1, 1], [], []>} : vector<8x128xbf16>, vector<128x512xbf16>, vector<8x512xf32> -> vector<8x512xf32>
    %372 = arith.addf %369, %371 : vector<8x512xf32>
    %373 = vector.extract_strided_slice %372 {offsets = [0, 0], sizes = [8, 128], strides = [1, 1]} : vector<8x512xf32> to vector<8x128xf32>
    %374 = arith.negf %373 : vector<8x128xf32>
    %375 = math.exp %374 : vector<8x128xf32>
    %cst_129 = arith.constant 1.000000e+00 : f32
    %376 = vector.broadcast %cst_129 : f32 to vector<8x128xf32>
    %377 = arith.addf %376, %375 : vector<8x128xf32>
    %378 = arith.divf %376, %377 : vector<8x128xf32>
    %379 = vector.extract_strided_slice %372 {offsets = [0, 128], sizes = [8, 128], strides = [1, 1]} : vector<8x512xf32> to vector<8x128xf32>
    %380 = arith.negf %379 : vector<8x128xf32>
    %381 = math.exp %380 : vector<8x128xf32>
    %cst_130 = arith.constant 1.000000e+00 : f32
    %382 = vector.broadcast %cst_130 : f32 to vector<8x128xf32>
    %383 = arith.addf %382, %381 : vector<8x128xf32>
    %384 = arith.divf %382, %383 : vector<8x128xf32>
    %385 = vector.extract_strided_slice %372 {offsets = [0, 256], sizes = [8, 128], strides = [1, 1]} : vector<8x512xf32> to vector<8x128xf32>
    %386 = math.tanh %385 : vector<8x128xf32>
    %387 = vector.extract_strided_slice %372 {offsets = [0, 384], sizes = [8, 128], strides = [1, 1]} : vector<8x512xf32> to vector<8x128xf32>
    %388 = arith.negf %387 : vector<8x128xf32>
    %389 = math.exp %388 : vector<8x128xf32>
    %cst_131 = arith.constant 1.000000e+00 : f32
    %390 = vector.broadcast %cst_131 : f32 to vector<8x128xf32>
    %391 = arith.addf %390, %389 : vector<8x128xf32>
    %392 = arith.divf %390, %391 : vector<8x128xf32>
    %393 = arith.mulf %384, %365 : vector<8x128xf32>
    %394 = arith.mulf %378, %386 : vector<8x128xf32>
    %395 = arith.addf %393, %394 : vector<8x128xf32>
    %396 = math.tanh %395 : vector<8x128xf32>
    %397 = arith.mulf %392, %396 : vector<8x128xf32>
    %c3_132 = arith.constant 3 : index
    %c0_133 = arith.constant 0 : index
    %c0_134 = arith.constant 0 : index
    %398 = vector.load %arg16[%c3_132, %c0_133, %c0_134] : memref<8x8x512xf32, #tpu.memory_space<vmem>>, vector<1x8x512xf32>
    %399 = vector.shape_cast %398 : vector<1x8x512xf32> to vector<8x512xf32>
    %400 = arith.truncf %397 : vector<8x128xf32> to vector<8x128xbf16>
    %cst_135 = arith.constant dense<0.000000e+00> : vector<8x512xf32>
    %401 = tpu.matmul %400, %294, %cst_135 {dimension_numbers = #tpu.dot_dimension_numbers<[1], [0], [0], [1], [0, 0, 1, 1], [], []>} : vector<8x128xbf16>, vector<128x512xbf16>, vector<8x512xf32> -> vector<8x512xf32>
    %402 = arith.addf %399, %401 : vector<8x512xf32>
    %403 = vector.extract_strided_slice %402 {offsets = [0, 0], sizes = [8, 128], strides = [1, 1]} : vector<8x512xf32> to vector<8x128xf32>
    %404 = arith.negf %403 : vector<8x128xf32>
    %405 = math.exp %404 : vector<8x128xf32>
    %cst_136 = arith.constant 1.000000e+00 : f32
    %406 = vector.broadcast %cst_136 : f32 to vector<8x128xf32>
    %407 = arith.addf %406, %405 : vector<8x128xf32>
    %408 = arith.divf %406, %407 : vector<8x128xf32>
    %409 = vector.extract_strided_slice %402 {offsets = [0, 128], sizes = [8, 128], strides = [1, 1]} : vector<8x512xf32> to vector<8x128xf32>
    %410 = arith.negf %409 : vector<8x128xf32>
    %411 = math.exp %410 : vector<8x128xf32>
    %cst_137 = arith.constant 1.000000e+00 : f32
    %412 = vector.broadcast %cst_137 : f32 to vector<8x128xf32>
    %413 = arith.addf %412, %411 : vector<8x128xf32>
    %414 = arith.divf %412, %413 : vector<8x128xf32>
    %415 = vector.extract_strided_slice %402 {offsets = [0, 256], sizes = [8, 128], strides = [1, 1]} : vector<8x512xf32> to vector<8x128xf32>
    %416 = math.tanh %415 : vector<8x128xf32>
    %417 = vector.extract_strided_slice %402 {offsets = [0, 384], sizes = [8, 128], strides = [1, 1]} : vector<8x512xf32> to vector<8x128xf32>
    %418 = arith.negf %417 : vector<8x128xf32>
    %419 = math.exp %418 : vector<8x128xf32>
    %cst_138 = arith.constant 1.000000e+00 : f32
    %420 = vector.broadcast %cst_138 : f32 to vector<8x128xf32>
    %421 = arith.addf %420, %419 : vector<8x128xf32>
    %422 = arith.divf %420, %421 : vector<8x128xf32>
    %423 = arith.mulf %414, %395 : vector<8x128xf32>
    %424 = arith.mulf %408, %416 : vector<8x128xf32>
    %425 = arith.addf %423, %424 : vector<8x128xf32>
    %426 = math.tanh %425 : vector<8x128xf32>
    %427 = arith.mulf %422, %426 : vector<8x128xf32>
    %c4_139 = arith.constant 4 : index
    %c0_140 = arith.constant 0 : index
    %c0_141 = arith.constant 0 : index
    %428 = vector.load %arg16[%c4_139, %c0_140, %c0_141] : memref<8x8x512xf32, #tpu.memory_space<vmem>>, vector<1x8x512xf32>
    %429 = vector.shape_cast %428 : vector<1x8x512xf32> to vector<8x512xf32>
    %430 = arith.truncf %427 : vector<8x128xf32> to vector<8x128xbf16>
    %cst_142 = arith.constant dense<0.000000e+00> : vector<8x512xf32>
    %431 = tpu.matmul %430, %294, %cst_142 {dimension_numbers = #tpu.dot_dimension_numbers<[1], [0], [0], [1], [0, 0, 1, 1], [], []>} : vector<8x128xbf16>, vector<128x512xbf16>, vector<8x512xf32> -> vector<8x512xf32>
    %432 = arith.addf %429, %431 : vector<8x512xf32>
    %433 = vector.extract_strided_slice %432 {offsets = [0, 0], sizes = [8, 128], strides = [1, 1]} : vector<8x512xf32> to vector<8x128xf32>
    %434 = arith.negf %433 : vector<8x128xf32>
    %435 = math.exp %434 : vector<8x128xf32>
    %cst_143 = arith.constant 1.000000e+00 : f32
    %436 = vector.broadcast %cst_143 : f32 to vector<8x128xf32>
    %437 = arith.addf %436, %435 : vector<8x128xf32>
    %438 = arith.divf %436, %437 : vector<8x128xf32>
    %439 = vector.extract_strided_slice %432 {offsets = [0, 128], sizes = [8, 128], strides = [1, 1]} : vector<8x512xf32> to vector<8x128xf32>
    %440 = arith.negf %439 : vector<8x128xf32>
    %441 = math.exp %440 : vector<8x128xf32>
    %cst_144 = arith.constant 1.000000e+00 : f32
    %442 = vector.broadcast %cst_144 : f32 to vector<8x128xf32>
    %443 = arith.addf %442, %441 : vector<8x128xf32>
    %444 = arith.divf %442, %443 : vector<8x128xf32>
    %445 = vector.extract_strided_slice %432 {offsets = [0, 256], sizes = [8, 128], strides = [1, 1]} : vector<8x512xf32> to vector<8x128xf32>
    %446 = math.tanh %445 : vector<8x128xf32>
    %447 = vector.extract_strided_slice %432 {offsets = [0, 384], sizes = [8, 128], strides = [1, 1]} : vector<8x512xf32> to vector<8x128xf32>
    %448 = arith.negf %447 : vector<8x128xf32>
    %449 = math.exp %448 : vector<8x128xf32>
    %cst_145 = arith.constant 1.000000e+00 : f32
    %450 = vector.broadcast %cst_145 : f32 to vector<8x128xf32>
    %451 = arith.addf %450, %449 : vector<8x128xf32>
    %452 = arith.divf %450, %451 : vector<8x128xf32>
    %453 = arith.mulf %444, %425 : vector<8x128xf32>
    %454 = arith.mulf %438, %446 : vector<8x128xf32>
    %455 = arith.addf %453, %454 : vector<8x128xf32>
    %456 = math.tanh %455 : vector<8x128xf32>
    %457 = arith.mulf %452, %456 : vector<8x128xf32>
    %c5_146 = arith.constant 5 : index
    %c0_147 = arith.constant 0 : index
    %c0_148 = arith.constant 0 : index
    %458 = vector.load %arg16[%c5_146, %c0_147, %c0_148] : memref<8x8x512xf32, #tpu.memory_space<vmem>>, vector<1x8x512xf32>
    %459 = vector.shape_cast %458 : vector<1x8x512xf32> to vector<8x512xf32>
    %460 = arith.truncf %457 : vector<8x128xf32> to vector<8x128xbf16>
    %cst_149 = arith.constant dense<0.000000e+00> : vector<8x512xf32>
    %461 = tpu.matmul %460, %294, %cst_149 {dimension_numbers = #tpu.dot_dimension_numbers<[1], [0], [0], [1], [0, 0, 1, 1], [], []>} : vector<8x128xbf16>, vector<128x512xbf16>, vector<8x512xf32> -> vector<8x512xf32>
    %462 = arith.addf %459, %461 : vector<8x512xf32>
    %463 = vector.extract_strided_slice %462 {offsets = [0, 0], sizes = [8, 128], strides = [1, 1]} : vector<8x512xf32> to vector<8x128xf32>
    %464 = arith.negf %463 : vector<8x128xf32>
    %465 = math.exp %464 : vector<8x128xf32>
    %cst_150 = arith.constant 1.000000e+00 : f32
    %466 = vector.broadcast %cst_150 : f32 to vector<8x128xf32>
    %467 = arith.addf %466, %465 : vector<8x128xf32>
    %468 = arith.divf %466, %467 : vector<8x128xf32>
    %469 = vector.extract_strided_slice %462 {offsets = [0, 128], sizes = [8, 128], strides = [1, 1]} : vector<8x512xf32> to vector<8x128xf32>
    %470 = arith.negf %469 : vector<8x128xf32>
    %471 = math.exp %470 : vector<8x128xf32>
    %cst_151 = arith.constant 1.000000e+00 : f32
    %472 = vector.broadcast %cst_151 : f32 to vector<8x128xf32>
    %473 = arith.addf %472, %471 : vector<8x128xf32>
    %474 = arith.divf %472, %473 : vector<8x128xf32>
    %475 = vector.extract_strided_slice %462 {offsets = [0, 256], sizes = [8, 128], strides = [1, 1]} : vector<8x512xf32> to vector<8x128xf32>
    %476 = math.tanh %475 : vector<8x128xf32>
    %477 = vector.extract_strided_slice %462 {offsets = [0, 384], sizes = [8, 128], strides = [1, 1]} : vector<8x512xf32> to vector<8x128xf32>
    %478 = arith.negf %477 : vector<8x128xf32>
    %479 = math.exp %478 : vector<8x128xf32>
    %cst_152 = arith.constant 1.000000e+00 : f32
    %480 = vector.broadcast %cst_152 : f32 to vector<8x128xf32>
    %481 = arith.addf %480, %479 : vector<8x128xf32>
    %482 = arith.divf %480, %481 : vector<8x128xf32>
    %483 = arith.mulf %474, %455 : vector<8x128xf32>
    %484 = arith.mulf %468, %476 : vector<8x128xf32>
    %485 = arith.addf %483, %484 : vector<8x128xf32>
    %486 = math.tanh %485 : vector<8x128xf32>
    %487 = arith.mulf %482, %486 : vector<8x128xf32>
    %c6_153 = arith.constant 6 : index
    %c0_154 = arith.constant 0 : index
    %c0_155 = arith.constant 0 : index
    %488 = vector.load %arg16[%c6_153, %c0_154, %c0_155] : memref<8x8x512xf32, #tpu.memory_space<vmem>>, vector<1x8x512xf32>
    %489 = vector.shape_cast %488 : vector<1x8x512xf32> to vector<8x512xf32>
    %490 = arith.truncf %487 : vector<8x128xf32> to vector<8x128xbf16>
    %cst_156 = arith.constant dense<0.000000e+00> : vector<8x512xf32>
    %491 = tpu.matmul %490, %294, %cst_156 {dimension_numbers = #tpu.dot_dimension_numbers<[1], [0], [0], [1], [0, 0, 1, 1], [], []>} : vector<8x128xbf16>, vector<128x512xbf16>, vector<8x512xf32> -> vector<8x512xf32>
    %492 = arith.addf %489, %491 : vector<8x512xf32>
    %493 = vector.extract_strided_slice %492 {offsets = [0, 0], sizes = [8, 128], strides = [1, 1]} : vector<8x512xf32> to vector<8x128xf32>
    %494 = arith.negf %493 : vector<8x128xf32>
    %495 = math.exp %494 : vector<8x128xf32>
    %cst_157 = arith.constant 1.000000e+00 : f32
    %496 = vector.broadcast %cst_157 : f32 to vector<8x128xf32>
    %497 = arith.addf %496, %495 : vector<8x128xf32>
    %498 = arith.divf %496, %497 : vector<8x128xf32>
    %499 = vector.extract_strided_slice %492 {offsets = [0, 128], sizes = [8, 128], strides = [1, 1]} : vector<8x512xf32> to vector<8x128xf32>
    %500 = arith.negf %499 : vector<8x128xf32>
    %501 = math.exp %500 : vector<8x128xf32>
    %cst_158 = arith.constant 1.000000e+00 : f32
    %502 = vector.broadcast %cst_158 : f32 to vector<8x128xf32>
    %503 = arith.addf %502, %501 : vector<8x128xf32>
    %504 = arith.divf %502, %503 : vector<8x128xf32>
    %505 = vector.extract_strided_slice %492 {offsets = [0, 256], sizes = [8, 128], strides = [1, 1]} : vector<8x512xf32> to vector<8x128xf32>
    %506 = math.tanh %505 : vector<8x128xf32>
    %507 = vector.extract_strided_slice %492 {offsets = [0, 384], sizes = [8, 128], strides = [1, 1]} : vector<8x512xf32> to vector<8x128xf32>
    %508 = arith.negf %507 : vector<8x128xf32>
    %509 = math.exp %508 : vector<8x128xf32>
    %cst_159 = arith.constant 1.000000e+00 : f32
    %510 = vector.broadcast %cst_159 : f32 to vector<8x128xf32>
    %511 = arith.addf %510, %509 : vector<8x128xf32>
    %512 = arith.divf %510, %511 : vector<8x128xf32>
    %513 = arith.mulf %504, %485 : vector<8x128xf32>
    %514 = arith.mulf %498, %506 : vector<8x128xf32>
    %515 = arith.addf %513, %514 : vector<8x128xf32>
    %516 = math.tanh %515 : vector<8x128xf32>
    %517 = arith.mulf %512, %516 : vector<8x128xf32>
    %c7_160 = arith.constant 7 : index
    %c0_161 = arith.constant 0 : index
    %c0_162 = arith.constant 0 : index
    %518 = vector.load %arg16[%c7_160, %c0_161, %c0_162] : memref<8x8x512xf32, #tpu.memory_space<vmem>>, vector<1x8x512xf32>
    %519 = vector.shape_cast %518 : vector<1x8x512xf32> to vector<8x512xf32>
    %520 = arith.truncf %517 : vector<8x128xf32> to vector<8x128xbf16>
    %cst_163 = arith.constant dense<0.000000e+00> : vector<8x512xf32>
    %521 = tpu.matmul %520, %294, %cst_163 {dimension_numbers = #tpu.dot_dimension_numbers<[1], [0], [0], [1], [0, 0, 1, 1], [], []>} : vector<8x128xbf16>, vector<128x512xbf16>, vector<8x512xf32> -> vector<8x512xf32>
    %522 = arith.addf %519, %521 : vector<8x512xf32>
    %523 = vector.extract_strided_slice %522 {offsets = [0, 0], sizes = [8, 128], strides = [1, 1]} : vector<8x512xf32> to vector<8x128xf32>
    %524 = arith.negf %523 : vector<8x128xf32>
    %525 = math.exp %524 : vector<8x128xf32>
    %cst_164 = arith.constant 1.000000e+00 : f32
    %526 = vector.broadcast %cst_164 : f32 to vector<8x128xf32>
    %527 = arith.addf %526, %525 : vector<8x128xf32>
    %528 = arith.divf %526, %527 : vector<8x128xf32>
    %529 = vector.extract_strided_slice %522 {offsets = [0, 128], sizes = [8, 128], strides = [1, 1]} : vector<8x512xf32> to vector<8x128xf32>
    %530 = arith.negf %529 : vector<8x128xf32>
    %531 = math.exp %530 : vector<8x128xf32>
    %cst_165 = arith.constant 1.000000e+00 : f32
    %532 = vector.broadcast %cst_165 : f32 to vector<8x128xf32>
    %533 = arith.addf %532, %531 : vector<8x128xf32>
    %534 = arith.divf %532, %533 : vector<8x128xf32>
    %535 = vector.extract_strided_slice %522 {offsets = [0, 256], sizes = [8, 128], strides = [1, 1]} : vector<8x512xf32> to vector<8x128xf32>
    %536 = math.tanh %535 : vector<8x128xf32>
    %537 = vector.extract_strided_slice %522 {offsets = [0, 384], sizes = [8, 128], strides = [1, 1]} : vector<8x512xf32> to vector<8x128xf32>
    %538 = arith.negf %537 : vector<8x128xf32>
    %539 = math.exp %538 : vector<8x128xf32>
    %cst_166 = arith.constant 1.000000e+00 : f32
    %540 = vector.broadcast %cst_166 : f32 to vector<8x128xf32>
    %541 = arith.addf %540, %539 : vector<8x128xf32>
    %542 = arith.divf %540, %541 : vector<8x128xf32>
    %543 = arith.mulf %534, %515 : vector<8x128xf32>
    %544 = arith.mulf %528, %536 : vector<8x128xf32>
    %545 = arith.addf %543, %544 : vector<8x128xf32>
    %546 = math.tanh %545 : vector<8x128xf32>
    %547 = arith.mulf %542, %546 : vector<8x128xf32>
    %c2_i32_167 = arith.constant 2 : i32
    %548 = tpu.memref_slice %arg23[%c2_i32_167] : memref<5x!tpu.dma_semaphore, #tpu.memory_space<semaphore_mem>> -> memref<1x!tpu.dma_semaphore, #tpu.memory_space<semaphore_mem>>
    %549 = tpu.memref_squeeze %548 : memref<1x!tpu.dma_semaphore, #tpu.memory_space<semaphore_mem>> -> memref<!tpu.dma_semaphore, #tpu.memory_space<semaphore_mem>>
    tpu.wait_dma2 semaphore(%549 : memref<!tpu.dma_semaphore, #tpu.memory_space<semaphore_mem>>) src(%arg9 : memref<128x256xbf16, #tpu.memory_space<any>>) dst(%arg20 : memref<128x256xbf16, #tpu.memory_space<vmem>>)
    %c3_i32_168 = arith.constant 3 : i32
    %550 = tpu.memref_slice %arg23[%c3_i32_168] : memref<5x!tpu.dma_semaphore, #tpu.memory_space<semaphore_mem>> -> memref<1x!tpu.dma_semaphore, #tpu.memory_space<semaphore_mem>>
    %551 = tpu.memref_squeeze %550 : memref<1x!tpu.dma_semaphore, #tpu.memory_space<semaphore_mem>> -> memref<!tpu.dma_semaphore, #tpu.memory_space<semaphore_mem>>
    tpu.wait_dma2 semaphore(%551 : memref<!tpu.dma_semaphore, #tpu.memory_space<semaphore_mem>>) src(%arg11 : memref<256x128xbf16, #tpu.memory_space<any>>) dst(%arg21 : memref<256x128xbf16, #tpu.memory_space<vmem>>)
    %c4_i32_169 = arith.constant 4 : i32
    %552 = tpu.memref_slice %arg23[%c4_i32_169] : memref<5x!tpu.dma_semaphore, #tpu.memory_space<semaphore_mem>> -> memref<1x!tpu.dma_semaphore, #tpu.memory_space<semaphore_mem>>
    %553 = tpu.memref_squeeze %552 : memref<1x!tpu.dma_semaphore, #tpu.memory_space<semaphore_mem>> -> memref<!tpu.dma_semaphore, #tpu.memory_space<semaphore_mem>>
    tpu.wait_dma2 semaphore(%553 : memref<!tpu.dma_semaphore, #tpu.memory_space<semaphore_mem>>) src(%arg13 : memref<128x128xbf16, #tpu.memory_space<any>>) dst(%arg22 : memref<128x128xbf16, #tpu.memory_space<vmem>>)
    %c0_170 = arith.constant 0 : index
    %c0_171 = arith.constant 0 : index
    %554 = vector.load %arg20[%c0_170, %c0_171] : memref<128x256xbf16, #tpu.memory_space<vmem>>, vector<128x256xbf16>
    %c0_172 = arith.constant 0 : index
    %c0_173 = arith.constant 0 : index
    %555 = vector.load %arg21[%c0_172, %c0_173] : memref<256x128xbf16, #tpu.memory_space<vmem>>, vector<256x128xbf16>
    %c0_174 = arith.constant 0 : index
    %c0_175 = arith.constant 0 : index
    %556 = vector.load %arg22[%c0_174, %c0_175] : memref<128x128xbf16, #tpu.memory_space<vmem>>, vector<128x128xbf16>
    %557 = arith.truncf %547 : vector<8x128xf32> to vector<8x128xbf16>
    %cst_176 = arith.constant dense<0.000000e+00> : vector<8x256xf32>
    %558 = tpu.matmul %557, %554, %cst_176 {dimension_numbers = #tpu.dot_dimension_numbers<[1], [0], [0], [1], [0, 0, 1, 1], [], []>} : vector<8x128xbf16>, vector<128x256xbf16>, vector<8x256xf32> -> vector<8x256xf32>
    %c0_177 = arith.constant 0 : index
    %c0_178 = arith.constant 0 : index
    %559 = vector.load %arg10[%c0_177, %c0_178] : memref<1x256xf32, #tpu.memory_space<vmem>>, vector<1x256xf32>
    %560 = vector.broadcast %559 : vector<1x256xf32> to vector<8x256xf32>
    %561 = arith.addf %558, %560 : vector<8x256xf32>
    %cst_179 = arith.constant 0.000000e+00 : f32
    %562 = vector.broadcast %cst_179 : f32 to vector<8x256xf32>
    %563 = arith.maximumf %561, %562 : vector<8x256xf32>
    %564 = arith.truncf %563 : vector<8x256xf32> to vector<8x256xbf16>
    %cst_180 = arith.constant dense<0.000000e+00> : vector<8x128xf32>
    %565 = tpu.matmul %564, %555, %cst_180 {dimension_numbers = #tpu.dot_dimension_numbers<[1], [0], [0], [1], [0, 0, 1, 1], [], []>} : vector<8x256xbf16>, vector<256x128xbf16>, vector<8x128xf32> -> vector<8x128xf32>
    %c0_181 = arith.constant 0 : index
    %c0_182 = arith.constant 0 : index
    %566 = vector.load %arg12[%c0_181, %c0_182] : memref<1x128xf32, #tpu.memory_space<vmem>>, vector<1x128xf32>
    %567 = vector.broadcast %566 : vector<1x128xf32> to vector<8x128xf32>
    %568 = arith.addf %565, %567 : vector<8x128xf32>
    %cst_183 = arith.constant 0.000000e+00 : f32
    %569 = vector.broadcast %cst_183 : f32 to vector<8x128xf32>
    %570 = arith.maximumf %568, %569 : vector<8x128xf32>
    %571 = arith.truncf %570 : vector<8x128xf32> to vector<8x128xbf16>
    %cst_184 = arith.constant dense<0.000000e+00> : vector<8x128xf32>
    %572 = tpu.matmul %571, %556, %cst_184 {dimension_numbers = #tpu.dot_dimension_numbers<[1], [0], [0], [1], [0, 0, 1, 1], [], []>} : vector<8x128xbf16>, vector<128x128xbf16>, vector<8x128xf32> -> vector<8x128xf32>
    %c0_185 = arith.constant 0 : index
    %c0_186 = arith.constant 0 : index
    %573 = vector.load %arg14[%c0_185, %c0_186] : memref<1x128xf32, #tpu.memory_space<vmem>>, vector<1x128xf32>
    %574 = vector.broadcast %573 : vector<1x128xf32> to vector<8x128xf32>
    %575 = arith.addf %572, %574 : vector<8x128xf32>
    %cst_187 = arith.constant dense<0xFF800000> : vector<8xf32>
    %576 = vector.multi_reduction <maximumf>, %575, %cst_187 [1] : vector<8x128xf32> to vector<8xf32>
    %577 = vector.shape_cast %576 : vector<8xf32> to vector<8x1xf32>
    %578 = vector.broadcast %577 : vector<8x1xf32> to vector<8x128xf32>
    %579 = arith.subf %575, %578 : vector<8x128xf32>
    %580 = math.exp %579 : vector<8x128xf32>
    %cst_188 = arith.constant dense<0.000000e+00> : vector<8xf32>
    %581 = vector.multi_reduction <add>, %580, %cst_188 [1] : vector<8x128xf32> to vector<8xf32>
    %582 = vector.shape_cast %581 : vector<8xf32> to vector<8x1xf32>
    %583 = vector.broadcast %582 : vector<8x1xf32> to vector<8x128xf32>
    %584 = arith.divf %580, %583 : vector<8x128xf32>
    %c0_189 = arith.constant 0 : index
    %c0_190 = arith.constant 0 : index
    %585 = vector.load %arg15[%c0_189, %c0_190] : memref<8x128xf32, #tpu.memory_space<vmem>>, vector<8x128xf32>
    tpu.vector_store %arg15[%c0_189, %c0_190], %584 {strides = array<i32>} : memref<8x128xf32, #tpu.memory_space<vmem>>, vector<8x128xf32>,
    return
  }
}

</mosaic_0001>

<bundles_post_ra>
// kernel: neural_network_forward.1
= control target key start
LH: loop header
LB: loop body
LE: loop exit
PB: predicated region body
PF: predicated region fallthrough
CT: control target
= control target key end

     0   :  { %20 = vsyncpa [#allocation11], 0  ;;  %s5630_s0 = inlined_call_operand.vmem [shape: f32[8,8,128], index: 0, kind: input, shape index: {}]   ;;  %s5631_s1 = inlined_call_operand.vmem [shape: f32[2,8,128], index: 1, kind: input, shape index: {}]   ;;  %s5632_s2 = inlined_call_operand.vmem [shape: f32[2,8,128], index: 2, kind: input, shape index: {}]   ;;  %s5633_s3 = inlined_call_operand.vmem [shape: bf16[128,512], index: 3, kind: input, shape index: {}]   ;;  %s5634_s4 = inlined_call_operand.hbm [shape: bf16[128,512], index: 4, kind: input, shape index: {}]   ;;  %s5635_s5 = inlined_call_operand.vmem [shape: f32[1,512], index: 5, kind: input, shape index: {}]   ;;  %s5636_s6 = inlined_call_operand.hbm [shape: bf16[128,512], index: 6, kind: input, shape index: {}]   ;;  %s5637_s7 = inlined_call_operand.hbm [shape: bf16[128,512], index: 7, kind: input, shape index: {}]   ;;  %s5638_s8 = inlined_call_operand.hbm [shape: f32[1,512], index: 8, kind: input, shape index: {}]   ;;  %s5639_s9 = inlined_call_operand.vmem [shape: bf16[128,256], index: 9, kind: input, shape index: {}]   ;;  %s5640_s10 = inlined_call_operand.vmem [shape: f32[1,256], index: 10, kind: input, shape index: {}]   ;;  %s5641_s11 = inlined_call_operand.hbm [shape: bf16[256,128], index: 11, kind: input, shape index: {}]   ;;  %s5642_s12 = inlined_call_operand.vmem [shape: f32[1,128], index: 12, kind: input, shape index: {}]   ;;  %s5643_s13 = inlined_call_operand.vmem [shape: bf16[128,128], index: 13, kind: input, shape index: {}]   ;;  %s5644_s14 = inlined_call_operand.hbm [shape: f32[1,128], index: 14, kind: input, shape index: {}]   ;;  %s5645_s15 = inlined_call_operand.vmem [shape: f32[8,128], index: 15, kind: output, shape index: {}]  }
   0x1   :  { %21 = vsyncpa [#allocation13], 0  ;;  %s4134_s18 = smov [#allocation12]   ;;  %s4135_s20 = smov [#allocation10]  }
   0x2   :  { %s50_s19 = sshll.u32 %s4134_s18, 4  ;;  %s35_s21 = sshll.u32 %s4135_s20, 4  ;;  %s51_s19 = int_to_ptr.vmem [resolvable:$true] %s50_s19  ;;  %s4234_s21 = int_to_ptr.vmem [resolvable:$true] %s35_s21 }
   0x3   :  { %s4032_s24 = scalar_lea.hbm %s5638_s8, 64 }
   0x4   :  { %p4033_p0 = scmp.ne.s32.totalorder %s5638_s8, %s4032_s24  ;;  %p4036_p1 = scmp.lt.u32.totalorder %s4032_s24, %s5638_s8 }
   0x6   :  { %p4038_p2 = pnand %p4036_p1, %p4033_p0 }
   0x8   :  { %4041 = shalt.err (!%p4038_p2)
}
   0x9   :  { %s4042_s29 = scalar_lea.vmem %s51_s19, 64  ;;  %p4047_p4 = scmp.lt.s32.totalorder %s51_s19, %s51_s19 }
   0xa   :  { %p4043_p3 = scmp.ne.s32.totalorder %s51_s19, %s4042_s29  ;;  %p4048_p5 = scmp.lt.s32.totalorder %s4042_s29, %s4042_s29 }
   0xc   :  { %p4049_p6 = por %p4048_p5, %p4047_p4 }
   0xe   :  { %p4050_p7 = pnand %p4049_p6, %p4043_p3 }
  0x10   :  { %4053 = shalt.err (!%p4050_p7)
}
  0x11   :  { %53 = dma.hbm_to_vmem [thread:$0]  %s5638_s8, 64, %s51_s19, [#allocation13]  }
  0x12   :  { %s4054_s20 = scalar_lea.hbm %s5634_s4, 4096 }
  0x13   :  { %p4055_p8 = scmp.ne.s32.totalorder %s5634_s4, %s4054_s20  ;;  %p4058_p9 = scmp.lt.u32.totalorder %s4054_s20, %s5634_s4 }
  0x15   :  { %p4060_p10 = pnand %p4058_p9, %p4055_p8 }
  0x17   :  { %4063 = shalt.err (!%p4060_p10)
}
  0x18   :  { %s4064_s26 = scalar_lea.vmem %s4234_s21, 4096  ;;  %p4069_p12 = scmp.lt.s32.totalorder %s4234_s21, %s4234_s21 }
  0x19   :  { %p4065_p11 = scmp.ne.s32.totalorder %s4234_s21, %s4064_s26  ;;  %p4070_p13 = scmp.lt.s32.totalorder %s4064_s26, %s4064_s26 }
  0x1b   :  { %p4071_p0 = por %p4070_p13, %p4069_p12 }
  0x1d   :  { %p4072_p1 = pnand %p4071_p0, %p4065_p11 }
  0x1f   :  { %4075 = shalt.err (!%p4072_p1)
}
  0x20   :  { %s4136_s8 = smov 256   ;;  %s4137_s19 = smov 16  }
  0x21   :  { %41 = dma.hbm_to_vmem [thread:$0]  %s5634_s4, 4096, %s4234_s21, [#allocation11], %s4136_s8, %s4136_s8, %s4137_s19  }
  0x22   :  { %s4138_s29 = smov [#allocation14]   ;;  %s4076_s18 = scalar_lea.hbm %s5644_s14, 16 }
  0x23   :  { %s64_s30 = sshll.u32 %s4138_s29, 4  ;;  %p4077_p2 = scmp.ne.s32.totalorder %s5644_s14, %s4076_s18  ;;  %s65_s30 = int_to_ptr.vmem [resolvable:$true] %s64_s30 }
  0x24   :  { %p4080_p3 = scmp.lt.u32.totalorder %s4076_s18, %s5644_s14 }
  0x26   :  { %p4082_p4 = pnand %p4080_p3, %p4077_p2 }
  0x28   :  { %4085 = shalt.err (!%p4082_p4)
}
  0x29   :  { %s4086_s25 = scalar_lea.vmem %s65_s30, 16  ;;  %s4090_s4 = scalar_lea.vmem %s65_s30, 32 }
  0x2a   :  { %p4087_p5 = scmp.ne.s32.totalorder %s65_s30, %s4086_s25  ;;  %p4091_p6 = scmp.lt.s32.totalorder %s65_s30, %s65_s30 }
  0x2b   :  { %p4092_p7 = scmp.lt.s32.totalorder %s4090_s4, %s4086_s25 }
  0x2d   :  { %p4093_p8 = por %p4092_p7, %p4091_p6 }
  0x2f   :  { %p4094_p9 = pnand %p4093_p8, %p4087_p5 }
  0x31   :  { %4097 = shalt.err (!%p4094_p9)
}
  0x32   :  { %67 = dma.hbm_to_vmem [thread:$0]  %s5644_s14, 16, %s65_s30, [#allocation13]  }
  0x33   :  { %4120 = dma.done.wait [#allocation11], 4096  }
  0x34   :  { %4121 = vsyncadd [#allocation11], 4294963200 }
  0x35   :  { %4122 = dma.done.wait [#allocation13], 80  }
  0x36   :  { %4123 = vsyncadd [#allocation13], 4294967216  ;;  %s82_s19 = sld [smem:[#allocation0]]   ;;  %106 = sst [smem:[#allocation16 + $0x6]] %s4136_s8 }
  0x37   :  { %s4139_s27 = smov [#allocation4]   ;;  %s4140_s29 = smov 512  }
  0x38   :  { %s90_s28 = sshll.u32 %s4139_s27, 4  ;;  %94 = sst [smem:[#allocation16]] %s4140_s29  ;;  %s91_s28 = int_to_ptr.vmem [resolvable:$true] %s90_s28 }
  0x39   :  { %96 = sst [smem:[#allocation16 + $0x1]] %s4140_s29  ;;  %s4141_s16 = smov 4  }
  0x3a   :  { %98 = sst [smem:[#allocation16 + $0x2]] %s4141_s16  ;;  %s4142_s17 = smov 64  }
  0x3b   :  { %100 = sst [smem:[#allocation16 + $0x3]] %s4142_s17  ;;  %s4143_s20 = smov 128  }
  0x3c   :  { %s3416_s18 = sshll.u32 %s82_s19, 26  ;;  %102 = sst [smem:[#allocation16 + $0x4]] %s4143_s20 }
  0x3d   :  { %s3417_s14 = sadd.s32 134217728, %s3416_s18  ;;  %s4144_s30 = smov 2  }
  0x3e   :  { %104 = sst [smem:[#allocation16 + $0x5]] %s4144_s30  ;;  %s4145_s22 = smov [#allocation9]  }
  0x3f   :  { %108 = sst [smem:[#allocation16 + $0x7]] %s4142_s17  ;;  %s4146_s23 = smov [#allocation15]  }
  0x40   :  { %110 = sst [smem:[#allocation16 + $0x8]] %s4141_s16  ;;  %s4147_s4 = smov [#allocation5]  }
  0x41   :  { %112 = dma.general %s5636_s6, 4096, %s91_s28, %s4145_s22, %s4146_s23, [#allocation16], %s3417_s14, 0  }
  0x42   :  { %129 = sst [smem:[#allocation18]] %s4140_s29  ;;  %s125_s21 = sshll.u32 %s4147_s4, 4  ;;  %s126_s21 = int_to_ptr.vmem [resolvable:$true] %s125_s21 }
  0x43   :  { %131 = sst [smem:[#allocation18 + $0x1]] %s4140_s29  ;;  %s4148_s26 = smov [#allocation9 + $0x1]  }
  0x44   :  { %133 = sst [smem:[#allocation18 + $0x2]] %s4141_s16  ;;  %s4149_s19 = smov [#allocation17]  }
  0x45   :  { %135 = sst [smem:[#allocation18 + $0x3]] %s4142_s17 }
  0x46   :  { %137 = sst [smem:[#allocation18 + $0x4]] %s4143_s20 }
  0x47   :  { %139 = sst [smem:[#allocation18 + $0x5]] %s4144_s30 }
  0x48   :  { %141 = sst [smem:[#allocation18 + $0x6]] %s4136_s8 }
  0x49   :  { %143 = sst [smem:[#allocation18 + $0x7]] %s4142_s17 }
  0x4a   :  { %145 = sst [smem:[#allocation18 + $0x8]] %s4141_s16 }
  0x4b   :  { %147 = dma.general %s5637_s7, 4096, %s126_s21, %s4148_s26, %s4149_s19, [#allocation18], %s3417_s14, 0  }
  0x4c   :  { %v166_v0 = vld [vmem:[%s5639_s9] sm:$0xf]  ;;  %v168_v1 = vld [vmem:[%s5639_s9 + $0x8] sm:$0xf]  ;;  %v170_v2 = vld [vmem:[%s5639_s9 + $0x4] sm:$0xf] }
  0x4d   :  { %167 = vst [vmem:[#allocation6] sm:$0xf] %v166_v0  ;;  %169 = vst [vmem:[#allocation6 + $0x4] sm:$0xf] %v168_v1  ;;  %v172_v3 = vld [vmem:[%s5639_s9 + $0xc] sm:$0xff]   ;;  %v180_v6 = vld [vmem:[%s5639_s9 + $0x1c] sm:$0xff]  }
  0x4e   :  { %171 = vst [vmem:[#allocation6 + $0x8] sm:$0xf] %v170_v2  ;;  %v176_v4 = vld [vmem:[%s5639_s9 + $0x18] sm:$0xf]  ;;  %v178_v5 = vld [vmem:[%s5639_s9 + $0x14] sm:$0xf] }
  0x4f   :  { %173 = vst [vmem:[#allocation6 + $0xc] sm:$0xff] %v172_v3   ;;  %177 = vst [vmem:[#allocation6 + $0x14] sm:$0xf] %v176_v4  ;;  %v184_v7 = vld [vmem:[%s5639_s9 + $0x28] sm:$0xf]  ;;  %v188_v9 = vld [vmem:[%s5639_s9 + $0x2c] sm:$0xff]  }
  0x50   :  { %179 = vst [vmem:[#allocation6 + $0x18] sm:$0xf] %v178_v5  ;;  %v186_v8 = vld [vmem:[%s5639_s9 + $0x24] sm:$0xf]  ;;  %181 = vst [vmem:[#allocation6 + $0x1c] sm:$0xff] %v180_v6   ;;  %v196_v12 = vld [vmem:[%s5639_s9 + $0x3c] sm:$0xff]  }
  0x51   :  { %185 = vst [vmem:[#allocation6 + $0x24] sm:$0xf] %v184_v7  ;;  %187 = vst [vmem:[#allocation6 + $0x28] sm:$0xf] %v186_v8  ;;  %v192_v10 = vld [vmem:[%s5639_s9 + $0x38] sm:$0xf] }
  0x52   :  { %v194_v11 = vld [vmem:[%s5639_s9 + $0x34] sm:$0xf]  ;;  %189 = vst [vmem:[#allocation6 + $0x2c] sm:$0xff] %v188_v9   ;;  %193 = vst [vmem:[#allocation6 + $0x34] sm:$0xf] %v192_v10  ;;  %v204_v15 = vld [vmem:[%s5639_s9 + $0x4c] sm:$0xff]  }
  0x53   :  { %195 = vst [vmem:[#allocation6 + $0x38] sm:$0xf] %v194_v11  ;;  %v200_v13 = vld [vmem:[%s5639_s9 + $0x48] sm:$0xf]  ;;  %v202_v14 = vld [vmem:[%s5639_s9 + $0x44] sm:$0xf] }
  0x54   :  { %197 = vst [vmem:[#allocation6 + $0x3c] sm:$0xff] %v196_v12   ;;  %201 = vst [vmem:[#allocation6 + $0x44] sm:$0xf] %v200_v13  ;;  %v208_v16 = vld [vmem:[%s5639_s9 + $0x58] sm:$0xf]  ;;  %v212_v18 = vld [vmem:[%s5639_s9 + $0x5c] sm:$0xff]  }
  0x55   :  { %203 = vst [vmem:[#allocation6 + $0x48] sm:$0xf] %v202_v14  ;;  %v210_v17 = vld [vmem:[%s5639_s9 + $0x54] sm:$0xf]  ;;  %205 = vst [vmem:[#allocation6 + $0x4c] sm:$0xff] %v204_v15   ;;  %v220_v21 = vld [vmem:[%s5639_s9 + $0x6c] sm:$0xff]  }
  0x56   :  { %209 = vst [vmem:[#allocation6 + $0x54] sm:$0xf] %v208_v16  ;;  %211 = vst [vmem:[#allocation6 + $0x58] sm:$0xf] %v210_v17  ;;  %v216_v19 = vld [vmem:[%s5639_s9 + $0x68] sm:$0xf] }
  0x57   :  { %v218_v20 = vld [vmem:[%s5639_s9 + $0x64] sm:$0xf]  ;;  %213 = vst [vmem:[#allocation6 + $0x5c] sm:$0xff] %v212_v18   ;;  %217 = vst [vmem:[#allocation6 + $0x64] sm:$0xf] %v216_v19 }
  0x58   :  { %219 = vst [vmem:[#allocation6 + $0x68] sm:$0xf] %v218_v20  ;;  %v224_v22 = vld [vmem:[%s5639_s9 + $0x78] sm:$0xf]  ;;  %v226_v23 = vld [vmem:[%s5639_s9 + $0x74] sm:$0xf] }
  0x59   :  { %221 = vst [vmem:[#allocation6 + $0x6c] sm:$0xff] %v220_v21   ;;  %225 = vst [vmem:[#allocation6 + $0x74] sm:$0xf] %v224_v22  ;;  %v228_v24 = vld [vmem:[%s5639_s9 + $0x7c] sm:$0xf] }
  0x5a   :  { %227 = vst [vmem:[#allocation6 + $0x78] sm:$0xf] %v226_v23  ;;  %229 = vst [vmem:[#allocation6 + $0x7c] sm:$0xf] %v228_v24 }
  0x5b   :  { %324 = vsyncadd [#allocation9 + $0x2], 2048  ;;  %v4365_v25 = vld [vmem:[%s5643_s13] sm:$0xff]  ;;  %v4370_v26 = vld [vmem:[%s5643_s13 + $0x8] sm:$0xff]  ;;  %s4150_s4 = smov [#allocation7]   ;;  %s4098_s17 = scalar_lea.hbm %s5641_s11, 2048 }
  0x5c   :  { %5656 = vst [vmem:[#allocation32_spill] sm:$0xff] %v4365_v25  ;;  %5657 = vst [vmem:[#allocation33_spill] sm:$0xff] %v4370_v26  ;;  %s333_s21 = sshll.u32 %s4150_s4, 4  ;;  %v4375_v27 = vld [vmem:[%s5643_s13 + $0x10] sm:$0xff]  ;;  %v4380_v28 = vld [vmem:[%s5643_s13 + $0x18] sm:$0xff]  ;;  %p4099_p10 = scmp.ne.s32.totalorder %s5641_s11, %s4098_s17  ;;  %s334_s21 = int_to_ptr.vmem [resolvable:$true] %s333_s21 }
  0x5d   :  { %5658 = vst [vmem:[#allocation34_spill] sm:$0xff] %v4375_v27  ;;  %5659 = vst [vmem:[#allocation35_spill] sm:$0xff] %v4380_v28  ;;  %v4385_v29 = vld [vmem:[%s5643_s13 + $0x20] sm:$0xff]  ;;  %v4390_v30 = vld [vmem:[%s5643_s13 + $0x28] sm:$0xff]  ;;  %p4102_p11 = scmp.lt.u32.totalorder %s4098_s17, %s5641_s11 }
  0x5e   :  { %5660 = vst [vmem:[#allocation36_spill] sm:$0xff] %v4385_v29  ;;  %5661 = vst [vmem:[#allocation37_spill] sm:$0xff] %v4390_v30  ;;  %v4395_v31 = vld [vmem:[%s5643_s13 + $0x30] sm:$0xff]  ;;  %v4400_v32 = vld [vmem:[%s5643_s13 + $0x38] sm:$0xff] }
  0x5f   :  { %5662 = vst [vmem:[#allocation38_spill] sm:$0xff] %v4395_v31  ;;  %5663 = vst [vmem:[#allocation39_spill] sm:$0xff] %v4400_v32  ;;  %p4104_p12 = pnand %p4102_p11, %p4099_p10 }
  0x61   :  { %4107 = shalt.err (!%p4104_p12)  }
  0x62   :  { %s4108_s4 = scalar_lea.vmem %s334_s21, 2048  ;;  %p4113_p0 = scmp.lt.s32.totalorder %s334_s21, %s334_s21 }
  0x63   :  { %p4109_p13 = scmp.ne.s32.totalorder %s334_s21, %s4108_s4  ;;  %p4114_p1 = scmp.lt.s32.totalorder %s4108_s4, %s4108_s4 }
  0x65   :  { %p4115_p2 = por %p4114_p1, %p4113_p0 }
  0x67   :  { %p4116_p3 = pnand %p4115_p2, %p4109_p13 }
  0x69   :  { %4119 = shalt.err (!%p4116_p3)  }
  0x6a   :  { %336 = dma.hbm_to_vmem [thread:$0]  %s5641_s11, 2048, %s334_s21, [#allocation9 + $0x3] }
  0x6b   :  { %393 = vsyncadd [#allocation9 + $0x4], 1024  ;;  %v3612_v33 = vld [vmem:[%s5633_s3 + $0x4] ss:$16 sps:$4 sm:$0xff]   ;;  %v5648_v34 = vmov 0   ;;  %v459_v3 = vld [vmem:[%s5630_s0 + $0x8] sm:$0xff] }
  0x6c   :  { %684 = vmatprep.mubr.bf16.mxu0 %v5648_v34  ;;  %757 = vmatprep.mubr.bf16.mxu1 %v5648_v34  ;;  %v3614_v35 = vld [vmem:[%s5633_s3 + $0xc] ss:$16 sps:$4 sm:$0xff]   ;;  %v3616_v36 = vld [vmem:[%s5633_s3] ss:$16 sps:$4 sm:$0xff]   ;;  %v3617_v37 = vld [vmem:[%s5633_s3 + $0x8] ss:$16 sps:$4 sm:$0xff]  }
  0x6d   :  { %652 = vmatprep.subr.bf16.mxu0 %v3612_v33  ;;  %v3618_v38 = vld [vmem:[%s5633_s3 + $0x24] ss:$16 sps:$4 sm:$0xff]   ;;  %725 = vmatprep.subr.bf16.mxu1 %v3614_v35  ;;  %v3620_v39 = vld [vmem:[%s5633_s3 + $0x2c] ss:$16 sps:$4 sm:$0xff]   ;;  %v3622_v40 = vld [vmem:[%s5633_s3 + $0x20] ss:$16 sps:$4 sm:$0xff]  }
  0x6e   :  { %653 = vmatpush1.bf16.msra.mxu0 %v3616_v36  ;;  %726 = vmatpush1.bf16.msra.mxu1 %v3617_v37  ;;  %v3623_v41 = vld [vmem:[%s5633_s3 + $0x28] ss:$16 sps:$4 sm:$0xff]   ;;  %v3624_v42 = vld [vmem:[%s5633_s3 + $0x44] ss:$16 sps:$4 sm:$0xff]   ;;  %v3626_v43 = vld [vmem:[%s5633_s3 + $0x4c] ss:$16 sps:$4 sm:$0xff]  }
  0x6f   :  { %654 = vmatprep.subr.bf16.mxu0 %v3618_v38  ;;  %727 = vmatprep.subr.bf16.mxu1 %v3620_v39  ;;  %v3628_v44 = vld [vmem:[%s5633_s3 + $0x40] ss:$16 sps:$4 sm:$0xff]   ;;  %v3629_v45 = vld [vmem:[%s5633_s3 + $0x48] ss:$16 sps:$4 sm:$0xff]   ;;  %v3630_v46 = vld [vmem:[%s5633_s3 + $0x64] ss:$16 sps:$4 sm:$0xff]  }
  0x70   :  { %v3632_v47 = vld [vmem:[%s5633_s3 + $0x6c] ss:$16 sps:$4 sm:$0xff]   ;;  %v3634_v48 = vld [vmem:[%s5633_s3 + $0x60] ss:$16 sps:$4 sm:$0xff]   ;;  %v3635_v49 = vld [vmem:[%s5633_s3 + $0x68] ss:$16 sps:$4 sm:$0xff]  }
  0x71   :  { %v3636_v50 = vld [vmem:[%s5633_s3 + $0x84] ss:$16 sps:$4 sm:$0xff]   ;;  %v3638_v51 = vld [vmem:[%s5633_s3 + $0x8c] ss:$16 sps:$4 sm:$0xff]   ;;  %v3640_v52 = vld [vmem:[%s5633_s3 + $0x80] ss:$16 sps:$4 sm:$0xff]  }
  0x72   :  { %655 = vmatpush1.bf16.msra.mxu0 %v3622_v40  ;;  %728 = vmatpush1.bf16.msra.mxu1 %v3623_v41  ;;  %v3641_v53 = vld [vmem:[%s5633_s3 + $0x88] ss:$16 sps:$4 sm:$0xff]   ;;  %v3642_v54 = vld [vmem:[%s5633_s3 + $0xa4] ss:$16 sps:$4 sm:$0xff]   ;;  %v3644_v55 = vld [vmem:[%s5633_s3 + $0xac] ss:$16 sps:$4 sm:$0xff]  }
  0x73   :  { %656 = vmatprep.subr.bf16.mxu0 %v3624_v42  ;;  %729 = vmatprep.subr.bf16.mxu1 %v3626_v43  ;;  %v3646_v56 = vld [vmem:[%s5633_s3 + $0xa0] ss:$16 sps:$4 sm:$0xff]   ;;  %v3647_v57 = vld [vmem:[%s5633_s3 + $0xa8] ss:$16 sps:$4 sm:$0xff]   ;;  %v3648_v58 = vld [vmem:[%s5633_s3 + $0xc4] ss:$16 sps:$4 sm:$0xff]  }
  0x74   :  { %v3650_v59 = vld [vmem:[%s5633_s3 + $0xcc] ss:$16 sps:$4 sm:$0xff]   ;;  %v3652_v60 = vld [vmem:[%s5633_s3 + $0xc0] ss:$16 sps:$4 sm:$0xff]   ;;  %v3653_v61 = vld [vmem:[%s5633_s3 + $0xc8] ss:$16 sps:$4 sm:$0xff]  }
  0x75   :  { %v3654_v62 = vld [vmem:[%s5633_s3 + $0xe4] ss:$16 sps:$4 sm:$0xff]   ;;  %v3656_v63 = vld [vmem:[%s5633_s3 + $0xec] ss:$16 sps:$4 sm:$0xff]   ;;  %v3658_v0 = vld [vmem:[%s5633_s3 + $0xe0] ss:$16 sps:$4 sm:$0xff]  }
  0x76   :  { %657 = vmatpush1.bf16.msra.mxu0 %v3628_v44  ;;  %730 = vmatpush1.bf16.msra.mxu1 %v3629_v45  ;;  %v3659_v1 = vld [vmem:[%s5633_s3 + $0xe8] ss:$16 sps:$4 sm:$0xff]   ;;  %v458_v2 = vld [vmem:[%s5630_s0] sm:$0xff]  ;;  %v4520_v5 = vld [vmem:[#allocation10 + $0xc] ss:$16 sps:$4 sm:$0xff]  }
  0x77   :  { %658 = vmatprep.subr.bf16.mxu0 %v3630_v46  ;;  %731 = vmatprep.subr.bf16.mxu1 %v3632_v47  ;;  %v4518_v4 = vld [vmem:[#allocation10 + $0x4] ss:$16 sps:$4 sm:$0xff]   ;;  %v466_v6 = vpack.c.bf16 %v459_v3, %v458_v2  ;;  %v4522_v7 = vld [vmem:[#allocation10] ss:$16 sps:$4 sm:$0xff]   ;;  %v4525_v8 = vld [vmem:[#allocation10 + $0x8] ss:$16 sps:$4 sm:$0xff]  }
  0x78   :  { %v4527_v9 = vld [vmem:[#allocation10 + $0x24] ss:$16 sps:$4 sm:$0xff]   ;;  %v4530_v10 = vld [vmem:[#allocation10 + $0x2c] ss:$16 sps:$4 sm:$0xff]   ;;  %v4532_v11 = vld [vmem:[#allocation10 + $0x20] ss:$16 sps:$4 sm:$0xff]  }
  0x79   :  { %v4535_v12 = vld [vmem:[#allocation10 + $0x28] ss:$16 sps:$4 sm:$0xff]   ;;  %v460_v13 = vld [vmem:[%s5630_s0 + $0x10] sm:$0xff]  ;;  %v4549_v16 = vld [vmem:[#allocation10 + $0x4c] ss:$16 sps:$4 sm:$0xff]  }
  0x7a   :  { %659 = vmatpush1.bf16.msra.mxu0 %v3634_v48  ;;  %732 = vmatpush1.bf16.msra.mxu1 %v3635_v49  ;;  %v461_v14 = vld [vmem:[%s5630_s0 + $0x18] sm:$0xff]  ;;  %v4545_v15 = vld [vmem:[#allocation10 + $0x44] ss:$16 sps:$4 sm:$0xff]   ;;  %v4552_v18 = vld [vmem:[#allocation10 + $0x40] ss:$16 sps:$4 sm:$0xff]  }
  0x7b   :  { %660 = vmatprep.subr.bf16.mxu0 %v3636_v50  ;;  %733 = vmatprep.subr.bf16.mxu1 %v3638_v51  ;;  %v467_v17 = vpack.c.bf16 %v461_v14, %v460_v13  ;;  %v4555_v19 = vld [vmem:[#allocation10 + $0x48] ss:$16 sps:$4 sm:$0xff]   ;;  %v4559_v20 = vld [vmem:[#allocation10 + $0x64] ss:$16 sps:$4 sm:$0xff]   ;;  %v4562_v21 = vld [vmem:[#allocation10 + $0x6c] ss:$16 sps:$4 sm:$0xff]  }
  0x7c   :  { %v4564_v22 = vld [vmem:[#allocation10 + $0x60] ss:$16 sps:$4 sm:$0xff]   ;;  %v463_v24 = vld [vmem:[%s5630_s0 + $0x28] sm:$0xff]  ;;  %v4577_v35 = vld [vmem:[#allocation10 + $0x84] ss:$16 sps:$4 sm:$0xff]  }
  0x7d   :  { %v462_v23 = vld [vmem:[%s5630_s0 + $0x20] sm:$0xff]  ;;  %v4575_v33 = vld [vmem:[#allocation10 + $0x68] ss:$16 sps:$4 sm:$0xff]   ;;  %v4581_v36 = vld [vmem:[#allocation10 + $0x8c] ss:$16 sps:$4 sm:$0xff]  }
  0x7e   :  { %661 = vmatpush1.bf16.msra.mxu0 %v3640_v52  ;;  %734 = vmatpush1.bf16.msra.mxu1 %v3641_v53  ;;  %v468_v37 = vpack.c.bf16 %v463_v24, %v462_v23  ;;  %v4585_v38 = vld [vmem:[#allocation10 + $0x80] ss:$16 sps:$4 sm:$0xff]   ;;  %v4589_v39 = vld [vmem:[#allocation10 + $0x88] ss:$16 sps:$4 sm:$0xff]   ;;  %v4591_v40 = vld [vmem:[#allocation10 + $0xa4] ss:$16 sps:$4 sm:$0xff]  }
  0x7f   :  { %662 = vmatprep.subr.bf16.mxu0 %v3642_v54  ;;  %735 = vmatprep.subr.bf16.mxu1 %v3644_v55  ;;  %v4594_v41 = vld [vmem:[#allocation10 + $0xac] ss:$16 sps:$4 sm:$0xff]   ;;  %v4597_v42 = vld [vmem:[#allocation10 + $0xa0] ss:$16 sps:$4 sm:$0xff]   ;;  %v4607_v45 = vld [vmem:[#allocation10 + $0xa8] ss:$16 sps:$4 sm:$0xff]  }
  0x80   :  { %v464_v43 = vld [vmem:[%s5630_s0 + $0x30] sm:$0xff]  ;;  %v465_v44 = vld [vmem:[%s5630_s0 + $0x38] sm:$0xff]  ;;  %v830_v54 = vld [vmem:[%s5631_s1] sm:$0xff] }
  0x81   :  { %v4609_v46 = vld [vmem:[#allocation10 + $0xc4] ss:$16 sps:$4 sm:$0xff]   ;;  %v4613_v47 = vld [vmem:[#allocation10 + $0xcc] ss:$16 sps:$4 sm:$0xff]   ;;  %v469_v48 = vpack.c.bf16 %v465_v44, %v464_v43  ;;  %v4617_v49 = vld [vmem:[#allocation10 + $0xc0] ss:$16 sps:$4 sm:$0xff]  }
  0x82   :  { %663 = vmatpush1.bf16.msra.mxu0 %v3646_v56  ;;  %736 = vmatpush1.bf16.msra.mxu1 %v3647_v57  ;;  %v4621_v50 = vld [vmem:[#allocation10 + $0xc8] ss:$16 sps:$4 sm:$0xff]   ;;  %v4623_v51 = vld [vmem:[#allocation10 + $0xe4] ss:$16 sps:$4 sm:$0xff]   ;;  %v4626_v52 = vld [vmem:[#allocation10 + $0xec] ss:$16 sps:$4 sm:$0xff]   ;;  %v836_v56 = vpack.c.bf16 %v830_v54, %v830_v54  ;;  %v472_v57 = vlaneseq }
  0x83   :  { %664 = vmatprep.subr.bf16.mxu0 %v3648_v58  ;;  %737 = vmatprep.subr.bf16.mxu1 %v3650_v59  ;;  %v4629_v53 = vld [vmem:[#allocation10 + $0xe0] ss:$16 sps:$4 sm:$0xff]   ;;  %v4636_v55 = vld [vmem:[#allocation10 + $0xe8] ss:$16 sps:$4 sm:$0xff]  }
  0x84   :  { %v4679_v58 = vshrl.u32 %v472_v57, 7 }
  0x86   :  { %665 = vmatpush1.bf16.msra.mxu0 %v3652_v60  ;;  %738 = vmatpush1.bf16.msra.mxu1 %v3653_v61  ;;  %5664 = vst [vmem:[#allocation40_spill] sm:$0xff] %v4679_v58  ;;  %v5647_v59 = vsub.s32 2, %v4679_v58  ;;  %v4683_v60 = vsub.s32 0, %v4679_v58  ;;  %v5646_v61 = vsub.s32 3, %v4679_v58 }
  0x87   :  { %666 = vmatprep.subr.bf16.mxu0 %v3654_v62  ;;  %739 = vmatprep.subr.bf16.mxu1 %v3656_v63  ;;  %v470_v62 = vld [vmem:[%s5635_s5] sm:$0xf]  ;;  %v4690_v63 = vsub.s32 1, %v4679_v58 }
  0x88   :  { %5665 = vst [vmem:[#allocation41_spill] sm:$0xff] %v4683_v60  ;;  %v475_v2 = vrot.slane %v470_v62, %v4683_v60  ;;  %v4701_v13 = vrot.slane %v470_v62, %v5646_v61 }
  0x89   :  { %5666 = vst [vmem:[#allocation42_spill] sm:$0xff] %v4690_v63  ;;  %v479_v14 = vrot.slane %v470_v62, %v4690_v63 }
  0x8a   :  { %667 = vmatpush1.bf16.msra.mxu0 %v3658_v0  ;;  %740 = vmatpush1.bf16.msra.mxu1 %v3659_v1  ;;  %v4696_v1 = vrot.slane %v470_v62, %v5647_v59 }
  0x8b   :  { %997 = vmatprep.subr.bf16.mxu0 %v4518_v4  ;;  %1038 = vmatprep.subr.bf16.mxu1 %v4520_v5 }
  0x8d   :  { %685 = vmatmul.mubr.bf16.vlgmr.msra.gmra.mrb[0].mxu0 %v466_v6  ;;  %758 = vmatmul.mubr.bf16.vlgmr.msra.gmra.mrb[0].mxu1 %v466_v6 }
  0x8e   :  { %998 = vmatpush1.bf16.msra.mxu0 %v4522_v7  ;;  %1039 = vmatpush1.bf16.msra.mxu1 %v4525_v8 }
  0x8f   :  { %999 = vmatprep.subr.bf16.mxu0 %v4527_v9  ;;  %1040 = vmatprep.subr.bf16.mxu1 %v4530_v10 }
  0x90   :  { %694 = vmatprep.mubr.bf16.mxu0 %v5648_v34  ;;  %767 = vmatprep.mubr.bf16.mxu1 %v5648_v34 }
  0x92   :  { %1000 = vmatpush1.bf16.msra.mxu0 %v4532_v11  ;;  %1041 = vmatpush1.bf16.msra.mxu1 %v4535_v12 }
  0x93   :  { %1001 = vmatprep.subr.bf16.mxu0 %v4545_v15  ;;  %1042 = vmatprep.subr.bf16.mxu1 %v4549_v16 }
  0x95   :  { %695 = vmatmul.mubr.bf16.gmra.mrb[4].mxu0 %v467_v17  ;;  %768 = vmatmul.mubr.bf16.gmra.mrb[4].mxu1 %v467_v17 }
  0x96   :  { %1002 = vmatpush1.bf16.msra.mxu0 %v4552_v18  ;;  %1043 = vmatpush1.bf16.msra.mxu1 %v4555_v19 }
  0x97   :  { %1003 = vmatprep.subr.bf16.mxu0 %v4559_v20  ;;  %1044 = vmatprep.subr.bf16.mxu1 %v4562_v21 }
  0x98   :  { %704 = vmatprep.mubr.bf16.mxu0 %v5648_v34  ;;  %777 = vmatprep.mubr.bf16.mxu1 %v5648_v34 }
  0x9a   :  { %1004 = vmatpush1.bf16.msra.mxu0 %v4564_v22  ;;  %1045 = vmatpush1.bf16.msra.mxu1 %v4575_v33 }
  0x9b   :  { %1005 = vmatprep.subr.bf16.mxu0 %v4577_v35  ;;  %1046 = vmatprep.subr.bf16.mxu1 %v4581_v36 }
  0x9d   :  { %705 = vmatmul.mubr.bf16.gmra.mrb[8].mxu0 %v468_v37  ;;  %778 = vmatmul.mubr.bf16.gmra.mrb[8].mxu1 %v468_v37 }
  0x9e   :  { %1006 = vmatpush1.bf16.msra.mxu0 %v4585_v38  ;;  %1047 = vmatpush1.bf16.msra.mxu1 %v4589_v39 }
  0x9f   :  { %1007 = vmatprep.subr.bf16.mxu0 %v4591_v40  ;;  %1048 = vmatprep.subr.bf16.mxu1 %v4594_v41 }
  0xa0   :  { %714 = vmatprep.mubr.bf16.mxu0 %v5648_v34  ;;  %787 = vmatprep.mubr.bf16.mxu1 %v5648_v34 }
  0xa2   :  { %1008 = vmatpush1.bf16.msra.mxu0 %v4597_v42  ;;  %1049 = vmatpush1.bf16.msra.mxu1 %v4607_v45 }
  0xa3   :  { %1009 = vmatprep.subr.bf16.mxu0 %v4609_v46  ;;  %1050 = vmatprep.subr.bf16.mxu1 %v4613_v47 }
  0xa5   :  { %715 = vmatmul.mubr.bf16.gmra.mrb[12].mxu0 %v469_v48  ;;  %788 = vmatmul.mubr.bf16.gmra.mrb[12].mxu1 %v469_v48 }
  0xa6   :  { %1010 = vmatpush1.bf16.msra.mxu0 %v4617_v49  ;;  %1051 = vmatpush1.bf16.msra.mxu1 %v4621_v50 }
  0xa7   :  { %1011 = vmatprep.subr.bf16.mxu0 %v4623_v51  ;;  %1052 = vmatprep.subr.bf16.mxu1 %v4626_v52 }
  0xa8   :  { %1029 = vmatprep.mubr.bf16.mxu0 %v5648_v34  ;;  %1070 = vmatprep.mubr.bf16.mxu1 %v5648_v34 }
  0xaa   :  { %1012 = vmatpush1.bf16.msra.mxu0 %v4629_v53  ;;  %1053 = vmatpush1.bf16.msra.mxu1 %v4636_v55 }
  0xab   :  { %1114 = vmatprep.subr.bf16.mxu0 %v4518_v4  ;;  %1155 = vmatprep.subr.bf16.mxu1 %v4520_v5 }
  0xad   :  { %1030 = vmatmul.mubr.bf16.vlgmr.msra.gmra.mrb[16].mxu0 %v836_v56  ;;  %1071 = vmatmul.mubr.bf16.vlgmr.msra.gmra.mrb[16].mxu1 %v836_v56 }
  0xae   :  { %1115 = vmatpush1.bf16.msra.mxu0 %v4522_v7  ;;  %1156 = vmatpush1.bf16.msra.mxu1 %v4525_v8 }
  0xaf   :  { %1116 = vmatprep.subr.bf16.mxu0 %v4527_v9  ;;  %1157 = vmatprep.subr.bf16.mxu1 %v4530_v10 }
  0xb0   :  { %1146 = vmatprep.mubr.bf16.mxu0 %v5648_v34  ;;  %1187 = vmatprep.mubr.bf16.mxu1 %v5648_v34 }
  0xb2   :  { %1117 = vmatpush1.bf16.msra.mxu0 %v4532_v11  ;;  %1158 = vmatpush1.bf16.msra.mxu1 %v4535_v12 }
  0xb3   :  { %1118 = vmatprep.subr.bf16.mxu0 %v4545_v15  ;;  %1159 = vmatprep.subr.bf16.mxu1 %v4549_v16 }
  0xb6   :  { %1119 = vmatpush1.bf16.msra.mxu0 %v4552_v18  ;;  %1160 = vmatpush1.bf16.msra.mxu1 %v4555_v19 }
  0xb7   :  { %1120 = vmatprep.subr.bf16.mxu0 %v4559_v20  ;;  %1161 = vmatprep.subr.bf16.mxu1 %v4562_v21 }
  0xba   :  { %1121 = vmatpush1.bf16.msra.mxu0 %v4564_v22  ;;  %1162 = vmatpush1.bf16.msra.mxu1 %v4575_v33 }
  0xbb   :  { %1122 = vmatprep.subr.bf16.mxu0 %v4577_v35  ;;  %1163 = vmatprep.subr.bf16.mxu1 %v4581_v36 }
  0xbe   :  { %1123 = vmatpush1.bf16.msra.mxu0 %v4585_v38  ;;  %1164 = vmatpush1.bf16.msra.mxu1 %v4589_v39 }
  0xbf   :  { %1124 = vmatprep.subr.bf16.mxu0 %v4591_v40  ;;  %1165 = vmatprep.subr.bf16.mxu1 %v4594_v41 }
  0xc2   :  { %1125 = vmatpush1.bf16.msra.mxu0 %v4597_v42  ;;  %1166 = vmatpush1.bf16.msra.mxu1 %v4607_v45 }
  0xc3   :  { %1126 = vmatprep.subr.bf16.mxu0 %v4609_v46  ;;  %1167 = vmatprep.subr.bf16.mxu1 %v4613_v47 }
  0xc6   :  { %1127 = vmatpush1.bf16.msra.mxu0 %v4617_v49  ;;  %1168 = vmatpush1.bf16.msra.mxu1 %v4621_v50 }
  0xc7   :  { %1128 = vmatprep.subr.bf16.mxu0 %v4623_v51  ;;  %1169 = vmatprep.subr.bf16.mxu1 %v4626_v52 }
  0xca   :  { %1129 = vmatpush1.bf16.msra.mxu0 %v4629_v53  ;;  %1170 = vmatpush1.bf16.msra.mxu1 %v4636_v55 }
  0xcb   :  { %1232 = vmatprep.subr.bf16.mxu0 %v4518_v4  ;;  %1273 = vmatprep.subr.bf16.mxu1 %v4520_v5 }
 0x160   :  { %v4692_v0 = vpop.f32.mrb[0].mxu0  ;;  %v759_v6 = vpop.f32.mrb[0].mxu1 }
 0x161   :  { %v688_v3 = vpop.f32.mrb[1].mxu0  ;;  %v761_v23 = vpop.f32.mrb[1].mxu1 }
 0x162   :  { %v690_v17 = vpop.f32.mrb[2].mxu0  ;;  %v763_v43 = vpop.f32.mrb[2].mxu1 }
 0x163   :  { %v4704_v24 = vadd.f32 %v690_v17, %v475_v2  ;;  %v692_v37 = vpop.f32.mrb[3].mxu0  ;;  %v4709_v48 = vadd.f32 %v763_v43, %v4696_v1  ;;  %v765_v54 = vpop.f32.mrb[3].mxu1 }
 0x164   :  { %v4706_v44 = vadd.f32 %v692_v37, %v479_v14  ;;  %v4712_v56 = vadd.f32 %v765_v54, %v4701_v13 }
 0x168   :  { %v696_v57 = vpop.f32.mrb[4].mxu0  ;;  %v769_v62 = vpop.f32.mrb[4].mxu1 }
 0x169   :  { %v4714_v61 = vadd.f32 %v696_v57, %v475_v2  ;;  %v698_v59 = vpop.f32.mrb[5].mxu0  ;;  %v4719_v32 = vadd.f32 %v769_v62, %v4696_v1  ;;  %v771_v37 = vpop.f32.mrb[5].mxu1 }
 0x16a   :  { %v4716_v34 = vadd.f32 %v698_v59, %v479_v14  ;;  %v700_v17 = vpop.f32.mrb[6].mxu0  ;;  %v4724_v30 = vadd.f32 %v771_v37, %v4701_v13  ;;  %v773_v54 = vpop.f32.mrb[6].mxu1 }
 0x16b   :  { %v4721_v31 = vadd.f32 %v700_v17, %v475_v2  ;;  %v702_v43 = vpop.f32.mrb[7].mxu0  ;;  %v4729_v57 = vadd.f32 %v773_v54, %v4696_v1  ;;  %v775_v28 = vpop.f32.mrb[7].mxu1 }
 0x16c   :  { %5667 = vst [vmem:[#allocation43_spill] sm:$0xff] %v4716_v34  ;;  %5669 = vst [vmem:[#allocation45_spill] sm:$0xff] %v4724_v30  ;;  %v4726_v29 = vadd.f32 %v702_v43, %v479_v14  ;;  %v4732_v59 = vadd.f32 %v775_v28, %v4701_v13 }
 0x16d   :  { %5668 = vst [vmem:[#allocation44_spill] sm:$0xff] %v4721_v31  ;;  %5671 = vst [vmem:[#allocation47_spill] sm:$0xff] %v4729_v57 }
 0x16e   :  { %5670 = vst [vmem:[#allocation46_spill] sm:$0xff] %v4726_v29  ;;  %5672 = vst [vmem:[#allocation48_spill] sm:$0xff] %v4732_v59 }
 0x170   :  { %v706_v27 = vpop.f32.mrb[8].mxu0  ;;  %v779_v17 = vpop.f32.mrb[8].mxu1 }
 0x171   :  { %v4734_v62 = vadd.f32 %v706_v27, %v475_v2  ;;  %v708_v26 = vpop.f32.mrb[9].mxu0  ;;  %v4739_v37 = vadd.f32 %v779_v17, %v4696_v1  ;;  %v781_v43 = vpop.f32.mrb[9].mxu1 }
 0x172   :  { %v4736_v25 = vadd.f32 %v708_v26, %v479_v14  ;;  %v710_v63 = vpop.f32.mrb[10].mxu0  ;;  %v4744_v58 = vadd.f32 %v781_v43, %v4701_v13  ;;  %v783_v28 = vpop.f32.mrb[10].mxu1 }
 0x173   :  { %5673 = vst [vmem:[#allocation49_spill] sm:$0xff] %v4734_v62  ;;  %5675 = vst [vmem:[#allocation51_spill] sm:$0xff] %v4739_v37  ;;  %v4741_v60 = vadd.f32 %v710_v63, %v475_v2  ;;  %v712_v54 = vpop.f32.mrb[11].mxu0  ;;  %v4749_v27 = vadd.f32 %v783_v28, %v4696_v1  ;;  %v785_v62 = vpop.f32.mrb[11].mxu1 }
 0x174   :  { %5674 = vst [vmem:[#allocation50_spill] sm:$0xff] %v4736_v25  ;;  %5677 = vst [vmem:[#allocation53_spill] sm:$0xff] %v4744_v58  ;;  %v4746_v59 = vadd.f32 %v712_v54, %v479_v14  ;;  %v4752_v26 = vadd.f32 %v785_v62, %v4701_v13 }
 0x175   :  { %5676 = vst [vmem:[#allocation52_spill] sm:$0xff] %v4741_v60  ;;  %5679 = vst [vmem:[#allocation55_spill] sm:$0xff] %v4749_v27 }
 0x176   :  { %5678 = vst [vmem:[#allocation54_spill] sm:$0xff] %v4746_v59  ;;  %5680 = vst [vmem:[#allocation56_spill] sm:$0xff] %v4752_v26 }
 0x178   :  { %v716_v25 = vpop.f32.mrb[12].mxu0  ;;  %v789_v63 = vpop.f32.mrb[12].mxu1 }
 0x179   :  { %v4754_v17 = vadd.f32 %v716_v25, %v475_v2  ;;  %v718_v37 = vpop.f32.mrb[13].mxu0  ;;  %v4759_v43 = vadd.f32 %v789_v63, %v4696_v1  ;;  %v791_v54 = vpop.f32.mrb[13].mxu1  ;;  %v687_v63 = vadd.f32 %v4692_v0, %v475_v2 }
 0x17a   :  { %v4756_v60 = vadd.f32 %v718_v37, %v479_v14  ;;  %v720_v29 = vpop.f32.mrb[14].mxu0  ;;  %v4764_v27 = vadd.f32 %v791_v54, %v4701_v13  ;;  %v793_v62 = vpop.f32.mrb[14].mxu1 }
 0x17b   :  { %5681 = vst [vmem:[#allocation57_spill] sm:$0xff] %v4754_v17  ;;  %5683 = vst [vmem:[#allocation59_spill] sm:$0xff] %v4759_v43  ;;  %v4761_v59 = vadd.f32 %v720_v29, %v475_v2  ;;  %v722_v28 = vpop.f32.mrb[15].mxu0  ;;  %v4769_v25 = vadd.f32 %v793_v62, %v4696_v1  ;;  %v795_v17 = vpop.f32.mrb[15].mxu1  ;;  %v760_v29 = vadd.f32 %v759_v6, %v4696_v1 }
 0x17c   :  { %5682 = vst [vmem:[#allocation58_spill] sm:$0xff] %v4756_v60  ;;  %5685 = vst [vmem:[#allocation61_spill] sm:$0xff] %v4764_v27  ;;  %v4766_v26 = vadd.f32 %v722_v28, %v479_v14  ;;  %v4772_v37 = vadd.f32 %v795_v17, %v4701_v13  ;;  %v689_v60 = vadd.f32 %v688_v3, %v479_v14 }
 0x17d   :  { %5684 = vst [vmem:[#allocation60_spill] sm:$0xff] %v4761_v59  ;;  %5687 = vst [vmem:[#allocation63_spill] sm:$0xff] %v4769_v25  ;;  %v762_v43 = vadd.f32 %v761_v23, %v4701_v13 }
 0x17e   :  { %5686 = vst [vmem:[#allocation62_spill] sm:$0xff] %v4766_v26  ;;  %5688 = vst [vmem:[#allocation64_spill] sm:$0xff] %v4772_v37 }
 0x180   :  { %v1031_v59 = vpop.f32.mrb[16].mxu0  ;;  %v1072_v27 = vpop.f32.mrb[16].mxu1 }
 0x181   :  { %v1079_v54 = vadd.f32 %v1031_v59, %v687_v63  ;;  %v1033_v58 = vpop.f32.mrb[17].mxu0  ;;  %v1081_v28 = vadd.f32 %v1072_v27, %v760_v29  ;;  %v1074_v57 = vpop.f32.mrb[17].mxu1 }
 0x182   :  { %v1080_v26 = vadd.f32 %v1033_v58, %v689_v60  ;;  %v1035_v62 = vpop.f32.mrb[18].mxu0  ;;  %v1082_v31 = vadd.f32 %v1074_v57, %v762_v43  ;;  %v1076_v17 = vpop.f32.mrb[18].mxu1 }
 0x183   :  { %v3484_v25 = vmul.f32 -1.442695, %v1079_v54  ;;  %v1036_v30 = vpop.f32.mrb[19].mxu0  ;;  %v1077_v34 = vpop.f32.mrb[19].mxu1 }
 0x184   :  { %v3485_v37 = vmul.f32 -1.442695, %v1080_v26  ;;  %v3486_v0 = vmul.f32 -1.442695, %v1082_v31  ;;  %v831_v30 = vld [vmem:[%s5632_s2] sm:$0xff] }
 0x185   :  { %3708 = vpow2.f32 %v3484_v25  ;;  %v5689_v25 = vmov 0  }
 0x186   :  { %3710 = vpow2.f32 %v3485_v37 }
 0x187   :  { %3712 = vpow2.f32 %v3486_v0 }
 0x188   :  { %3714 = vtanh.f32 %v1081_v28 }
 0x18f   :  { %v3709_v1 = vpop.eup %3708 }
 0x190   :  { %v3711_v2 = vpop.eup %3710  ;;  %v1086_v3 = vadd.f32 1.0, %v3709_v1 }
 0x191   :  { %v1092_v6 = vadd.f32 1.0, %v3711_v2  ;;  %v3713_v58 = vpop.eup %3712 }
 0x192   :  { %3716 = vrcp.f32 %v1086_v3  ;;  %v3715_v60 = vpop.eup %3714  ;;  %v1099_v23 = vadd.f32 1.0, %v3713_v58 }
 0x193   :  { %3718 = vrcp.f32 %v1092_v6 }
 0x194   :  { %3720 = vrcp.f32 %v1099_v23 }
 0x19c   :  { %v3717_v13 = vpop.eup %3716 }
 0x19d   :  { %v3719_v14 = vpop.eup %3718  ;;  %v1103_v34 = vmul.f32 %v3717_v13, %v3715_v60 }
 0x19e   :  { %v1102_v57 = vmul.f32 %v3719_v14, %v831_v30  ;;  %v3721_v59 = vpop.eup %3720 }
 0x1a0   :  { %v4780_v31 = vadd.f32 %v1103_v34, %v1102_v57 }
 0x1a2   :  { %3722 = vtanh.f32 %v4780_v31 }
 0x1ac   :  { %v3723_v27 = vpop.eup %3722 }
 0x1ad   :  { %v4783_v26 = vmul.f32 %v3723_v27, %v3721_v59 }
 0x1af   :  { %v1113_v43 = vpack.c.bf16 %v4783_v26, %v4783_v26 }
 0x1b1   :  { %1147 = vmatmul.mubr.bf16.vlgmr.msra.gmra.mrb[20].mxu0 %v1113_v43  ;;  %1188 = vmatmul.mubr.bf16.vlgmr.msra.gmra.mrb[20].mxu1 %v1113_v43 }
 0x1b2   :  { %1233 = vmatpush1.bf16.msra.mxu0 %v4522_v7  ;;  %1274 = vmatpush1.bf16.msra.mxu1 %v4525_v8 }
 0x1b3   :  { %1234 = vmatprep.subr.bf16.mxu0 %v4527_v9  ;;  %1275 = vmatprep.subr.bf16.mxu1 %v4530_v10 }
 0x1b4   :  { %1264 = vmatprep.mubr.bf16.mxu0 %v5689_v25  ;;  %1305 = vmatprep.mubr.bf16.mxu1 %v5689_v25 }
 0x1b6   :  { %1235 = vmatpush1.bf16.msra.mxu0 %v4532_v11  ;;  %1276 = vmatpush1.bf16.msra.mxu1 %v4535_v12 }
 0x1b7   :  { %1236 = vmatprep.subr.bf16.mxu0 %v4545_v15  ;;  %1277 = vmatprep.subr.bf16.mxu1 %v4549_v16 }
 0x1ba   :  { %1237 = vmatpush1.bf16.msra.mxu0 %v4552_v18  ;;  %1278 = vmatpush1.bf16.msra.mxu1 %v4555_v19 }
 0x1bb   :  { %1238 = vmatprep.subr.bf16.mxu0 %v4559_v20  ;;  %1279 = vmatprep.subr.bf16.mxu1 %v4562_v21 }
 0x1be   :  { %1239 = vmatpush1.bf16.msra.mxu0 %v4564_v22  ;;  %1280 = vmatpush1.bf16.msra.mxu1 %v4575_v33 }
 0x1bf   :  { %1240 = vmatprep.subr.bf16.mxu0 %v4577_v35  ;;  %1281 = vmatprep.subr.bf16.mxu1 %v4581_v36 }
 0x1c2   :  { %1241 = vmatpush1.bf16.msra.mxu0 %v4585_v38  ;;  %1282 = vmatpush1.bf16.msra.mxu1 %v4589_v39 }
 0x1c3   :  { %1242 = vmatprep.subr.bf16.mxu0 %v4591_v40  ;;  %1283 = vmatprep.subr.bf16.mxu1 %v4594_v41 }
 0x1c6   :  { %1243 = vmatpush1.bf16.msra.mxu0 %v4597_v42  ;;  %1284 = vmatpush1.bf16.msra.mxu1 %v4607_v45 }
 0x1c7   :  { %1244 = vmatprep.subr.bf16.mxu0 %v4609_v46  ;;  %1285 = vmatprep.subr.bf16.mxu1 %v4613_v47 }
 0x1ca   :  { %1245 = vmatpush1.bf16.msra.mxu0 %v4617_v49  ;;  %1286 = vmatpush1.bf16.msra.mxu1 %v4621_v50 }
 0x1cb   :  { %1246 = vmatprep.subr.bf16.mxu0 %v4623_v51  ;;  %1287 = vmatprep.subr.bf16.mxu1 %v4626_v52 }
 0x1ce   :  { %1247 = vmatpush1.bf16.msra.mxu0 %v4629_v53  ;;  %1288 = vmatpush1.bf16.msra.mxu1 %v4636_v55 }
 0x1cf   :  { %1350 = vmatprep.subr.bf16.mxu0 %v4518_v4  ;;  %1391 = vmatprep.subr.bf16.mxu1 %v4520_v5 }
 0x284   :  { %v1148_v37 = vpop.f32.mrb[20].mxu0  ;;  %v1189_v63 = vpop.f32.mrb[20].mxu1 }
 0x285   :  { %v1196_v29 = vadd.f32 %v1148_v37, %v4704_v24  ;;  %v1198_v54 = vadd.f32 %v1189_v63, %v4709_v48  ;;  %v1150_v28 = vpop.f32.mrb[21].mxu0  ;;  %v1191_v62 = vpop.f32.mrb[21].mxu1 }
 0x286   :  { %v1197_v17 = vadd.f32 %v1150_v28, %v4706_v44  ;;  %v1199_v0 = vadd.f32 %v1191_v62, %v4712_v56  ;;  %v1152_v1 = vpop.f32.mrb[22].mxu0  ;;  %v1193_v2 = vpop.f32.mrb[22].mxu1 }
 0x287   :  { %v3487_v3 = vmul.f32 -1.442695, %v1196_v29  ;;  %v1153_v6 = vpop.f32.mrb[23].mxu0  ;;  %v1194_v58 = vpop.f32.mrb[23].mxu1  ;;  %v5690_v2 = vld [vmem:[#allocation43_spill] sm:$0xff] }
 0x288   :  { %v3488_v60 = vmul.f32 -1.442695, %v1197_v17  ;;  %v3489_v30 = vmul.f32 -1.442695, %v1199_v0  ;;  %v5691_v6 = vld [vmem:[#allocation45_spill] sm:$0xff] }
 0x289   :  { %3724 = vpow2.f32 %v3487_v3 }
 0x28a   :  { %3726 = vpow2.f32 %v3488_v60 }
 0x28b   :  { %3728 = vpow2.f32 %v3489_v30 }
 0x28c   :  { %3730 = vtanh.f32 %v1198_v54 }
 0x293   :  { %v3725_v13 = vpop.eup %3724 }
 0x294   :  { %v3727_v14 = vpop.eup %3726  ;;  %v1203_v24 = vadd.f32 1.0, %v3725_v13 }
 0x295   :  { %v1209_v48 = vadd.f32 1.0, %v3727_v14  ;;  %v3729_v44 = vpop.eup %3728 }
 0x296   :  { %3732 = vrcp.f32 %v1203_v24  ;;  %v3731_v34 = vpop.eup %3730  ;;  %v1216_v59 = vadd.f32 1.0, %v3729_v44 }
 0x297   :  { %3734 = vrcp.f32 %v1209_v48 }
 0x298   :  { %3736 = vrcp.f32 %v1216_v59 }
 0x2a0   :  { %v3733_v56 = vpop.eup %3732 }
 0x2a1   :  { %v3735_v23 = vpop.eup %3734  ;;  %v1220_v57 = vmul.f32 %v3733_v56, %v3731_v34 }
 0x2a2   :  { %v1219_v27 = vmul.f32 %v3735_v23, %v4780_v31  ;;  %v3737_v37 = vpop.eup %3736 }
 0x2a4   :  { %v4826_v43 = vadd.f32 %v1220_v57, %v1219_v27 }
 0x2a6   :  { %3738 = vtanh.f32 %v4826_v43 }
 0x2b0   :  { %v3739_v63 = vpop.eup %3738 }
 0x2b1   :  { %v4829_v29 = vmul.f32 %v3739_v63, %v3737_v37 }
 0x2b3   :  { %v1231_v54 = vpack.c.bf16 %v4829_v29, %v4829_v29 }
 0x2b5   :  { %1265 = vmatmul.mubr.bf16.vlgmr.msra.gmra.mrb[24].mxu0 %v1231_v54  ;;  %1306 = vmatmul.mubr.bf16.vlgmr.msra.gmra.mrb[24].mxu1 %v1231_v54 }
 0x2b6   :  { %1351 = vmatpush1.bf16.msra.mxu0 %v4522_v7  ;;  %1392 = vmatpush1.bf16.msra.mxu1 %v4525_v8 }
 0x2b7   :  { %1352 = vmatprep.subr.bf16.mxu0 %v4527_v9  ;;  %1393 = vmatprep.subr.bf16.mxu1 %v4530_v10 }
 0x2b8   :  { %1382 = vmatprep.mubr.bf16.mxu0 %v5689_v25  ;;  %1423 = vmatprep.mubr.bf16.mxu1 %v5689_v25 }
 0x2ba   :  { %1353 = vmatpush1.bf16.msra.mxu0 %v4532_v11  ;;  %1394 = vmatpush1.bf16.msra.mxu1 %v4535_v12 }
 0x2bb   :  { %1354 = vmatprep.subr.bf16.mxu0 %v4545_v15  ;;  %1395 = vmatprep.subr.bf16.mxu1 %v4549_v16 }
 0x2be   :  { %1355 = vmatpush1.bf16.msra.mxu0 %v4552_v18  ;;  %1396 = vmatpush1.bf16.msra.mxu1 %v4555_v19 }
 0x2bf   :  { %1356 = vmatprep.subr.bf16.mxu0 %v4559_v20  ;;  %1397 = vmatprep.subr.bf16.mxu1 %v4562_v21 }
 0x2c2   :  { %1357 = vmatpush1.bf16.msra.mxu0 %v4564_v22  ;;  %1398 = vmatpush1.bf16.msra.mxu1 %v4575_v33 }
 0x2c3   :  { %1358 = vmatprep.subr.bf16.mxu0 %v4577_v35  ;;  %1399 = vmatprep.subr.bf16.mxu1 %v4581_v36 }
 0x2c6   :  { %1359 = vmatpush1.bf16.msra.mxu0 %v4585_v38  ;;  %1400 = vmatpush1.bf16.msra.mxu1 %v4589_v39 }
 0x2c7   :  { %1360 = vmatprep.subr.bf16.mxu0 %v4591_v40  ;;  %1401 = vmatprep.subr.bf16.mxu1 %v4594_v41 }
 0x2ca   :  { %1361 = vmatpush1.bf16.msra.mxu0 %v4597_v42  ;;  %1402 = vmatpush1.bf16.msra.mxu1 %v4607_v45 }
 0x2cb   :  { %1362 = vmatprep.subr.bf16.mxu0 %v4609_v46  ;;  %1403 = vmatprep.subr.bf16.mxu1 %v4613_v47 }
 0x2ce   :  { %1363 = vmatpush1.bf16.msra.mxu0 %v4617_v49  ;;  %1404 = vmatpush1.bf16.msra.mxu1 %v4621_v50 }
 0x2cf   :  { %1364 = vmatprep.subr.bf16.mxu0 %v4623_v51  ;;  %1405 = vmatprep.subr.bf16.mxu1 %v4626_v52 }
 0x2d2   :  { %1365 = vmatpush1.bf16.msra.mxu0 %v4629_v53  ;;  %1406 = vmatpush1.bf16.msra.mxu1 %v4636_v55 }
 0x2d3   :  { %1468 = vmatprep.subr.bf16.mxu0 %v4518_v4  ;;  %1509 = vmatprep.subr.bf16.mxu1 %v4520_v5 }
 0x388   :  { %v1266_v31 = vpop.f32.mrb[24].mxu0  ;;  %v1307_v28 = vpop.f32.mrb[24].mxu1 }
 0x389   :  { %v1314_v62 = vadd.f32 %v1266_v31, %v4714_v61  ;;  %v1316_v17 = vadd.f32 %v1307_v28, %v4719_v32  ;;  %v1268_v0 = vpop.f32.mrb[25].mxu0  ;;  %v1309_v1 = vpop.f32.mrb[25].mxu1 }
 0x38a   :  { %v1315_v3 = vadd.f32 %v1268_v0, %v5690_v2  ;;  %v1317_v58 = vadd.f32 %v1309_v1, %v5691_v6  ;;  %v1270_v60 = vpop.f32.mrb[26].mxu0  ;;  %v1311_v30 = vpop.f32.mrb[26].mxu1  ;;  %v5692_v2 = vld [vmem:[#allocation44_spill] sm:$0xff]  ;;  %v5693_v6 = vld [vmem:[#allocation47_spill] sm:$0xff] }
 0x38b   :  { %v3490_v13 = vmul.f32 -1.442695, %v1314_v62  ;;  %v1271_v14 = vpop.f32.mrb[27].mxu0  ;;  %v1312_v24 = vpop.f32.mrb[27].mxu1 }
 0x38c   :  { %v3491_v48 = vmul.f32 -1.442695, %v1315_v3  ;;  %v3492_v44 = vmul.f32 -1.442695, %v1317_v58  ;;  %v5695_v24 = vld [vmem:[#allocation48_spill] sm:$0xff] }
 0x38d   :  { %3740 = vpow2.f32 %v3490_v13  ;;  %v5694_v13 = vld [vmem:[#allocation46_spill] sm:$0xff] }
 0x38e   :  { %3742 = vpow2.f32 %v3491_v48 }
 0x38f   :  { %3744 = vpow2.f32 %v3492_v44 }
 0x390   :  { %3746 = vtanh.f32 %v1316_v17 }
 0x397   :  { %v3741_v34 = vpop.eup %3740 }
 0x398   :  { %v3743_v56 = vpop.eup %3742  ;;  %v1321_v61 = vadd.f32 1.0, %v3741_v34 }
 0x399   :  { %v1327_v32 = vadd.f32 1.0, %v3743_v56  ;;  %v3745_v23 = vpop.eup %3744 }
 0x39a   :  { %3748 = vrcp.f32 %v1321_v61  ;;  %v3747_v57 = vpop.eup %3746  ;;  %v1334_v63 = vadd.f32 1.0, %v3745_v23 }
 0x39b   :  { %3750 = vrcp.f32 %v1327_v32 }
 0x39c   :  { %3752 = vrcp.f32 %v1334_v63 }
 0x3a4   :  { %v3749_v59 = vpop.eup %3748 }
 0x3a5   :  { %v3751_v27 = vpop.eup %3750  ;;  %v1338_v37 = vmul.f32 %v3749_v59, %v3747_v57 }
 0x3a6   :  { %v1337_v54 = vmul.f32 %v3751_v27, %v4826_v43  ;;  %v3753_v28 = vpop.eup %3752 }
 0x3a8   :  { %v4872_v31 = vadd.f32 %v1338_v37, %v1337_v54 }
 0x3aa   :  { %3754 = vtanh.f32 %v4872_v31 }
 0x3b4   :  { %v3755_v62 = vpop.eup %3754 }
 0x3b5   :  { %v4875_v0 = vmul.f32 %v3755_v62, %v3753_v28 }
 0x3b7   :  { %v1349_v17 = vpack.c.bf16 %v4875_v0, %v4875_v0 }
 0x3b9   :  { %1383 = vmatmul.mubr.bf16.vlgmr.msra.gmra.mrb[28].mxu0 %v1349_v17  ;;  %1424 = vmatmul.mubr.bf16.vlgmr.msra.gmra.mrb[28].mxu1 %v1349_v17 }
 0x3ba   :  { %1469 = vmatpush1.bf16.msra.mxu0 %v4522_v7  ;;  %1510 = vmatpush1.bf16.msra.mxu1 %v4525_v8 }
 0x3bb   :  { %1470 = vmatprep.subr.bf16.mxu0 %v4527_v9  ;;  %1511 = vmatprep.subr.bf16.mxu1 %v4530_v10 }
 0x3bc   :  { %1500 = vmatprep.mubr.bf16.mxu0 %v5689_v25  ;;  %1541 = vmatprep.mubr.bf16.mxu1 %v5689_v25 }
 0x3be   :  { %1471 = vmatpush1.bf16.msra.mxu0 %v4532_v11  ;;  %1512 = vmatpush1.bf16.msra.mxu1 %v4535_v12 }
 0x3bf   :  { %1472 = vmatprep.subr.bf16.mxu0 %v4545_v15  ;;  %1513 = vmatprep.subr.bf16.mxu1 %v4549_v16 }
 0x3c2   :  { %1473 = vmatpush1.bf16.msra.mxu0 %v4552_v18  ;;  %1514 = vmatpush1.bf16.msra.mxu1 %v4555_v19 }
 0x3c3   :  { %1474 = vmatprep.subr.bf16.mxu0 %v4559_v20  ;;  %1515 = vmatprep.subr.bf16.mxu1 %v4562_v21 }
 0x3c6   :  { %1475 = vmatpush1.bf16.msra.mxu0 %v4564_v22  ;;  %1516 = vmatpush1.bf16.msra.mxu1 %v4575_v33 }
 0x3c7   :  { %1476 = vmatprep.subr.bf16.mxu0 %v4577_v35  ;;  %1517 = vmatprep.subr.bf16.mxu1 %v4581_v36 }
 0x3ca   :  { %1477 = vmatpush1.bf16.msra.mxu0 %v4585_v38  ;;  %1518 = vmatpush1.bf16.msra.mxu1 %v4589_v39 }
 0x3cb   :  { %1478 = vmatprep.subr.bf16.mxu0 %v4591_v40  ;;  %1519 = vmatprep.subr.bf16.mxu1 %v4594_v41 }
 0x3ce   :  { %1479 = vmatpush1.bf16.msra.mxu0 %v4597_v42  ;;  %1520 = vmatpush1.bf16.msra.mxu1 %v4607_v45 }
 0x3cf   :  { %1480 = vmatprep.subr.bf16.mxu0 %v4609_v46  ;;  %1521 = vmatprep.subr.bf16.mxu1 %v4613_v47 }
 0x3d2   :  { %1481 = vmatpush1.bf16.msra.mxu0 %v4617_v49  ;;  %1522 = vmatpush1.bf16.msra.mxu1 %v4621_v50 }
 0x3d3   :  { %1482 = vmatprep.subr.bf16.mxu0 %v4623_v51  ;;  %1523 = vmatprep.subr.bf16.mxu1 %v4626_v52 }
 0x3d6   :  { %1483 = vmatpush1.bf16.msra.mxu0 %v4629_v53  ;;  %1524 = vmatpush1.bf16.msra.mxu1 %v4636_v55 }
 0x3d7   :  { %1586 = vmatprep.subr.bf16.mxu0 %v4518_v4  ;;  %1627 = vmatprep.subr.bf16.mxu1 %v4520_v5 }
 0x48c   :  { %v1384_v43 = vpop.f32.mrb[28].mxu0  ;;  %v1425_v1 = vpop.f32.mrb[28].mxu1 }
 0x48d   :  { %v1432_v3 = vadd.f32 %v1384_v43, %v5692_v2  ;;  %v1434_v58 = vadd.f32 %v1425_v1, %v5693_v6  ;;  %v1386_v60 = vpop.f32.mrb[29].mxu0  ;;  %v1427_v30 = vpop.f32.mrb[29].mxu1 }
 0x48e   :  { %v1433_v14 = vadd.f32 %v1386_v60, %v5694_v13  ;;  %v1435_v48 = vadd.f32 %v1427_v30, %v5695_v24  ;;  %v1388_v44 = vpop.f32.mrb[30].mxu0  ;;  %v1429_v34 = vpop.f32.mrb[30].mxu1 }
 0x48f   :  { %v3493_v56 = vmul.f32 -1.442695, %v1432_v3  ;;  %v1389_v61 = vpop.f32.mrb[31].mxu0  ;;  %v1430_v32 = vpop.f32.mrb[31].mxu1 }
 0x490   :  { %v3494_v4 = vmul.f32 -1.442695, %v1433_v14  ;;  %v3495_v5 = vmul.f32 -1.442695, %v1435_v48 }
 0x491   :  { %3756 = vpow2.f32 %v3493_v56 }
 0x492   :  { %3758 = vpow2.f32 %v3494_v4 }
 0x493   :  { %3760 = vpow2.f32 %v3495_v5 }
 0x494   :  { %3762 = vtanh.f32 %v1434_v58 }
 0x49b   :  { %v3757_v23 = vpop.eup %3756 }
 0x49c   :  { %v3759_v57 = vpop.eup %3758  ;;  %v1439_v59 = vadd.f32 1.0, %v3757_v23 }
 0x49d   :  { %v1445_v27 = vadd.f32 1.0, %v3759_v57  ;;  %v3761_v37 = vpop.eup %3760 }
 0x49e   :  { %3764 = vrcp.f32 %v1439_v59  ;;  %v3763_v63 = vpop.eup %3762  ;;  %v1452_v17 = vadd.f32 1.0, %v3761_v37  ;;  %v4978_v37 = vld [vmem:[#allocation10 + $0x8] ss:$16 sps:$4 sm:$0xff]  }
 0x49f   :  { %3766 = vrcp.f32 %v1445_v27  ;;  %v4975_v27 = vld [vmem:[#allocation10] ss:$16 sps:$4 sm:$0xff]  }
 0x4a0   :  { %3768 = vrcp.f32 %v1452_v17  ;;  %v4995_v17 = vld [vmem:[#allocation10 + $0x44] ss:$16 sps:$4 sm:$0xff]  }
 0x4a8   :  { %v3765_v54 = vpop.eup %3764 }
 0x4a9   :  { %v3767_v28 = vpop.eup %3766  ;;  %v1456_v62 = vmul.f32 %v3765_v54, %v3763_v63  ;;  %v4981_v63 = vld [vmem:[#allocation10 + $0x24] ss:$16 sps:$4 sm:$0xff]   ;;  %v4984_v54 = vld [vmem:[#allocation10 + $0x2c] ss:$16 sps:$4 sm:$0xff]  }
 0x4aa   :  { %v1455_v43 = vmul.f32 %v3767_v28, %v4872_v31  ;;  %v3769_v2 = vpop.eup %3768  ;;  %v4989_v28 = vld [vmem:[#allocation10 + $0x20] ss:$16 sps:$4 sm:$0xff]  }
 0x4ac   :  { %v4918_v1 = vadd.f32 %v1456_v62, %v1455_v43  ;;  %v4992_v62 = vld [vmem:[#allocation10 + $0x28] ss:$16 sps:$4 sm:$0xff]   ;;  %v4998_v43 = vld [vmem:[#allocation10 + $0x4c] ss:$16 sps:$4 sm:$0xff]  }
 0x4ae   :  { %3770 = vtanh.f32 %v4918_v1 }
 0x4b8   :  { %v3771_v3 = vpop.eup %3770 }
 0x4b9   :  { %v4921_v6 = vmul.f32 %v3771_v3, %v3769_v2  ;;  %v5004_v2 = vld [vmem:[#allocation10 + $0x48] ss:$16 sps:$4 sm:$0xff]   ;;  %v5007_v3 = vld [vmem:[#allocation10 + $0x64] ss:$16 sps:$4 sm:$0xff]  }
 0x4bb   :  { %v1467_v58 = vpack.c.bf16 %v4921_v6, %v4921_v6 }
 0x4bd   :  { %1501 = vmatmul.mubr.bf16.vlgmr.msra.gmra.mrb[32].mxu0 %v1467_v58  ;;  %1542 = vmatmul.mubr.bf16.vlgmr.msra.gmra.mrb[32].mxu1 %v1467_v58  ;;  %v5010_v58 = vld [vmem:[#allocation10 + $0x6c] ss:$16 sps:$4 sm:$0xff]  }
 0x4be   :  { %1587 = vmatpush1.bf16.msra.mxu0 %v4522_v7  ;;  %1628 = vmatpush1.bf16.msra.mxu1 %v4525_v8  ;;  %v4957_v7 = vld [vmem:[#allocation10 + $0x4] ss:$16 sps:$4 sm:$0xff]   ;;  %v4960_v8 = vld [vmem:[#allocation10 + $0xc] ss:$16 sps:$4 sm:$0xff]  }
 0x4bf   :  { %1588 = vmatprep.subr.bf16.mxu0 %v4527_v9  ;;  %1629 = vmatprep.subr.bf16.mxu1 %v4530_v10 }
 0x4c0   :  { %1618 = vmatprep.mubr.bf16.mxu0 %v5689_v25  ;;  %1659 = vmatprep.mubr.bf16.mxu1 %v5689_v25 }
 0x4c2   :  { %1589 = vmatpush1.bf16.msra.mxu0 %v4532_v11  ;;  %1630 = vmatpush1.bf16.msra.mxu1 %v4535_v12  ;;  %v5696_v11 = vld [vmem:[#allocation49_spill] sm:$0xff] }
 0x4c3   :  { %1590 = vmatprep.subr.bf16.mxu0 %v4545_v15  ;;  %1631 = vmatprep.subr.bf16.mxu1 %v4549_v16  ;;  %v5697_v15 = vld [vmem:[#allocation51_spill] sm:$0xff] }
 0x4c6   :  { %1591 = vmatpush1.bf16.msra.mxu0 %v4552_v18  ;;  %1632 = vmatpush1.bf16.msra.mxu1 %v4555_v19 }
 0x4c7   :  { %1592 = vmatprep.subr.bf16.mxu0 %v4559_v20  ;;  %1633 = vmatprep.subr.bf16.mxu1 %v4562_v21  ;;  %v5698_v20 = vld [vmem:[#allocation50_spill] sm:$0xff] }
 0x4ca   :  { %1593 = vmatpush1.bf16.msra.mxu0 %v4564_v22  ;;  %1634 = vmatpush1.bf16.msra.mxu1 %v4575_v33  ;;  %v5699_v22 = vld [vmem:[#allocation53_spill] sm:$0xff] }
 0x4cb   :  { %1594 = vmatprep.subr.bf16.mxu0 %v4577_v35  ;;  %1635 = vmatprep.subr.bf16.mxu1 %v4581_v36 }
 0x4ce   :  { %1595 = vmatpush1.bf16.msra.mxu0 %v4585_v38  ;;  %1636 = vmatpush1.bf16.msra.mxu1 %v4589_v39 }
 0x4cf   :  { %1596 = vmatprep.subr.bf16.mxu0 %v4591_v40  ;;  %1637 = vmatprep.subr.bf16.mxu1 %v4594_v41 }
 0x4d2   :  { %1597 = vmatpush1.bf16.msra.mxu0 %v4597_v42  ;;  %1638 = vmatpush1.bf16.msra.mxu1 %v4607_v45 }
 0x4d3   :  { %1598 = vmatprep.subr.bf16.mxu0 %v4609_v46  ;;  %1639 = vmatprep.subr.bf16.mxu1 %v4613_v47 }
 0x4d6   :  { %1599 = vmatpush1.bf16.msra.mxu0 %v4617_v49  ;;  %1640 = vmatpush1.bf16.msra.mxu1 %v4621_v50 }
 0x4d7   :  { %1600 = vmatprep.subr.bf16.mxu0 %v4623_v51  ;;  %1641 = vmatprep.subr.bf16.mxu1 %v4626_v52 }
 0x4da   :  { %1601 = vmatpush1.bf16.msra.mxu0 %v4629_v53  ;;  %1642 = vmatpush1.bf16.msra.mxu1 %v4636_v55 }
 0x4db   :  { %1704 = vmatprep.subr.bf16.mxu0 %v4957_v7  ;;  %1745 = vmatprep.subr.bf16.mxu1 %v4960_v8 }
 0x590   :  { %v1502_v9 = vpop.f32.mrb[32].mxu0  ;;  %v1543_v10 = vpop.f32.mrb[32].mxu1 }
 0x591   :  { %v1550_v12 = vadd.f32 %v1502_v9, %v5696_v11  ;;  %v1552_v16 = vadd.f32 %v1543_v10, %v5697_v15  ;;  %v1504_v18 = vpop.f32.mrb[33].mxu0  ;;  %v1545_v19 = vpop.f32.mrb[33].mxu1  ;;  %v5013_v9 = vld [vmem:[#allocation10 + $0x60] ss:$16 sps:$4 sm:$0xff]   ;;  %v5016_v10 = vld [vmem:[#allocation10 + $0x68] ss:$16 sps:$4 sm:$0xff]  }
 0x592   :  { %v1551_v21 = vadd.f32 %v1504_v18, %v5698_v20  ;;  %v1553_v33 = vadd.f32 %v1545_v19, %v5699_v22  ;;  %v1506_v35 = vpop.f32.mrb[34].mxu0  ;;  %v1547_v36 = vpop.f32.mrb[34].mxu1  ;;  %v5019_v11 = vld [vmem:[#allocation10 + $0x84] ss:$16 sps:$4 sm:$0xff]   ;;  %v5025_v15 = vld [vmem:[#allocation10 + $0x80] ss:$16 sps:$4 sm:$0xff]  }
 0x593   :  { %v3496_v38 = vmul.f32 -1.442695, %v1550_v12  ;;  %v1507_v39 = vpop.f32.mrb[35].mxu0  ;;  %v1548_v40 = vpop.f32.mrb[35].mxu1  ;;  %v5022_v12 = vld [vmem:[#allocation10 + $0x8c] ss:$16 sps:$4 sm:$0xff]  }
 0x594   :  { %v3497_v41 = vmul.f32 -1.442695, %v1551_v21  ;;  %v3498_v31 = vmul.f32 -1.442695, %v1553_v33  ;;  %v5031_v18 = vld [vmem:[#allocation10 + $0xa4] ss:$16 sps:$4 sm:$0xff]  }
 0x595   :  { %3772 = vpow2.f32 %v3496_v38  ;;  %v5034_v19 = vld [vmem:[#allocation10 + $0xac] ss:$16 sps:$4 sm:$0xff]  }
 0x596   :  { %3774 = vpow2.f32 %v3497_v41  ;;  %v5701_v20 = vld [vmem:[#allocation55_spill] sm:$0xff]  ;;  %v5702_v22 = vld [vmem:[#allocation54_spill] sm:$0xff]  ;;  %v5703_v33 = vld [vmem:[#allocation56_spill] sm:$0xff] }
 0x597   :  { %3776 = vpow2.f32 %v3498_v31 }
 0x598   :  { %3778 = vtanh.f32 %v1552_v16  ;;  %v5028_v16 = vld [vmem:[#allocation10 + $0x88] ss:$16 sps:$4 sm:$0xff]  }
 0x59f   :  { %v3773_v60 = vpop.eup %3772 }
 0x5a0   :  { %v3775_v30 = vpop.eup %3774  ;;  %v1557_v13 = vadd.f32 1.0, %v3773_v60 }
 0x5a1   :  { %v1563_v14 = vadd.f32 1.0, %v3775_v30  ;;  %v3777_v24 = vpop.eup %3776 }
 0x5a2   :  { %3780 = vrcp.f32 %v1557_v13  ;;  %v3779_v48 = vpop.eup %3778  ;;  %v1570_v61 = vadd.f32 1.0, %v3777_v24 }
 0x5a3   :  { %3782 = vrcp.f32 %v1563_v14 }
 0x5a4   :  { %3784 = vrcp.f32 %v1570_v61 }
 0x5ac   :  { %v3781_v44 = vpop.eup %3780 }
 0x5ad   :  { %v3783_v34 = vpop.eup %3782  ;;  %v1574_v56 = vmul.f32 %v3781_v44, %v3779_v48 }
 0x5ae   :  { %v1573_v32 = vmul.f32 %v3783_v34, %v4918_v1  ;;  %v3785_v5 = vpop.eup %3784  ;;  %v5001_v1 = vld [vmem:[#allocation10 + $0x40] ss:$16 sps:$4 sm:$0xff]  }
 0x5b0   :  { %v4968_v4 = vadd.f32 %v1574_v56, %v1573_v32 }
 0x5b2   :  { %3786 = vtanh.f32 %v4968_v4 }
 0x5bc   :  { %v3787_v23 = vpop.eup %3786 }
 0x5bd   :  { %v4971_v57 = vmul.f32 %v3787_v23, %v3785_v5  ;;  %v3859_v23 = vld [vmem:[#allocation10 + $0xa8] ss:$16 sps:$4 sm:$0xff]  }
 0x5bf   :  { %v1585_v59 = vpack.c.bf16 %v4971_v57, %v4971_v57 }
 0x5c1   :  { %1619 = vmatmul.mubr.bf16.vlgmr.msra.gmra.mrb[36].mxu0 %v1585_v59  ;;  %1660 = vmatmul.mubr.bf16.vlgmr.msra.gmra.mrb[36].mxu1 %v1585_v59  ;;  %v3860_v59 = vld [vmem:[#allocation10 + $0xc4] ss:$16 sps:$4 sm:$0xff]  }
 0x5c2   :  { %1705 = vmatpush1.bf16.msra.mxu0 %v4975_v27  ;;  %1746 = vmatpush1.bf16.msra.mxu1 %v4978_v37 }
 0x5c3   :  { %1706 = vmatprep.subr.bf16.mxu0 %v4981_v63  ;;  %1747 = vmatprep.subr.bf16.mxu1 %v4984_v54 }
 0x5c4   :  { %1736 = vmatprep.mubr.bf16.mxu0 %v5689_v25  ;;  %1777 = vmatprep.mubr.bf16.mxu1 %v5689_v25 }
 0x5c6   :  { %1707 = vmatpush1.bf16.msra.mxu0 %v4989_v28  ;;  %1748 = vmatpush1.bf16.msra.mxu1 %v4992_v62 }
 0x5c7   :  { %1708 = vmatprep.subr.bf16.mxu0 %v4995_v17  ;;  %1749 = vmatprep.subr.bf16.mxu1 %v4998_v43 }
 0x5ca   :  { %1709 = vmatpush1.bf16.msra.mxu0 %v5001_v1  ;;  %1750 = vmatpush1.bf16.msra.mxu1 %v5004_v2 }
 0x5cb   :  { %1710 = vmatprep.subr.bf16.mxu0 %v5007_v3  ;;  %1751 = vmatprep.subr.bf16.mxu1 %v5010_v58 }
 0x5ce   :  { %1711 = vmatpush1.bf16.msra.mxu0 %v5013_v9  ;;  %1752 = vmatpush1.bf16.msra.mxu1 %v5016_v10 }
 0x5cf   :  { %1712 = vmatprep.subr.bf16.mxu0 %v5019_v11  ;;  %1753 = vmatprep.subr.bf16.mxu1 %v5022_v12 }
 0x5d2   :  { %1713 = vmatpush1.bf16.msra.mxu0 %v5025_v15  ;;  %1754 = vmatpush1.bf16.msra.mxu1 %v5028_v16 }
 0x5d3   :  { %1714 = vmatprep.subr.bf16.mxu0 %v5031_v18  ;;  %1755 = vmatprep.subr.bf16.mxu1 %v5034_v19 }
 0x5d6   :  { %1715 = vmatpush1.bf16.msra.mxu0 %v4597_v42  ;;  %1756 = vmatpush1.bf16.msra.mxu1 %v4607_v45 }
 0x5d7   :  { %1716 = vmatprep.subr.bf16.mxu0 %v4609_v46  ;;  %1757 = vmatprep.subr.bf16.mxu1 %v4613_v47  ;;  %v5700_v46 = vld [vmem:[#allocation52_spill] sm:$0xff] }
 0x5da   :  { %1717 = vmatpush1.bf16.msra.mxu0 %v4617_v49  ;;  %1758 = vmatpush1.bf16.msra.mxu1 %v4621_v50 }
 0x5db   :  { %1718 = vmatprep.subr.bf16.mxu0 %v4623_v51  ;;  %1759 = vmatprep.subr.bf16.mxu1 %v4626_v52 }
 0x5de   :  { %1719 = vmatpush1.bf16.msra.mxu0 %v4629_v53  ;;  %1760 = vmatpush1.bf16.msra.mxu1 %v4636_v55 }
 0x5df   :  { %1822 = vmatprep.subr.bf16.mxu0 %v4957_v7  ;;  %1863 = vmatprep.subr.bf16.mxu1 %v4960_v8 }
 0x694   :  { %v1620_v42 = vpop.f32.mrb[36].mxu0  ;;  %v1661_v45 = vpop.f32.mrb[36].mxu1 }
 0x695   :  { %v1668_v47 = vadd.f32 %v1620_v42, %v5700_v46  ;;  %v1670_v49 = vadd.f32 %v1661_v45, %v5701_v20  ;;  %v1622_v21 = vpop.f32.mrb[37].mxu0  ;;  %v1663_v50 = vpop.f32.mrb[37].mxu1 }
 0x696   :  { %v1669_v51 = vadd.f32 %v1622_v21, %v5702_v22  ;;  %v1671_v52 = vadd.f32 %v1663_v50, %v5703_v33  ;;  %v1624_v35 = vpop.f32.mrb[38].mxu0  ;;  %v1665_v53 = vpop.f32.mrb[38].mxu1 }
 0x697   :  { %v3499_v36 = vmul.f32 -1.442695, %v1668_v47  ;;  %v1625_v55 = vpop.f32.mrb[39].mxu0  ;;  %v1666_v38 = vpop.f32.mrb[39].mxu1 }
 0x698   :  { %v3500_v7 = vmul.f32 -1.442695, %v1669_v51  ;;  %v3501_v8 = vmul.f32 -1.442695, %v1671_v52 }
 0x699   :  { %3788 = vpow2.f32 %v3499_v36 }
 0x69a   :  { %3790 = vpow2.f32 %v3500_v7 }
 0x69b   :  { %3792 = vpow2.f32 %v3501_v8 }
 0x69c   :  { %3794 = vtanh.f32 %v1670_v49 }
 0x6a3   :  { %v3789_v39 = vpop.eup %3788 }
 0x6a4   :  { %v3791_v40 = vpop.eup %3790  ;;  %v1675_v41 = vadd.f32 1.0, %v3789_v39 }
 0x6a5   :  { %v1681_v31 = vadd.f32 1.0, %v3791_v40  ;;  %v3793_v60 = vpop.eup %3792 }
 0x6a6   :  { %3796 = vrcp.f32 %v1675_v41  ;;  %v3795_v30 = vpop.eup %3794  ;;  %v1688_v48 = vadd.f32 1.0, %v3793_v60 }
 0x6a7   :  { %3798 = vrcp.f32 %v1681_v31 }
 0x6a8   :  { %3800 = vrcp.f32 %v1688_v48 }
 0x6b0   :  { %v3797_v13 = vpop.eup %3796 }
 0x6b1   :  { %v3799_v14 = vpop.eup %3798  ;;  %v1692_v24 = vmul.f32 %v3797_v13, %v3795_v30  ;;  %v5708_v30 = vld [vmem:[#allocation60_spill] sm:$0xff] }
 0x6b2   :  { %v1691_v44 = vmul.f32 %v3799_v14, %v4968_v4  ;;  %v3801_v56 = vpop.eup %3800  ;;  %v3858_v4 = vld [vmem:[#allocation10 + $0xa0] ss:$16 sps:$4 sm:$0xff]  }
 0x6b3   :  { %v5709_v14 = vld [vmem:[#allocation63_spill] sm:$0xff] }
 0x6b4   :  { %v5054_v34 = vadd.f32 %v1692_v24, %v1691_v44 }
 0x6b6   :  { %3802 = vtanh.f32 %v5054_v34 }
 0x6c0   :  { %v3803_v61 = vpop.eup %3802 }
 0x6c1   :  { %v5057_v32 = vmul.f32 %v3803_v61, %v3801_v56  ;;  %v5711_v61 = vld [vmem:[#allocation64_spill] sm:$0xff] }
 0x6c3   :  { %v1703_v5 = vpack.c.bf16 %v5057_v32, %v5057_v32 }
 0x6c5   :  { %1737 = vmatmul.mubr.bf16.vlgmr.msra.gmra.mrb[40].mxu0 %v1703_v5  ;;  %1778 = vmatmul.mubr.bf16.vlgmr.msra.gmra.mrb[40].mxu1 %v1703_v5 }
 0x6c6   :  { %1823 = vmatpush1.bf16.msra.mxu0 %v4975_v27  ;;  %1864 = vmatpush1.bf16.msra.mxu1 %v4978_v37  ;;  %v3861_v27 = vld [vmem:[#allocation10 + $0xcc] ss:$16 sps:$4 sm:$0xff]   ;;  %v3862_v37 = vld [vmem:[#allocation10 + $0xc0] ss:$16 sps:$4 sm:$0xff]  }
 0x6c7   :  { %1824 = vmatprep.subr.bf16.mxu0 %v4981_v63  ;;  %1865 = vmatprep.subr.bf16.mxu1 %v4984_v54  ;;  %v3863_v63 = vld [vmem:[#allocation10 + $0xc8] ss:$16 sps:$4 sm:$0xff]   ;;  %v3864_v54 = vld [vmem:[#allocation10 + $0xe4] ss:$16 sps:$4 sm:$0xff]  }
 0x6c8   :  { %1854 = vmatprep.mubr.bf16.mxu0 %v5689_v25  ;;  %1895 = vmatprep.mubr.bf16.mxu1 %v5689_v25 }
 0x6ca   :  { %1825 = vmatpush1.bf16.msra.mxu0 %v4989_v28  ;;  %1866 = vmatpush1.bf16.msra.mxu1 %v4992_v62  ;;  %v3865_v28 = vld [vmem:[#allocation10 + $0xec] ss:$16 sps:$4 sm:$0xff]   ;;  %v3866_v62 = vld [vmem:[#allocation10 + $0xe0] ss:$16 sps:$4 sm:$0xff]  }
 0x6cb   :  { %1826 = vmatprep.subr.bf16.mxu0 %v4995_v17  ;;  %1867 = vmatprep.subr.bf16.mxu1 %v4998_v43  ;;  %v3867_v17 = vld [vmem:[#allocation10 + $0xe8] ss:$16 sps:$4 sm:$0xff]  }
 0x6ce   :  { %1827 = vmatpush1.bf16.msra.mxu0 %v5001_v1  ;;  %1868 = vmatpush1.bf16.msra.mxu1 %v5004_v2  ;;  %v5704_v2 = vld [vmem:[#allocation57_spill] sm:$0xff] }
 0x6cf   :  { %1828 = vmatprep.subr.bf16.mxu0 %v5007_v3  ;;  %1869 = vmatprep.subr.bf16.mxu1 %v5010_v58  ;;  %v5705_v58 = vld [vmem:[#allocation59_spill] sm:$0xff] }
 0x6d2   :  { %1829 = vmatpush1.bf16.msra.mxu0 %v5013_v9  ;;  %1870 = vmatpush1.bf16.msra.mxu1 %v5016_v10 }
 0x6d3   :  { %1830 = vmatprep.subr.bf16.mxu0 %v5019_v11  ;;  %1871 = vmatprep.subr.bf16.mxu1 %v5022_v12  ;;  %v5706_v12 = vld [vmem:[#allocation58_spill] sm:$0xff] }
 0x6d6   :  { %1831 = vmatpush1.bf16.msra.mxu0 %v5025_v15  ;;  %1872 = vmatpush1.bf16.msra.mxu1 %v5028_v16  ;;  %v5707_v16 = vld [vmem:[#allocation61_spill] sm:$0xff] }
 0x6d7   :  { %1832 = vmatprep.subr.bf16.mxu0 %v5031_v18  ;;  %1873 = vmatprep.subr.bf16.mxu1 %v5034_v19 }
 0x6da   :  { %1833 = vmatpush1.bf16.msra.mxu0 %v3858_v4  ;;  %1874 = vmatpush1.bf16.msra.mxu1 %v3859_v23 }
 0x6db   :  { %1834 = vmatprep.subr.bf16.mxu0 %v3860_v59  ;;  %1875 = vmatprep.subr.bf16.mxu1 %v3861_v27 }
 0x6de   :  { %1835 = vmatpush1.bf16.msra.mxu0 %v3862_v37  ;;  %1876 = vmatpush1.bf16.msra.mxu1 %v3863_v63 }
 0x6df   :  { %1836 = vmatprep.subr.bf16.mxu0 %v3864_v54  ;;  %1877 = vmatprep.subr.bf16.mxu1 %v3865_v28 }
 0x6e2   :  { %1837 = vmatpush1.bf16.msra.mxu0 %v3866_v62  ;;  %1878 = vmatpush1.bf16.msra.mxu1 %v3867_v17 }
 0x798   :  { %v1738_v43 = vpop.f32.mrb[40].mxu0  ;;  %v1779_v1 = vpop.f32.mrb[40].mxu1 }
 0x799   :  { %v1786_v3 = vadd.f32 %v1738_v43, %v5704_v2  ;;  %v1788_v9 = vadd.f32 %v1779_v1, %v5705_v58  ;;  %v1740_v10 = vpop.f32.mrb[41].mxu0  ;;  %v1781_v11 = vpop.f32.mrb[41].mxu1 }
 0x79a   :  { %v1787_v15 = vadd.f32 %v1740_v10, %v5706_v12  ;;  %v1789_v18 = vadd.f32 %v1781_v11, %v5707_v16  ;;  %v1742_v19 = vpop.f32.mrb[42].mxu0  ;;  %v1783_v42 = vpop.f32.mrb[42].mxu1 }
 0x79b   :  { %v3502_v45 = vmul.f32 -1.442695, %v1786_v3  ;;  %v1743_v46 = vpop.f32.mrb[43].mxu0  ;;  %v1784_v47 = vpop.f32.mrb[43].mxu1 }
 0x79c   :  { %v3503_v20 = vmul.f32 -1.442695, %v1787_v15  ;;  %v3504_v49 = vmul.f32 -1.442695, %v1789_v18 }
 0x79d   :  { %3804 = vpow2.f32 %v3502_v45 }
 0x79e   :  { %3806 = vpow2.f32 %v3503_v20 }
 0x79f   :  { %3808 = vpow2.f32 %v3504_v49 }
 0x7a0   :  { %3810 = vtanh.f32 %v1788_v9 }
 0x7a7   :  { %v3805_v21 = vpop.eup %3804 }
 0x7a8   :  { %v3807_v50 = vpop.eup %3806  ;;  %v1793_v22 = vadd.f32 1.0, %v3805_v21 }
 0x7a9   :  { %v1799_v51 = vadd.f32 1.0, %v3807_v50  ;;  %v3809_v33 = vpop.eup %3808 }
 0x7aa   :  { %3812 = vrcp.f32 %v1793_v22  ;;  %v3811_v52 = vpop.eup %3810  ;;  %v1806_v55 = vadd.f32 1.0, %v3809_v33 }
 0x7ab   :  { %3814 = vrcp.f32 %v1799_v51 }
 0x7ac   :  { %3816 = vrcp.f32 %v1806_v55 }
 0x7b4   :  { %v3813_v35 = vpop.eup %3812 }
 0x7b5   :  { %v3815_v53 = vpop.eup %3814  ;;  %v1810_v36 = vmul.f32 %v3813_v35, %v3811_v52 }
 0x7b6   :  { %v1809_v38 = vmul.f32 %v3815_v53, %v5054_v34  ;;  %v3817_v8 = vpop.eup %3816  ;;  %v5710_v34 = vld [vmem:[#allocation62_spill] sm:$0xff] }
 0x7b8   :  { %v1811_v7 = vadd.f32 %v1810_v36, %v1809_v38 }
 0x7ba   :  { %3818 = vtanh.f32 %v1811_v7 }
 0x7c4   :  { %v3819_v39 = vpop.eup %3818 }
 0x7c5   :  { %v5088_v40 = vmul.f32 %v3819_v39, %v3817_v8 }
 0x7c7   :  { %v1821_v41 = vpack.c.bf16 %v5088_v40, %v5088_v40 }
 0x7c9   :  { %1855 = vmatmul.mubr.bf16.vlgmr.msra.gmra.mrb[44].mxu0 %v1821_v41  ;;  %1896 = vmatmul.mubr.bf16.vlgmr.msra.gmra.mrb[44].mxu1 %v1821_v41 }
 0x89c   :  { %v1856_v31 = vpop.f32.mrb[44].mxu0  ;;  %v1897_v60 = vpop.f32.mrb[44].mxu1 }
 0x89d   :  { %v1904_v13 = vadd.f32 %v1856_v31, %v5708_v30  ;;  %v1906_v24 = vadd.f32 %v1897_v60, %v5709_v14  ;;  %v1858_v48 = vpop.f32.mrb[45].mxu0  ;;  %v1899_v44 = vpop.f32.mrb[45].mxu1 }
 0x89e   :  { %v1905_v56 = vadd.f32 %v1858_v48, %v5710_v34  ;;  %v1907_v5 = vadd.f32 %v1899_v44, %v5711_v61  ;;  %v1860_v4 = vpop.f32.mrb[46].mxu0  ;;  %v1901_v23 = vpop.f32.mrb[46].mxu1 }
 0x89f   :  { %v3505_v59 = vmul.f32 -1.442695, %v1904_v13  ;;  %v1861_v27 = vpop.f32.mrb[47].mxu0  ;;  %v1902_v37 = vpop.f32.mrb[47].mxu1 }
 0x8a0   :  { %v3506_v63 = vmul.f32 -1.442695, %v1905_v56  ;;  %v3507_v54 = vmul.f32 -1.442695, %v1907_v5 }
 0x8a1   :  { %3820 = vpow2.f32 %v3505_v59 }
 0x8a2   :  { %3822 = vpow2.f32 %v3506_v63 }
 0x8a3   :  { %3824 = vpow2.f32 %v3507_v54 }
 0x8a4   :  { %3826 = vtanh.f32 %v1906_v24 }
 0x8ab   :  { %v3821_v28 = vpop.eup %3820 }
 0x8ac   :  { %v3823_v62 = vpop.eup %3822  ;;  %v1911_v17 = vadd.f32 1.0, %v3821_v28 }
 0x8ad   :  { %v1917_v43 = vadd.f32 1.0, %v3823_v62  ;;  %v3825_v1 = vpop.eup %3824 }
 0x8ae   :  { %3828 = vrcp.f32 %v1911_v17  ;;  %v3827_v2 = vpop.eup %3826  ;;  %v1924_v10 = vadd.f32 1.0, %v3825_v1 }
 0x8af   :  { %3830 = vrcp.f32 %v1917_v43 }
 0x8b0   :  { %3832 = vrcp.f32 %v1924_v10 }
 0x8b8   :  { %v3829_v3 = vpop.eup %3828 }
 0x8b9   :  { %v3831_v58 = vpop.eup %3830  ;;  %v1928_v9 = vmul.f32 %v3829_v3, %v3827_v2 }
 0x8ba   :  { %v1927_v11 = vmul.f32 %v3831_v58, %v1811_v7  ;;  %v3833_v15 = vpop.eup %3832 }
 0x8bc   :  { %v1929_v12 = vadd.f32 %v1928_v9, %v1927_v11 }
 0x8be   :  { %3834 = vtanh.f32 %v1929_v12 }
 0x8c8   :  { %v3835_v16 = vpop.eup %3834 }
 0x8c9   :  { %v5096_v18 = vmul.f32 %v3835_v16, %v3833_v15 }
 0x8ca   :  { %4124 = dma.done.wait [#allocation9], 4096 }
 0x8cb   :  { %4125 = vsyncadd [#allocation9], 4294963200 }
 0x8cc   :  { %4126 = dma.done.wait [#allocation9 + $0x1], 4096 }
 0x8cd   :  { %4127 = vsyncadd [#allocation9 + $0x1], 4294963200  ;;  %2070 = vmatprep.mubr.bf16.mxu0 %v5689_v25  ;;  %2143 = vmatprep.mubr.bf16.mxu1 %v5689_v25  ;;  %v1941_v19 = vld [vmem:[#allocation4 + $0x8] sm:$0xff]  ;;  %v1943_v42 = vld [vmem:[#allocation4 + $0x18] sm:$0xff]  ;;  %v2012_v4 = vpack.c.bf16 %v4829_v29, %v4783_v26  ;;  %v2013_v28 = vpack.c.bf16 %v4921_v6, %v4875_v0  ;;  %v2014_v58 = vpack.c.bf16 %v5057_v32, %v4971_v57 }
 0x8ce   :  { %v1940_v45 = vld [vmem:[#allocation4] sm:$0xff]  ;;  %2038 = vmatprep.subr.bf16.mxu0 %v1941_v19  ;;  %2111 = vmatprep.subr.bf16.mxu1 %v1943_v42  ;;  %v1942_v46 = vld [vmem:[#allocation4 + $0x10] sm:$0xff]  ;;  %v1945_v47 = vld [vmem:[#allocation4 + $0x28] sm:$0xff]  ;;  %v2015_v19 = vpack.c.bf16 %v5096_v18, %v5088_v40 }
 0x8cf   :  { %v1947_v20 = vld [vmem:[#allocation4 + $0x38] sm:$0xff]  ;;  %2039 = vmatpush1.bf16.msra.mxu0 %v1940_v45  ;;  %2112 = vmatpush1.bf16.msra.mxu1 %v1942_v46  ;;  %v1944_v49 = vld [vmem:[#allocation4 + $0x20] sm:$0xff]  ;;  %v1946_v21 = vld [vmem:[#allocation4 + $0x30] sm:$0xff] }
 0x8d0   :  { %2040 = vmatprep.subr.bf16.mxu0 %v1945_v47  ;;  %2113 = vmatprep.subr.bf16.mxu1 %v1947_v20  ;;  %v1949_v50 = vld [vmem:[#allocation4 + $0x48] sm:$0xff]  ;;  %v1951_v22 = vld [vmem:[#allocation4 + $0x58] sm:$0xff]  ;;  %v1948_v51 = vld [vmem:[#allocation4 + $0x40] sm:$0xff] }
 0x8d1   :  { %v1950_v33 = vld [vmem:[#allocation4 + $0x50] sm:$0xff]  ;;  %v1953_v52 = vld [vmem:[#allocation4 + $0x68] sm:$0xff]  ;;  %v1955_v35 = vld [vmem:[#allocation4 + $0x78] sm:$0xff] }
 0x8d2   :  { %v1952_v53 = vld [vmem:[#allocation4 + $0x60] sm:$0xff]  ;;  %v1954_v36 = vld [vmem:[#allocation4 + $0x70] sm:$0xff]  ;;  %v1957_v55 = vld [vmem:[#allocation4 + $0x88] sm:$0xff] }
 0x8d3   :  { %2041 = vmatpush1.bf16.msra.mxu0 %v1944_v49  ;;  %2114 = vmatpush1.bf16.msra.mxu1 %v1946_v21  ;;  %v1959_v38 = vld [vmem:[#allocation4 + $0x98] sm:$0xff]  ;;  %v1956_v7 = vld [vmem:[#allocation4 + $0x80] sm:$0xff]  ;;  %v1958_v8 = vld [vmem:[#allocation4 + $0x90] sm:$0xff] }
 0x8d4   :  { %2042 = vmatprep.subr.bf16.mxu0 %v1949_v50  ;;  %2115 = vmatprep.subr.bf16.mxu1 %v1951_v22  ;;  %v1961_v39 = vld [vmem:[#allocation4 + $0xa8] sm:$0xff]  ;;  %v1963_v41 = vld [vmem:[#allocation4 + $0xb8] sm:$0xff]  ;;  %v1960_v31 = vld [vmem:[#allocation4 + $0xa0] sm:$0xff] }
 0x8d5   :  { %v1962_v60 = vld [vmem:[#allocation4 + $0xb0] sm:$0xff]  ;;  %v1965_v30 = vld [vmem:[#allocation4 + $0xc8] sm:$0xff]  ;;  %v1967_v13 = vld [vmem:[#allocation4 + $0xd8] sm:$0xff] }
 0x8d6   :  { %v1964_v14 = vld [vmem:[#allocation4 + $0xc0] sm:$0xff]  ;;  %v1966_v24 = vld [vmem:[#allocation4 + $0xd0] sm:$0xff]  ;;  %v1969_v48 = vld [vmem:[#allocation4 + $0xe8] sm:$0xff] }
 0x8d7   :  { %2043 = vmatpush1.bf16.msra.mxu0 %v1948_v51  ;;  %2116 = vmatpush1.bf16.msra.mxu1 %v1950_v33  ;;  %v1971_v44 = vld [vmem:[#allocation4 + $0xf8] sm:$0xff]  ;;  %v1968_v34 = vld [vmem:[#allocation4 + $0xe0] sm:$0xff]  ;;  %v1970_v56 = vld [vmem:[#allocation4 + $0xf0] sm:$0xff] }
 0x8d8   :  { %2044 = vmatprep.subr.bf16.mxu0 %v1953_v52  ;;  %2117 = vmatprep.subr.bf16.mxu1 %v1955_v35  ;;  %v5100_v61 = vld [vmem:[#allocation5 + $0x8] sm:$0xff]  ;;  %v5102_v5 = vld [vmem:[#allocation5 + $0x18] sm:$0xff]  ;;  %v5108_v23 = vld [vmem:[#allocation5] sm:$0xff] }
 0x8d9   :  { %v5110_v59 = vld [vmem:[#allocation5 + $0x10] sm:$0xff]  ;;  %v5112_v27 = vld [vmem:[#allocation5 + $0x28] sm:$0xff]  ;;  %v5114_v37 = vld [vmem:[#allocation5 + $0x38] sm:$0xff] }
 0x8da   :  { %v5120_v26 = vld [vmem:[#allocation5 + $0x20] sm:$0xff]  ;;  %v5122_v29 = vld [vmem:[#allocation5 + $0x30] sm:$0xff]  ;;  %v5126_v63 = vld [vmem:[#allocation5 + $0x48] sm:$0xff] }
 0x8db   :  { %2045 = vmatpush1.bf16.msra.mxu0 %v1952_v53  ;;  %2118 = vmatpush1.bf16.msra.mxu1 %v1954_v36  ;;  %v5128_v54 = vld [vmem:[#allocation5 + $0x58] sm:$0xff]  ;;  %v5136_v62 = vld [vmem:[#allocation5 + $0x40] sm:$0xff]  ;;  %v5138_v17 = vld [vmem:[#allocation5 + $0x50] sm:$0xff] }
 0x8dc   :  { %2046 = vmatprep.subr.bf16.mxu0 %v1957_v55  ;;  %2119 = vmatprep.subr.bf16.mxu1 %v1959_v38  ;;  %v5140_v43 = vld [vmem:[#allocation5 + $0x68] sm:$0xff]  ;;  %v5142_v1 = vld [vmem:[#allocation5 + $0x78] sm:$0xff]  ;;  %v5148_v0 = vld [vmem:[#allocation5 + $0x60] sm:$0xff] }
 0x8dd   :  { %v5150_v6 = vld [vmem:[#allocation5 + $0x70] sm:$0xff]  ;;  %v5154_v2 = vld [vmem:[#allocation5 + $0x88] sm:$0xff]  ;;  %v5156_v3 = vld [vmem:[#allocation5 + $0x98] sm:$0xff] }
 0x8de   :  { %v5164_v9 = vld [vmem:[#allocation5 + $0x80] sm:$0xff]  ;;  %v5166_v10 = vld [vmem:[#allocation5 + $0x90] sm:$0xff]  ;;  %v5168_v11 = vld [vmem:[#allocation5 + $0xa8] sm:$0xff] }
 0x8df   :  { %2047 = vmatpush1.bf16.msra.mxu0 %v1956_v7  ;;  %2120 = vmatpush1.bf16.msra.mxu1 %v1958_v8  ;;  %v5170_v12 = vld [vmem:[#allocation5 + $0xb8] sm:$0xff]  ;;  %v5176_v57 = vld [vmem:[#allocation5 + $0xa0] sm:$0xff]  ;;  %v5178_v32 = vld [vmem:[#allocation5 + $0xb0] sm:$0xff] }
 0x8e0   :  { %2048 = vmatprep.subr.bf16.mxu0 %v1961_v39  ;;  %2121 = vmatprep.subr.bf16.mxu1 %v1963_v41  ;;  %v5182_v15 = vld [vmem:[#allocation5 + $0xc8] sm:$0xff]  ;;  %v5184_v16 = vld [vmem:[#allocation5 + $0xd8] sm:$0xff]  ;;  %v5192_v42 = vld [vmem:[#allocation5 + $0xc0] sm:$0xff] }
 0x8e1   :  { %v5194_v45 = vld [vmem:[#allocation5 + $0xd0] sm:$0xff]  ;;  %v5196_v46 = vld [vmem:[#allocation5 + $0xe8] sm:$0xff]  ;;  %v5198_v47 = vld [vmem:[#allocation5 + $0xf8] sm:$0xff] }
 0x8e2   :  { %v3508_v40 = vld [vmem:[%s5631_s1 + $0x8] sm:$0xff]  ;;  %v5207_v18 = vld [vmem:[#allocation5 + $0xe0] sm:$0xff]  ;;  %v5209_v20 = vld [vmem:[#allocation5 + $0xf0] sm:$0xff] }
 0x8e3   :  { %2049 = vmatpush1.bf16.msra.mxu0 %v1960_v31  ;;  %2122 = vmatpush1.bf16.msra.mxu1 %v1962_v60  ;;  %v2224_v49 = vpack.c.bf16 %v3508_v40, %v3508_v40  ;;  %v2016_v21 = vld [vmem:[#allocation12] sm:$0xf]  ;;  %v5712_v50 = vld [vmem:[#allocation40_spill] sm:$0xff]  ;;  %v5715_v36 = vld [vmem:[#allocation41_spill] sm:$0xff] }
 0x8e4   :  { %2050 = vmatprep.subr.bf16.mxu0 %v1965_v30  ;;  %2123 = vmatprep.subr.bf16.mxu1 %v1967_v13  ;;  %v5713_v22 = vsub.s32 2, %v5712_v50  ;;  %v5714_v35 = vsub.s32 3, %v5712_v50  ;;  %v2021_v55 = vrot.slane %v2016_v21, %v5715_v36  ;;  %v5716_v8 = vld [vmem:[#allocation42_spill] sm:$0xff] }
 0x8e5   :  { %v2025_v39 = vrot.slane %v2016_v21, %v5716_v8 }
 0x8e6   :  { %v5253_v51 = vrot.slane %v2016_v21, %v5713_v22  ;;  %v5261_v53 = vrot.slane %v2016_v21, %v5714_v35 }
 0x8e7   :  { %2051 = vmatpush1.bf16.msra.mxu0 %v1964_v14  ;;  %2124 = vmatpush1.bf16.msra.mxu1 %v1966_v24 }
 0x8e8   :  { %2052 = vmatprep.subr.bf16.mxu0 %v1969_v48  ;;  %2125 = vmatprep.subr.bf16.mxu1 %v1971_v44 }
 0x8eb   :  { %2053 = vmatpush1.bf16.msra.mxu0 %v1968_v34  ;;  %2126 = vmatpush1.bf16.msra.mxu1 %v1970_v56 }
 0x8ec   :  { %2225 = vmatprep.subr.bf16.mxu0 %v5100_v61  ;;  %2266 = vmatprep.subr.bf16.mxu1 %v5102_v5 }
 0x8ee   :  { %2071 = vmatmul.mubr.bf16.vlgmr.msra.gmra.mrb[48].mxu0 %v2012_v4  ;;  %2144 = vmatmul.mubr.bf16.vlgmr.msra.gmra.mrb[48].mxu1 %v2012_v4 }
 0x8ef   :  { %2226 = vmatpush1.bf16.msra.mxu0 %v5108_v23  ;;  %2267 = vmatpush1.bf16.msra.mxu1 %v5110_v59 }
 0x8f0   :  { %2227 = vmatprep.subr.bf16.mxu0 %v5112_v27  ;;  %2268 = vmatprep.subr.bf16.mxu1 %v5114_v37 }
 0x8f1   :  { %2080 = vmatprep.mubr.bf16.mxu0 %v5689_v25  ;;  %2153 = vmatprep.mubr.bf16.mxu1 %v5689_v25 }
 0x8f3   :  { %2228 = vmatpush1.bf16.msra.mxu0 %v5120_v26  ;;  %2269 = vmatpush1.bf16.msra.mxu1 %v5122_v29 }
 0x8f4   :  { %2229 = vmatprep.subr.bf16.mxu0 %v5126_v63  ;;  %2270 = vmatprep.subr.bf16.mxu1 %v5128_v54 }
 0x8f6   :  { %2081 = vmatmul.mubr.bf16.gmra.mrb[52].mxu0 %v2013_v28  ;;  %2154 = vmatmul.mubr.bf16.gmra.mrb[52].mxu1 %v2013_v28 }
 0x8f7   :  { %2230 = vmatpush1.bf16.msra.mxu0 %v5136_v62  ;;  %2271 = vmatpush1.bf16.msra.mxu1 %v5138_v17 }
 0x8f8   :  { %2231 = vmatprep.subr.bf16.mxu0 %v5140_v43  ;;  %2272 = vmatprep.subr.bf16.mxu1 %v5142_v1 }
 0x8f9   :  { %2090 = vmatprep.mubr.bf16.mxu0 %v5689_v25  ;;  %2163 = vmatprep.mubr.bf16.mxu1 %v5689_v25 }
 0x8fb   :  { %2232 = vmatpush1.bf16.msra.mxu0 %v5148_v0  ;;  %2273 = vmatpush1.bf16.msra.mxu1 %v5150_v6 }
 0x8fc   :  { %2233 = vmatprep.subr.bf16.mxu0 %v5154_v2  ;;  %2274 = vmatprep.subr.bf16.mxu1 %v5156_v3 }
 0x8fe   :  { %2091 = vmatmul.mubr.bf16.gmra.mrb[56].mxu0 %v2014_v58  ;;  %2164 = vmatmul.mubr.bf16.gmra.mrb[56].mxu1 %v2014_v58 }
 0x8ff   :  { %2234 = vmatpush1.bf16.msra.mxu0 %v5164_v9  ;;  %2275 = vmatpush1.bf16.msra.mxu1 %v5166_v10 }
 0x900   :  { %2235 = vmatprep.subr.bf16.mxu0 %v5168_v11  ;;  %2276 = vmatprep.subr.bf16.mxu1 %v5170_v12 }
 0x901   :  { %2100 = vmatprep.mubr.bf16.mxu0 %v5689_v25  ;;  %2173 = vmatprep.mubr.bf16.mxu1 %v5689_v25 }
 0x903   :  { %2236 = vmatpush1.bf16.msra.mxu0 %v5176_v57  ;;  %2277 = vmatpush1.bf16.msra.mxu1 %v5178_v32 }
 0x904   :  { %2237 = vmatprep.subr.bf16.mxu0 %v5182_v15  ;;  %2278 = vmatprep.subr.bf16.mxu1 %v5184_v16 }
 0x906   :  { %2101 = vmatmul.mubr.bf16.gmra.mrb[60].mxu0 %v2015_v19  ;;  %2174 = vmatmul.mubr.bf16.gmra.mrb[60].mxu1 %v2015_v19 }
 0x907   :  { %2238 = vmatpush1.bf16.msra.mxu0 %v5192_v42  ;;  %2279 = vmatpush1.bf16.msra.mxu1 %v5194_v45 }
 0x908   :  { %2239 = vmatprep.subr.bf16.mxu0 %v5196_v46  ;;  %2280 = vmatprep.subr.bf16.mxu1 %v5198_v47 }
 0x909   :  { %2257 = vmatprep.mubr.bf16.mxu0 %v5689_v25  ;;  %2298 = vmatprep.mubr.bf16.mxu1 %v5689_v25 }
 0x90b   :  { %2240 = vmatpush1.bf16.msra.mxu0 %v5207_v18  ;;  %2281 = vmatpush1.bf16.msra.mxu1 %v5209_v20 }
 0x90c   :  { %2340 = vmatprep.subr.bf16.mxu0 %v5100_v61  ;;  %2381 = vmatprep.subr.bf16.mxu1 %v5102_v5 }
 0x90e   :  { %2258 = vmatmul.mubr.bf16.vlgmr.msra.gmra.mrb[64].mxu0 %v2224_v49  ;;  %2299 = vmatmul.mubr.bf16.vlgmr.msra.gmra.mrb[64].mxu1 %v2224_v49 }
 0x90f   :  { %2341 = vmatpush1.bf16.msra.mxu0 %v5108_v23  ;;  %2382 = vmatpush1.bf16.msra.mxu1 %v5110_v59 }
 0x910   :  { %2342 = vmatprep.subr.bf16.mxu0 %v5112_v27  ;;  %2383 = vmatprep.subr.bf16.mxu1 %v5114_v37 }
 0x911   :  { %2372 = vmatprep.mubr.bf16.mxu0 %v5689_v25  ;;  %2413 = vmatprep.mubr.bf16.mxu1 %v5689_v25 }
 0x913   :  { %2343 = vmatpush1.bf16.msra.mxu0 %v5120_v26  ;;  %2384 = vmatpush1.bf16.msra.mxu1 %v5122_v29 }
 0x914   :  { %2344 = vmatprep.subr.bf16.mxu0 %v5126_v63  ;;  %2385 = vmatprep.subr.bf16.mxu1 %v5128_v54 }
 0x917   :  { %2345 = vmatpush1.bf16.msra.mxu0 %v5136_v62  ;;  %2386 = vmatpush1.bf16.msra.mxu1 %v5138_v17 }
 0x918   :  { %2346 = vmatprep.subr.bf16.mxu0 %v5140_v43  ;;  %2387 = vmatprep.subr.bf16.mxu1 %v5142_v1 }
 0x91b   :  { %2347 = vmatpush1.bf16.msra.mxu0 %v5148_v0  ;;  %2388 = vmatpush1.bf16.msra.mxu1 %v5150_v6 }
 0x91c   :  { %2348 = vmatprep.subr.bf16.mxu0 %v5154_v2  ;;  %2389 = vmatprep.subr.bf16.mxu1 %v5156_v3 }
 0x91f   :  { %2349 = vmatpush1.bf16.msra.mxu0 %v5164_v9  ;;  %2390 = vmatpush1.bf16.msra.mxu1 %v5166_v10 }
 0x920   :  { %2350 = vmatprep.subr.bf16.mxu0 %v5168_v11  ;;  %2391 = vmatprep.subr.bf16.mxu1 %v5170_v12 }
 0x923   :  { %2351 = vmatpush1.bf16.msra.mxu0 %v5176_v57  ;;  %2392 = vmatpush1.bf16.msra.mxu1 %v5178_v32 }
 0x924   :  { %2352 = vmatprep.subr.bf16.mxu0 %v5182_v15  ;;  %2393 = vmatprep.subr.bf16.mxu1 %v5184_v16 }
 0x927   :  { %2353 = vmatpush1.bf16.msra.mxu0 %v5192_v42  ;;  %2394 = vmatpush1.bf16.msra.mxu1 %v5194_v45 }
 0x928   :  { %2354 = vmatprep.subr.bf16.mxu0 %v5196_v46  ;;  %2395 = vmatprep.subr.bf16.mxu1 %v5198_v47 }
 0x92b   :  { %2355 = vmatpush1.bf16.msra.mxu0 %v5207_v18  ;;  %2396 = vmatpush1.bf16.msra.mxu1 %v5209_v20 }
 0x92c   :  { %2455 = vmatprep.subr.bf16.mxu0 %v5100_v61  ;;  %2496 = vmatprep.subr.bf16.mxu1 %v5102_v5 }
 0x9c1   :  { %v5255_v33 = vpop.f32.mrb[48].mxu0  ;;  %v5257_v52 = vpop.f32.mrb[48].mxu1 }
 0x9c2   :  { %v2074_v38 = vpop.f32.mrb[49].mxu0  ;;  %v2147_v7 = vpop.f32.mrb[49].mxu1 }
 0x9c3   :  { %v2076_v41 = vpop.f32.mrb[50].mxu0  ;;  %v2149_v31 = vpop.f32.mrb[50].mxu1 }
 0x9c4   :  { %v5265_v60 = vadd.f32 %v2076_v41, %v2021_v55  ;;  %v2078_v30 = vpop.f32.mrb[51].mxu0  ;;  %v5268_v13 = vadd.f32 %v2149_v31, %v5253_v51  ;;  %v2151_v14 = vpop.f32.mrb[51].mxu1 }
 0x9c5   :  { %v5270_v24 = vadd.f32 %v2078_v30, %v2025_v39  ;;  %v5273_v48 = vadd.f32 %v2151_v14, %v5261_v53 }
 0x9c9   :  { %v2082_v44 = vpop.f32.mrb[52].mxu0  ;;  %v2155_v34 = vpop.f32.mrb[52].mxu1 }
 0x9ca   :  { %v5275_v56 = vadd.f32 %v2082_v44, %v2021_v55  ;;  %v2084_v4 = vpop.f32.mrb[53].mxu0  ;;  %v5278_v28 = vadd.f32 %v2155_v34, %v5253_v51  ;;  %v2157_v58 = vpop.f32.mrb[53].mxu1 }
 0x9cb   :  { %v5280_v19 = vadd.f32 %v2084_v4, %v2025_v39  ;;  %v2086_v40 = vpop.f32.mrb[54].mxu0  ;;  %v5283_v49 = vadd.f32 %v2157_v58, %v5261_v53  ;;  %v2159_v21 = vpop.f32.mrb[54].mxu1 }
 0x9cc   :  { %v5285_v50 = vadd.f32 %v2086_v40, %v2021_v55  ;;  %v2088_v22 = vpop.f32.mrb[55].mxu0  ;;  %v5288_v35 = vadd.f32 %v2159_v21, %v5253_v51  ;;  %v2161_v41 = vpop.f32.mrb[55].mxu1 }
 0x9cd   :  { %5717 = vst [vmem:[#allocation43_spill] sm:$0xff] %v5280_v19  ;;  %5718 = vst [vmem:[#allocation45_spill] sm:$0xff] %v5283_v49  ;;  %v5290_v31 = vadd.f32 %v2088_v22, %v2025_v39  ;;  %v5293_v30 = vadd.f32 %v2161_v41, %v5261_v53 }
 0x9ce   :  { %5719 = vst [vmem:[#allocation44_spill] sm:$0xff] %v5285_v50  ;;  %5720 = vst [vmem:[#allocation47_spill] sm:$0xff] %v5288_v35 }
 0x9cf   :  { %5721 = vst [vmem:[#allocation46_spill] sm:$0xff] %v5290_v31  ;;  %5722 = vst [vmem:[#allocation48_spill] sm:$0xff] %v5293_v30 }
 0x9d1   :  { %v2092_v14 = vpop.f32.mrb[56].mxu0  ;;  %v2165_v44 = vpop.f32.mrb[56].mxu1 }
 0x9d2   :  { %v5295_v34 = vadd.f32 %v2092_v14, %v2021_v55  ;;  %v2094_v4 = vpop.f32.mrb[57].mxu0  ;;  %v5298_v58 = vadd.f32 %v2165_v44, %v5253_v51  ;;  %v2167_v40 = vpop.f32.mrb[57].mxu1 }
 0x9d3   :  { %v5300_v8 = vadd.f32 %v2094_v4, %v2025_v39  ;;  %v2096_v36 = vpop.f32.mrb[58].mxu0  ;;  %v5303_v21 = vadd.f32 %v2167_v40, %v5261_v53  ;;  %v2169_v22 = vpop.f32.mrb[58].mxu1 }
 0x9d4   :  { %5723 = vst [vmem:[#allocation49_spill] sm:$0xff] %v5295_v34  ;;  %5724 = vst [vmem:[#allocation51_spill] sm:$0xff] %v5298_v58  ;;  %v5305_v31 = vadd.f32 %v2096_v36, %v2021_v55  ;;  %v2098_v41 = vpop.f32.mrb[59].mxu0  ;;  %v5308_v30 = vadd.f32 %v2169_v22, %v5253_v51  ;;  %v2171_v14 = vpop.f32.mrb[59].mxu1 }
 0x9d5   :  { %5725 = vst [vmem:[#allocation50_spill] sm:$0xff] %v5300_v8  ;;  %5726 = vst [vmem:[#allocation53_spill] sm:$0xff] %v5303_v21  ;;  %v5310_v34 = vadd.f32 %v2098_v41, %v2025_v39  ;;  %v5313_v44 = vadd.f32 %v2171_v14, %v5261_v53 }
 0x9d6   :  { %5727 = vst [vmem:[#allocation52_spill] sm:$0xff] %v5305_v31  ;;  %5728 = vst [vmem:[#allocation55_spill] sm:$0xff] %v5308_v30 }
 0x9d7   :  { %5729 = vst [vmem:[#allocation54_spill] sm:$0xff] %v5310_v34  ;;  %5730 = vst [vmem:[#allocation56_spill] sm:$0xff] %v5313_v44 }
 0x9d9   :  { %v2102_v58 = vpop.f32.mrb[60].mxu0  ;;  %v2175_v4 = vpop.f32.mrb[60].mxu1 }
 0x9da   :  { %v5315_v8 = vadd.f32 %v2102_v58, %v2021_v55  ;;  %v2104_v35 = vpop.f32.mrb[61].mxu0  ;;  %v5318_v40 = vadd.f32 %v2175_v4, %v5253_v51  ;;  %v2177_v36 = vpop.f32.mrb[61].mxu1 }
 0x9db   :  { %v5320_v31 = vadd.f32 %v2104_v35, %v2025_v39  ;;  %v2106_v21 = vpop.f32.mrb[62].mxu0  ;;  %v5323_v22 = vadd.f32 %v2177_v36, %v5261_v53  ;;  %v2179_v41 = vpop.f32.mrb[62].mxu1  ;;  %v2073_v35 = vadd.f32 %v5255_v33, %v2021_v55  ;;  %v2075_v36 = vadd.f32 %v2074_v38, %v2025_v39 }
 0x9dc   :  { %5731 = vst [vmem:[#allocation57_spill] sm:$0xff] %v5315_v8  ;;  %5732 = vst [vmem:[#allocation59_spill] sm:$0xff] %v5318_v40  ;;  %v5325_v34 = vadd.f32 %v2106_v21, %v2021_v55  ;;  %v2108_v14 = vpop.f32.mrb[63].mxu0  ;;  %v5328_v44 = vadd.f32 %v2179_v41, %v5253_v51  ;;  %v2181_v58 = vpop.f32.mrb[63].mxu1 }
 0x9dd   :  { %5733 = vst [vmem:[#allocation58_spill] sm:$0xff] %v5320_v31  ;;  %5734 = vst [vmem:[#allocation61_spill] sm:$0xff] %v5323_v22  ;;  %v5330_v8 = vadd.f32 %v2108_v14, %v2025_v39  ;;  %v5333_v4 = vadd.f32 %v2181_v58, %v5261_v53  ;;  %v2146_v31 = vadd.f32 %v5257_v52, %v5253_v51 }
 0x9de   :  { %5735 = vst [vmem:[#allocation60_spill] sm:$0xff] %v5325_v34  ;;  %5736 = vst [vmem:[#allocation63_spill] sm:$0xff] %v5328_v44  ;;  %v2148_v22 = vadd.f32 %v2147_v7, %v5261_v53 }
 0x9df   :  { %5737 = vst [vmem:[#allocation62_spill] sm:$0xff] %v5330_v8  ;;  %5738 = vst [vmem:[#allocation64_spill] sm:$0xff] %v5333_v4 }
 0x9e1   :  { %v2259_v21 = vpop.f32.mrb[64].mxu0  ;;  %v2300_v34 = vpop.f32.mrb[64].mxu1 }
 0x9e2   :  { %v2307_v40 = vadd.f32 %v2259_v21, %v2073_v35  ;;  %v2309_v30 = vadd.f32 %v2300_v34, %v2146_v31  ;;  %v2261_v41 = vpop.f32.mrb[65].mxu0  ;;  %v2302_v44 = vpop.f32.mrb[65].mxu1 }
 0x9e3   :  { %v2308_v50 = vadd.f32 %v2261_v41, %v2075_v36  ;;  %v2310_v14 = vadd.f32 %v2302_v44, %v2148_v22  ;;  %v2263_v8 = vpop.f32.mrb[66].mxu0  ;;  %v2304_v49 = vpop.f32.mrb[66].mxu1 }
 0x9e4   :  { %v3510_v58 = vmul.f32 -1.442695, %v2307_v40  ;;  %v2264_v4 = vpop.f32.mrb[67].mxu0  ;;  %v2305_v19 = vpop.f32.mrb[67].mxu1  ;;  %v3509_v8 = vld [vmem:[%s5632_s2 + $0x8] sm:$0xff] }
 0x9e5   :  { %v3511_v33 = vmul.f32 -1.442695, %v2308_v50  ;;  %v3512_v51 = vmul.f32 -1.442695, %v2310_v14 }
 0x9e6   :  { %3868 = vpow2.f32 %v3510_v58 }
 0x9e7   :  { %3870 = vpow2.f32 %v3511_v33 }
 0x9e8   :  { %3872 = vpow2.f32 %v3512_v51 }
 0x9e9   :  { %3874 = vtanh.f32 %v2309_v30 }
 0x9f0   :  { %v3869_v52 = vpop.eup %3868 }
 0x9f1   :  { %v3871_v55 = vpop.eup %3870  ;;  %v2314_v53 = vadd.f32 1.0, %v3869_v52 }
 0x9f2   :  { %v2320_v38 = vadd.f32 1.0, %v3871_v55  ;;  %v3873_v7 = vpop.eup %3872 }
 0x9f3   :  { %3876 = vrcp.f32 %v2314_v53  ;;  %v3875_v39 = vpop.eup %3874  ;;  %v2327_v31 = vadd.f32 1.0, %v3873_v7 }
 0x9f4   :  { %3878 = vrcp.f32 %v2320_v38 }
 0x9f5   :  { %3880 = vrcp.f32 %v2327_v31 }
 0x9fd   :  { %v3877_v49 = vpop.eup %3876 }
 0x9fe   :  { %v3879_v19 = vpop.eup %3878  ;;  %v2331_v50 = vmul.f32 %v3877_v49, %v3875_v39 }
 0x9ff   :  { %v2330_v34 = vmul.f32 %v3879_v19, %v3509_v8  ;;  %v3881_v30 = vpop.eup %3880 }
 0xa01   :  { %v5342_v44 = vadd.f32 %v2331_v50, %v2330_v34 }
 0xa03   :  { %3882 = vtanh.f32 %v5342_v44 }
 0xa0d   :  { %v3883_v40 = vpop.eup %3882 }
 0xa0e   :  { %v2334_v22 = vmul.f32 %v3883_v40, %v3881_v30 }
 0xa10   :  { %v2339_v4 = vpack.c.bf16 %v2334_v22, %v2334_v22 }
 0xa12   :  { %2373 = vmatmul.mubr.bf16.vlgmr.msra.gmra.mrb[68].mxu0 %v2339_v4  ;;  %2414 = vmatmul.mubr.bf16.vlgmr.msra.gmra.mrb[68].mxu1 %v2339_v4 }
 0xa13   :  { %2456 = vmatpush1.bf16.msra.mxu0 %v5108_v23  ;;  %2497 = vmatpush1.bf16.msra.mxu1 %v5110_v59 }
 0xa14   :  { %2457 = vmatprep.subr.bf16.mxu0 %v5112_v27  ;;  %2498 = vmatprep.subr.bf16.mxu1 %v5114_v37 }
 0xa15   :  { %2487 = vmatprep.mubr.bf16.mxu0 %v5689_v25  ;;  %2528 = vmatprep.mubr.bf16.mxu1 %v5689_v25 }
 0xa17   :  { %2458 = vmatpush1.bf16.msra.mxu0 %v5120_v26  ;;  %2499 = vmatpush1.bf16.msra.mxu1 %v5122_v29 }
 0xa18   :  { %2459 = vmatprep.subr.bf16.mxu0 %v5126_v63  ;;  %2500 = vmatprep.subr.bf16.mxu1 %v5128_v54 }
 0xa1b   :  { %2460 = vmatpush1.bf16.msra.mxu0 %v5136_v62  ;;  %2501 = vmatpush1.bf16.msra.mxu1 %v5138_v17 }
 0xa1c   :  { %2461 = vmatprep.subr.bf16.mxu0 %v5140_v43  ;;  %2502 = vmatprep.subr.bf16.mxu1 %v5142_v1 }
 0xa1f   :  { %2462 = vmatpush1.bf16.msra.mxu0 %v5148_v0  ;;  %2503 = vmatpush1.bf16.msra.mxu1 %v5150_v6 }
 0xa20   :  { %2463 = vmatprep.subr.bf16.mxu0 %v5154_v2  ;;  %2504 = vmatprep.subr.bf16.mxu1 %v5156_v3 }
 0xa23   :  { %2464 = vmatpush1.bf16.msra.mxu0 %v5164_v9  ;;  %2505 = vmatpush1.bf16.msra.mxu1 %v5166_v10 }
 0xa24   :  { %2465 = vmatprep.subr.bf16.mxu0 %v5168_v11  ;;  %2506 = vmatprep.subr.bf16.mxu1 %v5170_v12 }
 0xa27   :  { %2466 = vmatpush1.bf16.msra.mxu0 %v5176_v57  ;;  %2507 = vmatpush1.bf16.msra.mxu1 %v5178_v32 }
 0xa28   :  { %2467 = vmatprep.subr.bf16.mxu0 %v5182_v15  ;;  %2508 = vmatprep.subr.bf16.mxu1 %v5184_v16 }
 0xa2b   :  { %2468 = vmatpush1.bf16.msra.mxu0 %v5192_v42  ;;  %2509 = vmatpush1.bf16.msra.mxu1 %v5194_v45 }
 0xa2c   :  { %2469 = vmatprep.subr.bf16.mxu0 %v5196_v46  ;;  %2510 = vmatprep.subr.bf16.mxu1 %v5198_v47 }
 0xa2f   :  { %2470 = vmatpush1.bf16.msra.mxu0 %v5207_v18  ;;  %2511 = vmatpush1.bf16.msra.mxu1 %v5209_v20 }
 0xa30   :  { %2570 = vmatprep.subr.bf16.mxu0 %v5100_v61  ;;  %2611 = vmatprep.subr.bf16.mxu1 %v5102_v5 }
 0xae5   :  { %v2374_v35 = vpop.f32.mrb[68].mxu0  ;;  %v2415_v36 = vpop.f32.mrb[68].mxu1 }
 0xae6   :  { %v2422_v21 = vadd.f32 %v2374_v35, %v5265_v60  ;;  %v2424_v41 = vadd.f32 %v2415_v36, %v5268_v13  ;;  %v2376_v14 = vpop.f32.mrb[69].mxu0  ;;  %v2417_v58 = vpop.f32.mrb[69].mxu1 }
 0xae7   :  { %v2423_v33 = vadd.f32 %v2376_v14, %v5270_v24  ;;  %v2425_v51 = vadd.f32 %v2417_v58, %v5273_v48  ;;  %v2378_v52 = vpop.f32.mrb[70].mxu0  ;;  %v2419_v55 = vpop.f32.mrb[70].mxu1 }
 0xae8   :  { %v3513_v53 = vmul.f32 -1.442695, %v2422_v21  ;;  %v2379_v38 = vpop.f32.mrb[71].mxu0  ;;  %v2420_v7 = vpop.f32.mrb[71].mxu1  ;;  %v5739_v52 = vld [vmem:[#allocation43_spill] sm:$0xff] }
 0xae9   :  { %v3514_v39 = vmul.f32 -1.442695, %v2423_v33  ;;  %v3515_v8 = vmul.f32 -1.442695, %v2425_v51 }
 0xaea   :  { %3884 = vpow2.f32 %v3513_v53  ;;  %v5740_v53 = vld [vmem:[#allocation45_spill] sm:$0xff] }
 0xaeb   :  { %3886 = vpow2.f32 %v3514_v39 }
 0xaec   :  { %3888 = vpow2.f32 %v3515_v8 }
 0xaed   :  { %3890 = vtanh.f32 %v2424_v41 }
 0xaf4   :  { %v3885_v49 = vpop.eup %3884 }
 0xaf5   :  { %v3887_v19 = vpop.eup %3886  ;;  %v2429_v60 = vadd.f32 1.0, %v3885_v49 }
 0xaf6   :  { %v2435_v13 = vadd.f32 1.0, %v3887_v19  ;;  %v3889_v24 = vpop.eup %3888 }
 0xaf7   :  { %3892 = vrcp.f32 %v2429_v60  ;;  %v3891_v50 = vpop.eup %3890  ;;  %v2442_v30 = vadd.f32 1.0, %v3889_v24 }
 0xaf8   :  { %3894 = vrcp.f32 %v2435_v13 }
 0xaf9   :  { %3896 = vrcp.f32 %v2442_v30 }
 0xb01   :  { %v3893_v48 = vpop.eup %3892 }
 0xb02   :  { %v3895_v31 = vpop.eup %3894  ;;  %v2446_v34 = vmul.f32 %v3893_v48, %v3891_v50 }
 0xb03   :  { %v2445_v40 = vmul.f32 %v3895_v31, %v5342_v44  ;;  %v3897_v4 = vpop.eup %3896 }
 0xb05   :  { %v5384_v22 = vadd.f32 %v2446_v34, %v2445_v40 }
 0xb07   :  { %3898 = vtanh.f32 %v5384_v22 }
 0xb11   :  { %v3899_v35 = vpop.eup %3898 }
 0xb12   :  { %v2449_v36 = vmul.f32 %v3899_v35, %v3897_v4 }
 0xb14   :  { %v2454_v21 = vpack.c.bf16 %v2449_v36, %v2449_v36 }
 0xb16   :  { %2488 = vmatmul.mubr.bf16.vlgmr.msra.gmra.mrb[72].mxu0 %v2454_v21  ;;  %2529 = vmatmul.mubr.bf16.vlgmr.msra.gmra.mrb[72].mxu1 %v2454_v21 }
 0xb17   :  { %2571 = vmatpush1.bf16.msra.mxu0 %v5108_v23  ;;  %2612 = vmatpush1.bf16.msra.mxu1 %v5110_v59 }
 0xb18   :  { %2572 = vmatprep.subr.bf16.mxu0 %v5112_v27  ;;  %2613 = vmatprep.subr.bf16.mxu1 %v5114_v37 }
 0xb19   :  { %2602 = vmatprep.mubr.bf16.mxu0 %v5689_v25  ;;  %2643 = vmatprep.mubr.bf16.mxu1 %v5689_v25 }
 0xb1b   :  { %2573 = vmatpush1.bf16.msra.mxu0 %v5120_v26  ;;  %2614 = vmatpush1.bf16.msra.mxu1 %v5122_v29 }
 0xb1c   :  { %2574 = vmatprep.subr.bf16.mxu0 %v5126_v63  ;;  %2615 = vmatprep.subr.bf16.mxu1 %v5128_v54 }
 0xb1f   :  { %2575 = vmatpush1.bf16.msra.mxu0 %v5136_v62  ;;  %2616 = vmatpush1.bf16.msra.mxu1 %v5138_v17 }
 0xb20   :  { %2576 = vmatprep.subr.bf16.mxu0 %v5140_v43  ;;  %2617 = vmatprep.subr.bf16.mxu1 %v5142_v1 }
 0xb23   :  { %2577 = vmatpush1.bf16.msra.mxu0 %v5148_v0  ;;  %2618 = vmatpush1.bf16.msra.mxu1 %v5150_v6 }
 0xb24   :  { %2578 = vmatprep.subr.bf16.mxu0 %v5154_v2  ;;  %2619 = vmatprep.subr.bf16.mxu1 %v5156_v3 }
 0xb27   :  { %2579 = vmatpush1.bf16.msra.mxu0 %v5164_v9  ;;  %2620 = vmatpush1.bf16.msra.mxu1 %v5166_v10 }
 0xb28   :  { %2580 = vmatprep.subr.bf16.mxu0 %v5168_v11  ;;  %2621 = vmatprep.subr.bf16.mxu1 %v5170_v12 }
 0xb2b   :  { %2581 = vmatpush1.bf16.msra.mxu0 %v5176_v57  ;;  %2622 = vmatpush1.bf16.msra.mxu1 %v5178_v32 }
 0xb2c   :  { %2582 = vmatprep.subr.bf16.mxu0 %v5182_v15  ;;  %2623 = vmatprep.subr.bf16.mxu1 %v5184_v16 }
 0xb2f   :  { %2583 = vmatpush1.bf16.msra.mxu0 %v5192_v42  ;;  %2624 = vmatpush1.bf16.msra.mxu1 %v5194_v45 }
 0xb30   :  { %2584 = vmatprep.subr.bf16.mxu0 %v5196_v46  ;;  %2625 = vmatprep.subr.bf16.mxu1 %v5198_v47 }
 0xb33   :  { %2585 = vmatpush1.bf16.msra.mxu0 %v5207_v18  ;;  %2626 = vmatpush1.bf16.msra.mxu1 %v5209_v20 }
 0xb34   :  { %2685 = vmatprep.subr.bf16.mxu0 %v5100_v61  ;;  %2726 = vmatprep.subr.bf16.mxu1 %v5102_v5 }
 0xbe9   :  { %v2489_v44 = vpop.f32.mrb[72].mxu0  ;;  %v2530_v41 = vpop.f32.mrb[72].mxu1 }
 0xbea   :  { %v2537_v14 = vadd.f32 %v2489_v44, %v5275_v56  ;;  %v2539_v58 = vadd.f32 %v2530_v41, %v5278_v28  ;;  %v2491_v33 = vpop.f32.mrb[73].mxu0  ;;  %v2532_v51 = vpop.f32.mrb[73].mxu1 }
 0xbeb   :  { %v2538_v55 = vadd.f32 %v2491_v33, %v5739_v52  ;;  %v2540_v38 = vadd.f32 %v2532_v51, %v5740_v53  ;;  %v2493_v7 = vpop.f32.mrb[74].mxu0  ;;  %v2534_v39 = vpop.f32.mrb[74].mxu1  ;;  %v5741_v33 = vld [vmem:[#allocation44_spill] sm:$0xff]  ;;  %v5742_v52 = vld [vmem:[#allocation47_spill] sm:$0xff] }
 0xbec   :  { %v3516_v8 = vmul.f32 -1.442695, %v2537_v14  ;;  %v2494_v49 = vpop.f32.mrb[75].mxu0  ;;  %v2535_v19 = vpop.f32.mrb[75].mxu1  ;;  %v5743_v7 = vld [vmem:[#allocation46_spill] sm:$0xff] }
 0xbed   :  { %v3517_v60 = vmul.f32 -1.442695, %v2538_v55  ;;  %v3518_v13 = vmul.f32 -1.442695, %v2540_v38 }
 0xbee   :  { %3900 = vpow2.f32 %v3516_v8  ;;  %v5744_v8 = vld [vmem:[#allocation48_spill] sm:$0xff] }
 0xbef   :  { %3902 = vpow2.f32 %v3517_v60 }
 0xbf0   :  { %3904 = vpow2.f32 %v3518_v13 }
 0xbf1   :  { %3906 = vtanh.f32 %v2539_v58 }
 0xbf8   :  { %v3901_v24 = vpop.eup %3900 }
 0xbf9   :  { %v3903_v50 = vpop.eup %3902  ;;  %v2544_v56 = vadd.f32 1.0, %v3901_v24 }
 0xbfa   :  { %v2550_v28 = vadd.f32 1.0, %v3903_v50  ;;  %v3905_v48 = vpop.eup %3904 }
 0xbfb   :  { %3908 = vrcp.f32 %v2544_v56  ;;  %v3907_v31 = vpop.eup %3906  ;;  %v2557_v4 = vadd.f32 1.0, %v3905_v48 }
 0xbfc   :  { %3910 = vrcp.f32 %v2550_v28 }
 0xbfd   :  { %3912 = vrcp.f32 %v2557_v4 }
 0xc05   :  { %v3909_v34 = vpop.eup %3908 }
 0xc06   :  { %v3911_v30 = vpop.eup %3910  ;;  %v2561_v40 = vmul.f32 %v3909_v34, %v3907_v31 }
 0xc07   :  { %v2560_v35 = vmul.f32 %v3911_v30, %v5384_v22  ;;  %v3913_v21 = vpop.eup %3912 }
 0xc09   :  { %v5426_v36 = vadd.f32 %v2561_v40, %v2560_v35 }
 0xc0b   :  { %3914 = vtanh.f32 %v5426_v36 }
 0xc15   :  { %v3915_v44 = vpop.eup %3914 }
 0xc16   :  { %v2564_v41 = vmul.f32 %v3915_v44, %v3913_v21 }
 0xc18   :  { %v2569_v14 = vpack.c.bf16 %v2564_v41, %v2564_v41 }
 0xc1a   :  { %2603 = vmatmul.mubr.bf16.vlgmr.msra.gmra.mrb[76].mxu0 %v2569_v14  ;;  %2644 = vmatmul.mubr.bf16.vlgmr.msra.gmra.mrb[76].mxu1 %v2569_v14 }
 0xc1b   :  { %2686 = vmatpush1.bf16.msra.mxu0 %v5108_v23  ;;  %2727 = vmatpush1.bf16.msra.mxu1 %v5110_v59 }
 0xc1c   :  { %2687 = vmatprep.subr.bf16.mxu0 %v5112_v27  ;;  %2728 = vmatprep.subr.bf16.mxu1 %v5114_v37 }
 0xc1d   :  { %2717 = vmatprep.mubr.bf16.mxu0 %v5689_v25  ;;  %2758 = vmatprep.mubr.bf16.mxu1 %v5689_v25 }
 0xc1f   :  { %2688 = vmatpush1.bf16.msra.mxu0 %v5120_v26  ;;  %2729 = vmatpush1.bf16.msra.mxu1 %v5122_v29 }
 0xc20   :  { %2689 = vmatprep.subr.bf16.mxu0 %v5126_v63  ;;  %2730 = vmatprep.subr.bf16.mxu1 %v5128_v54 }
 0xc23   :  { %2690 = vmatpush1.bf16.msra.mxu0 %v5136_v62  ;;  %2731 = vmatpush1.bf16.msra.mxu1 %v5138_v17 }
 0xc24   :  { %2691 = vmatprep.subr.bf16.mxu0 %v5140_v43  ;;  %2732 = vmatprep.subr.bf16.mxu1 %v5142_v1 }
 0xc27   :  { %2692 = vmatpush1.bf16.msra.mxu0 %v5148_v0  ;;  %2733 = vmatpush1.bf16.msra.mxu1 %v5150_v6 }
 0xc28   :  { %2693 = vmatprep.subr.bf16.mxu0 %v5154_v2  ;;  %2734 = vmatprep.subr.bf16.mxu1 %v5156_v3 }
 0xc2b   :  { %2694 = vmatpush1.bf16.msra.mxu0 %v5164_v9  ;;  %2735 = vmatpush1.bf16.msra.mxu1 %v5166_v10 }
 0xc2c   :  { %2695 = vmatprep.subr.bf16.mxu0 %v5168_v11  ;;  %2736 = vmatprep.subr.bf16.mxu1 %v5170_v12 }
 0xc2f   :  { %2696 = vmatpush1.bf16.msra.mxu0 %v5176_v57  ;;  %2737 = vmatpush1.bf16.msra.mxu1 %v5178_v32 }
 0xc30   :  { %2697 = vmatprep.subr.bf16.mxu0 %v5182_v15  ;;  %2738 = vmatprep.subr.bf16.mxu1 %v5184_v16 }
 0xc33   :  { %2698 = vmatpush1.bf16.msra.mxu0 %v5192_v42  ;;  %2739 = vmatpush1.bf16.msra.mxu1 %v5194_v45 }
 0xc34   :  { %2699 = vmatprep.subr.bf16.mxu0 %v5196_v46  ;;  %2740 = vmatprep.subr.bf16.mxu1 %v5198_v47 }
 0xc37   :  { %2700 = vmatpush1.bf16.msra.mxu0 %v5207_v18  ;;  %2741 = vmatpush1.bf16.msra.mxu1 %v5209_v20 }
 0xc38   :  { %2800 = vmatprep.subr.bf16.mxu0 %v5100_v61  ;;  %2841 = vmatprep.subr.bf16.mxu1 %v5102_v5 }
 0xced   :  { %v2604_v22 = vpop.f32.mrb[76].mxu0  ;;  %v2645_v58 = vpop.f32.mrb[76].mxu1 }
 0xcee   :  { %v2652_v51 = vadd.f32 %v2604_v22, %v5741_v33  ;;  %v2654_v55 = vadd.f32 %v2645_v58, %v5742_v52  ;;  %v2606_v53 = vpop.f32.mrb[77].mxu0  ;;  %v2647_v38 = vpop.f32.mrb[77].mxu1 }
 0xcef   :  { %v2653_v39 = vadd.f32 %v2606_v53, %v5743_v7  ;;  %v2655_v49 = vadd.f32 %v2647_v38, %v5744_v8  ;;  %v2608_v19 = vpop.f32.mrb[78].mxu0  ;;  %v2649_v60 = vpop.f32.mrb[78].mxu1 }
 0xcf0   :  { %v3519_v13 = vmul.f32 -1.442695, %v2652_v51  ;;  %v2609_v24 = vpop.f32.mrb[79].mxu0  ;;  %v2650_v50 = vpop.f32.mrb[79].mxu1 }
 0xcf1   :  { %v3520_v56 = vmul.f32 -1.442695, %v2653_v39  ;;  %v3521_v28 = vmul.f32 -1.442695, %v2655_v49 }
 0xcf2   :  { %3916 = vpow2.f32 %v3519_v13 }
 0xcf3   :  { %3918 = vpow2.f32 %v3520_v56 }
 0xcf4   :  { %3920 = vpow2.f32 %v3521_v28 }
 0xcf5   :  { %3922 = vtanh.f32 %v2654_v55 }
 0xcfc   :  { %v3917_v48 = vpop.eup %3916 }
 0xcfd   :  { %v3919_v31 = vpop.eup %3918  ;;  %v2659_v34 = vadd.f32 1.0, %v3917_v48 }
 0xcfe   :  { %v2665_v30 = vadd.f32 1.0, %v3919_v31  ;;  %v3921_v40 = vpop.eup %3920 }
 0xcff   :  { %3924 = vrcp.f32 %v2659_v34  ;;  %v3923_v4 = vpop.eup %3922  ;;  %v2672_v41 = vadd.f32 1.0, %v3921_v40  ;;  %v5513_v40 = vld [vmem:[#allocation5] sm:$0xff] }
 0xd00   :  { %3926 = vrcp.f32 %v2665_v30 }
 0xd01   :  { %3928 = vrcp.f32 %v2672_v41  ;;  %v5530_v41 = vld [vmem:[#allocation5 + $0x30] sm:$0xff] }
 0xd09   :  { %v3925_v35 = vpop.eup %3924 }
 0xd0a   :  { %v3927_v21 = vpop.eup %3926  ;;  %v2676_v44 = vmul.f32 %v3925_v35, %v3923_v4  ;;  %v5516_v4 = vld [vmem:[#allocation5 + $0x10] sm:$0xff]  ;;  %v5519_v35 = vld [vmem:[#allocation5 + $0x28] sm:$0xff] }
 0xd0b   :  { %v2675_v14 = vmul.f32 %v3927_v21, %v5426_v36  ;;  %v3929_v58 = vpop.eup %3928  ;;  %v5522_v21 = vld [vmem:[#allocation5 + $0x38] sm:$0xff] }
 0xd0d   :  { %v5468_v22 = vadd.f32 %v2676_v44, %v2675_v14  ;;  %v5527_v44 = vld [vmem:[#allocation5 + $0x20] sm:$0xff]  ;;  %v5533_v14 = vld [vmem:[#allocation5 + $0x48] sm:$0xff] }
 0xd0f   :  { %3930 = vtanh.f32 %v5468_v22 }
 0xd19   :  { %v3931_v33 = vpop.eup %3930 }
 0xd1a   :  { %v2679_v51 = vmul.f32 %v3931_v33, %v3929_v58  ;;  %v5539_v58 = vld [vmem:[#allocation5 + $0x40] sm:$0xff]  ;;  %v5542_v33 = vld [vmem:[#allocation5 + $0x50] sm:$0xff] }
 0xd1c   :  { %v2684_v52 = vpack.c.bf16 %v2679_v51, %v2679_v51  ;;  %v5545_v51 = vld [vmem:[#allocation5 + $0x68] sm:$0xff] }
 0xd1e   :  { %2718 = vmatmul.mubr.bf16.vlgmr.msra.gmra.mrb[80].mxu0 %v2684_v52  ;;  %2759 = vmatmul.mubr.bf16.vlgmr.msra.gmra.mrb[80].mxu1 %v2684_v52  ;;  %v5548_v52 = vld [vmem:[#allocation5 + $0x78] sm:$0xff] }
 0xd1f   :  { %2801 = vmatpush1.bf16.msra.mxu0 %v5108_v23  ;;  %2842 = vmatpush1.bf16.msra.mxu1 %v5110_v59 }
 0xd20   :  { %2802 = vmatprep.subr.bf16.mxu0 %v5112_v27  ;;  %2843 = vmatprep.subr.bf16.mxu1 %v5114_v37  ;;  %v5745_v27 = vld [vmem:[#allocation49_spill] sm:$0xff] }
 0xd21   :  { %2832 = vmatprep.mubr.bf16.mxu0 %v5689_v25  ;;  %2873 = vmatprep.mubr.bf16.mxu1 %v5689_v25 }
 0xd23   :  { %2803 = vmatpush1.bf16.msra.mxu0 %v5120_v26  ;;  %2844 = vmatpush1.bf16.msra.mxu1 %v5122_v29  ;;  %v5746_v26 = vld [vmem:[#allocation51_spill] sm:$0xff] }
 0xd24   :  { %2804 = vmatprep.subr.bf16.mxu0 %v5126_v63  ;;  %2845 = vmatprep.subr.bf16.mxu1 %v5128_v54 }
 0xd27   :  { %2805 = vmatpush1.bf16.msra.mxu0 %v5136_v62  ;;  %2846 = vmatpush1.bf16.msra.mxu1 %v5138_v17  ;;  %v5747_v62 = vld [vmem:[#allocation50_spill] sm:$0xff] }
 0xd28   :  { %2806 = vmatprep.subr.bf16.mxu0 %v5140_v43  ;;  %2847 = vmatprep.subr.bf16.mxu1 %v5142_v1  ;;  %v5748_v43 = vld [vmem:[#allocation53_spill] sm:$0xff] }
 0xd2b   :  { %2807 = vmatpush1.bf16.msra.mxu0 %v5148_v0  ;;  %2848 = vmatpush1.bf16.msra.mxu1 %v5150_v6 }
 0xd2c   :  { %2808 = vmatprep.subr.bf16.mxu0 %v5154_v2  ;;  %2849 = vmatprep.subr.bf16.mxu1 %v5156_v3 }
 0xd2f   :  { %2809 = vmatpush1.bf16.msra.mxu0 %v5164_v9  ;;  %2850 = vmatpush1.bf16.msra.mxu1 %v5166_v10 }
 0xd30   :  { %2810 = vmatprep.subr.bf16.mxu0 %v5168_v11  ;;  %2851 = vmatprep.subr.bf16.mxu1 %v5170_v12 }
 0xd33   :  { %2811 = vmatpush1.bf16.msra.mxu0 %v5176_v57  ;;  %2852 = vmatpush1.bf16.msra.mxu1 %v5178_v32 }
 0xd34   :  { %2812 = vmatprep.subr.bf16.mxu0 %v5182_v15  ;;  %2853 = vmatprep.subr.bf16.mxu1 %v5184_v16 }
 0xd37   :  { %2813 = vmatpush1.bf16.msra.mxu0 %v5192_v42  ;;  %2854 = vmatpush1.bf16.msra.mxu1 %v5194_v45 }
 0xd38   :  { %2814 = vmatprep.subr.bf16.mxu0 %v5196_v46  ;;  %2855 = vmatprep.subr.bf16.mxu1 %v5198_v47 }
 0xd3b   :  { %2815 = vmatpush1.bf16.msra.mxu0 %v5207_v18  ;;  %2856 = vmatpush1.bf16.msra.mxu1 %v5209_v20 }
 0xd3c   :  { %2915 = vmatprep.subr.bf16.mxu0 %v5100_v61  ;;  %2956 = vmatprep.subr.bf16.mxu1 %v5102_v5 }
 0xdf1   :  { %v2719_v23 = vpop.f32.mrb[80].mxu0  ;;  %v2760_v59 = vpop.f32.mrb[80].mxu1 }
 0xdf2   :  { %v2767_v37 = vadd.f32 %v2719_v23, %v5745_v27  ;;  %v2769_v29 = vadd.f32 %v2760_v59, %v5746_v26  ;;  %v2721_v63 = vpop.f32.mrb[81].mxu0  ;;  %v2762_v54 = vpop.f32.mrb[81].mxu1  ;;  %v5551_v23 = vld [vmem:[#allocation5 + $0x60] sm:$0xff]  ;;  %v5554_v59 = vld [vmem:[#allocation5 + $0x70] sm:$0xff] }
 0xdf3   :  { %v2768_v17 = vadd.f32 %v2721_v63, %v5747_v62  ;;  %v2770_v1 = vadd.f32 %v2762_v54, %v5748_v43  ;;  %v2723_v0 = vpop.f32.mrb[82].mxu0  ;;  %v2764_v6 = vpop.f32.mrb[82].mxu1 }
 0xdf4   :  { %v3522_v36 = vmul.f32 -1.442695, %v2767_v37  ;;  %v2724_v55 = vpop.f32.mrb[83].mxu0  ;;  %v2765_v53 = vpop.f32.mrb[83].mxu1 }
 0xdf5   :  { %v3523_v61 = vmul.f32 -1.442695, %v2768_v17  ;;  %v3524_v5 = vmul.f32 -1.442695, %v2770_v1 }
 0xdf6   :  { %3932 = vpow2.f32 %v3522_v36 }
 0xdf7   :  { %3934 = vpow2.f32 %v3523_v61 }
 0xdf8   :  { %3936 = vpow2.f32 %v3524_v5 }
 0xdf9   :  { %3938 = vtanh.f32 %v2769_v29 }
 0xe00   :  { %v3933_v38 = vpop.eup %3932 }
 0xe01   :  { %v3935_v7 = vpop.eup %3934  ;;  %v2774_v39 = vadd.f32 1.0, %v3933_v38 }
 0xe02   :  { %v2780_v8 = vadd.f32 1.0, %v3935_v7  ;;  %v3937_v49 = vpop.eup %3936 }
 0xe03   :  { %3940 = vrcp.f32 %v2774_v39  ;;  %v3939_v19 = vpop.eup %3938  ;;  %v2787_v50 = vadd.f32 1.0, %v3937_v49  ;;  %v4012_v49 = vld [vmem:[#allocation5 + $0x88] sm:$0xff] }
 0xe04   :  { %3942 = vrcp.f32 %v2780_v8 }
 0xe05   :  { %3944 = vrcp.f32 %v2787_v50  ;;  %v4017_v50 = vld [vmem:[#allocation5 + $0xb8] sm:$0xff] }
 0xe0d   :  { %v3941_v60 = vpop.eup %3940 }
 0xe0e   :  { %v3943_v13 = vpop.eup %3942  ;;  %v2791_v24 = vmul.f32 %v3941_v60, %v3939_v19  ;;  %v4013_v19 = vld [vmem:[#allocation5 + $0x98] sm:$0xff]  ;;  %v4014_v60 = vld [vmem:[#allocation5 + $0x80] sm:$0xff] }
 0xe0f   :  { %v2790_v56 = vmul.f32 %v3943_v13, %v5468_v22  ;;  %v3945_v48 = vpop.eup %3944  ;;  %v5536_v22 = vld [vmem:[#allocation5 + $0x58] sm:$0xff]  ;;  %v4015_v13 = vld [vmem:[#allocation5 + $0x90] sm:$0xff] }
 0xe11   :  { %v5510_v28 = vadd.f32 %v2791_v24, %v2790_v56  ;;  %v4016_v24 = vld [vmem:[#allocation5 + $0xa8] sm:$0xff]  ;;  %v4018_v56 = vld [vmem:[#allocation5 + $0xa0] sm:$0xff] }
 0xe13   :  { %3946 = vtanh.f32 %v5510_v28 }
 0xe1d   :  { %v3947_v31 = vpop.eup %3946 }
 0xe1e   :  { %v2794_v34 = vmul.f32 %v3947_v31, %v3945_v48  ;;  %v4020_v48 = vld [vmem:[#allocation5 + $0xc8] sm:$0xff]  ;;  %v4021_v31 = vld [vmem:[#allocation5 + $0xd8] sm:$0xff] }
 0xe20   :  { %v2799_v30 = vpack.c.bf16 %v2794_v34, %v2794_v34  ;;  %v4022_v34 = vld [vmem:[#allocation5 + $0xc0] sm:$0xff] }
 0xe22   :  { %2833 = vmatmul.mubr.bf16.vlgmr.msra.gmra.mrb[84].mxu0 %v2799_v30  ;;  %2874 = vmatmul.mubr.bf16.vlgmr.msra.gmra.mrb[84].mxu1 %v2799_v30  ;;  %v4023_v30 = vld [vmem:[#allocation5 + $0xd0] sm:$0xff] }
 0xe23   :  { %2916 = vmatpush1.bf16.msra.mxu0 %v5513_v40  ;;  %2957 = vmatpush1.bf16.msra.mxu1 %v5516_v4 }
 0xe24   :  { %2917 = vmatprep.subr.bf16.mxu0 %v5519_v35  ;;  %2958 = vmatprep.subr.bf16.mxu1 %v5522_v21 }
 0xe25   :  { %2947 = vmatprep.mubr.bf16.mxu0 %v5689_v25  ;;  %2988 = vmatprep.mubr.bf16.mxu1 %v5689_v25 }
 0xe27   :  { %2918 = vmatpush1.bf16.msra.mxu0 %v5527_v44  ;;  %2959 = vmatpush1.bf16.msra.mxu1 %v5530_v41 }
 0xe28   :  { %2919 = vmatprep.subr.bf16.mxu0 %v5533_v14  ;;  %2960 = vmatprep.subr.bf16.mxu1 %v5536_v22 }
 0xe2b   :  { %2920 = vmatpush1.bf16.msra.mxu0 %v5539_v58  ;;  %2961 = vmatpush1.bf16.msra.mxu1 %v5542_v33 }
 0xe2c   :  { %2921 = vmatprep.subr.bf16.mxu0 %v5545_v51  ;;  %2962 = vmatprep.subr.bf16.mxu1 %v5548_v52 }
 0xe2f   :  { %2922 = vmatpush1.bf16.msra.mxu0 %v5551_v23  ;;  %2963 = vmatpush1.bf16.msra.mxu1 %v5554_v59 }
 0xe30   :  { %2923 = vmatprep.subr.bf16.mxu0 %v5154_v2  ;;  %2964 = vmatprep.subr.bf16.mxu1 %v5156_v3  ;;  %v4010_v2 = vld [vmem:[#allocation5 + $0x8] sm:$0xff]  ;;  %v4011_v3 = vld [vmem:[#allocation5 + $0x18] sm:$0xff] }
 0xe33   :  { %2924 = vmatpush1.bf16.msra.mxu0 %v5164_v9  ;;  %2965 = vmatpush1.bf16.msra.mxu1 %v5166_v10 }
 0xe34   :  { %2925 = vmatprep.subr.bf16.mxu0 %v5168_v11  ;;  %2966 = vmatprep.subr.bf16.mxu1 %v5170_v12  ;;  %v5749_v11 = vld [vmem:[#allocation52_spill] sm:$0xff] }
 0xe37   :  { %2926 = vmatpush1.bf16.msra.mxu0 %v5176_v57  ;;  %2967 = vmatpush1.bf16.msra.mxu1 %v5178_v32  ;;  %v5750_v57 = vld [vmem:[#allocation55_spill] sm:$0xff] }
 0xe38   :  { %2927 = vmatprep.subr.bf16.mxu0 %v5182_v15  ;;  %2968 = vmatprep.subr.bf16.mxu1 %v5184_v16 }
 0xe3b   :  { %2928 = vmatpush1.bf16.msra.mxu0 %v5192_v42  ;;  %2969 = vmatpush1.bf16.msra.mxu1 %v5194_v45  ;;  %v5751_v42 = vld [vmem:[#allocation54_spill] sm:$0xff] }
 0xe3c   :  { %2929 = vmatprep.subr.bf16.mxu0 %v5196_v46  ;;  %2970 = vmatprep.subr.bf16.mxu1 %v5198_v47  ;;  %v5752_v46 = vld [vmem:[#allocation56_spill] sm:$0xff] }
 0xe3f   :  { %2930 = vmatpush1.bf16.msra.mxu0 %v5207_v18  ;;  %2971 = vmatpush1.bf16.msra.mxu1 %v5209_v20 }
 0xe40   :  { %3030 = vmatprep.subr.bf16.mxu0 %v4010_v2  ;;  %3071 = vmatprep.subr.bf16.mxu1 %v4011_v3  ;;  %v5756_v2 = vld [vmem:[#allocation61_spill] sm:$0xff] }
 0xef5   :  { %v2834_v9 = vpop.f32.mrb[84].mxu0  ;;  %v2875_v10 = vpop.f32.mrb[84].mxu1 }
 0xef6   :  { %v2882_v12 = vadd.f32 %v2834_v9, %v5749_v11  ;;  %v2884_v32 = vadd.f32 %v2875_v10, %v5750_v57  ;;  %v2836_v15 = vpop.f32.mrb[85].mxu0  ;;  %v2877_v16 = vpop.f32.mrb[85].mxu1 }
 0xef7   :  { %v2883_v45 = vadd.f32 %v2836_v15, %v5751_v42  ;;  %v2885_v47 = vadd.f32 %v2877_v16, %v5752_v46  ;;  %v2838_v27 = vpop.f32.mrb[86].mxu0  ;;  %v2879_v18 = vpop.f32.mrb[86].mxu1 }
 0xef8   :  { %v3525_v37 = vmul.f32 -1.442695, %v2882_v12  ;;  %v2839_v20 = vpop.f32.mrb[87].mxu0  ;;  %v2880_v26 = vpop.f32.mrb[87].mxu1 }
 0xef9   :  { %v3526_v29 = vmul.f32 -1.442695, %v2883_v45  ;;  %v3527_v63 = vmul.f32 -1.442695, %v2885_v47 }
 0xefa   :  { %3948 = vpow2.f32 %v3525_v37 }
 0xefb   :  { %3950 = vpow2.f32 %v3526_v29 }
 0xefc   :  { %3952 = vpow2.f32 %v3527_v63 }
 0xefd   :  { %3954 = vtanh.f32 %v2884_v32 }
 0xf04   :  { %v3949_v54 = vpop.eup %3948 }
 0xf05   :  { %v3951_v62 = vpop.eup %3950  ;;  %v2889_v17 = vadd.f32 1.0, %v3949_v54 }
 0xf06   :  { %v2895_v43 = vadd.f32 1.0, %v3951_v62  ;;  %v3953_v1 = vpop.eup %3952 }
 0xf07   :  { %3956 = vrcp.f32 %v2889_v17  ;;  %v3955_v0 = vpop.eup %3954  ;;  %v2902_v53 = vadd.f32 1.0, %v3953_v1 }
 0xf08   :  { %3958 = vrcp.f32 %v2895_v43 }
 0xf09   :  { %3960 = vrcp.f32 %v2902_v53 }
 0xf11   :  { %v3957_v6 = vpop.eup %3956 }
 0xf12   :  { %v3959_v36 = vpop.eup %3958  ;;  %v2906_v55 = vmul.f32 %v3957_v6, %v3955_v0  ;;  %v5757_v6 = vld [vmem:[#allocation60_spill] sm:$0xff] }
 0xf13   :  { %v2905_v61 = vmul.f32 %v3959_v36, %v5510_v28  ;;  %v3961_v38 = vpop.eup %3960  ;;  %v4019_v28 = vld [vmem:[#allocation5 + $0xb0] sm:$0xff] }
 0xf15   :  { %v5578_v5 = vadd.f32 %v2906_v55, %v2905_v61  ;;  %v5758_v55 = vld [vmem:[#allocation63_spill] sm:$0xff] }
 0xf17   :  { %3962 = vtanh.f32 %v5578_v5 }
 0xf21   :  { %v3963_v7 = vpop.eup %3962 }
 0xf22   :  { %v2909_v39 = vmul.f32 %v3963_v7, %v3961_v38  ;;  %v5759_v7 = vld [vmem:[#allocation62_spill] sm:$0xff] }
 0xf24   :  { %v2914_v8 = vpack.c.bf16 %v2909_v39, %v2909_v39 }
 0xf26   :  { %2948 = vmatmul.mubr.bf16.vlgmr.msra.gmra.mrb[88].mxu0 %v2914_v8  ;;  %2989 = vmatmul.mubr.bf16.vlgmr.msra.gmra.mrb[88].mxu1 %v2914_v8 }
 0xf27   :  { %3031 = vmatpush1.bf16.msra.mxu0 %v5513_v40  ;;  %3072 = vmatpush1.bf16.msra.mxu1 %v5516_v4  ;;  %v4024_v40 = vld [vmem:[#allocation5 + $0xe8] sm:$0xff]  ;;  %v4025_v4 = vld [vmem:[#allocation5 + $0xf8] sm:$0xff] }
 0xf28   :  { %3032 = vmatprep.subr.bf16.mxu0 %v5519_v35  ;;  %3073 = vmatprep.subr.bf16.mxu1 %v5522_v21  ;;  %v4026_v35 = vld [vmem:[#allocation5 + $0xe0] sm:$0xff]  ;;  %v4027_v21 = vld [vmem:[#allocation5 + $0xf0] sm:$0xff] }
 0xf29   :  { %3062 = vmatprep.mubr.bf16.mxu0 %v5689_v25  ;;  %3103 = vmatprep.mubr.bf16.mxu1 %v5689_v25 }
 0xf2b   :  { %3033 = vmatpush1.bf16.msra.mxu0 %v5527_v44  ;;  %3074 = vmatpush1.bf16.msra.mxu1 %v5530_v41 }
 0xf2c   :  { %3034 = vmatprep.subr.bf16.mxu0 %v5533_v14  ;;  %3075 = vmatprep.subr.bf16.mxu1 %v5536_v22  ;;  %v5753_v14 = vld [vmem:[#allocation57_spill] sm:$0xff] }
 0xf2f   :  { %3035 = vmatpush1.bf16.msra.mxu0 %v5539_v58  ;;  %3076 = vmatpush1.bf16.msra.mxu1 %v5542_v33  ;;  %v5754_v58 = vld [vmem:[#allocation59_spill] sm:$0xff] }
 0xf30   :  { %3036 = vmatprep.subr.bf16.mxu0 %v5545_v51  ;;  %3077 = vmatprep.subr.bf16.mxu1 %v5548_v52 }
 0xf33   :  { %3037 = vmatpush1.bf16.msra.mxu0 %v5551_v23  ;;  %3078 = vmatpush1.bf16.msra.mxu1 %v5554_v59  ;;  %v5755_v23 = vld [vmem:[#allocation58_spill] sm:$0xff] }
 0xf34   :  { %3038 = vmatprep.subr.bf16.mxu0 %v4012_v49  ;;  %3079 = vmatprep.subr.bf16.mxu1 %v4013_v19 }
 0xf37   :  { %3039 = vmatpush1.bf16.msra.mxu0 %v4014_v60  ;;  %3080 = vmatpush1.bf16.msra.mxu1 %v4015_v13 }
 0xf38   :  { %3040 = vmatprep.subr.bf16.mxu0 %v4016_v24  ;;  %3081 = vmatprep.subr.bf16.mxu1 %v4017_v50 }
 0xf3b   :  { %3041 = vmatpush1.bf16.msra.mxu0 %v4018_v56  ;;  %3082 = vmatpush1.bf16.msra.mxu1 %v4019_v28 }
 0xf3c   :  { %3042 = vmatprep.subr.bf16.mxu0 %v4020_v48  ;;  %3083 = vmatprep.subr.bf16.mxu1 %v4021_v31 }
 0xf3f   :  { %3043 = vmatpush1.bf16.msra.mxu0 %v4022_v34  ;;  %3084 = vmatpush1.bf16.msra.mxu1 %v4023_v30 }
 0xf40   :  { %3044 = vmatprep.subr.bf16.mxu0 %v4024_v40  ;;  %3085 = vmatprep.subr.bf16.mxu1 %v4025_v4 }
 0xf43   :  { %3045 = vmatpush1.bf16.msra.mxu0 %v4026_v35  ;;  %3086 = vmatpush1.bf16.msra.mxu1 %v4027_v21 }
 0xff9   :  { %v2949_v44 = vpop.f32.mrb[88].mxu0  ;;  %v2990_v41 = vpop.f32.mrb[88].mxu1 }
 0xffa   :  { %v2997_v22 = vadd.f32 %v2949_v44, %v5753_v14  ;;  %v2999_v33 = vadd.f32 %v2990_v41, %v5754_v58  ;;  %v2951_v51 = vpop.f32.mrb[89].mxu0  ;;  %v2992_v52 = vpop.f32.mrb[89].mxu1 }
 0xffb   :  { %v2998_v59 = vadd.f32 %v2951_v51, %v5755_v23  ;;  %v3000_v3 = vadd.f32 %v2992_v52, %v5756_v2  ;;  %v2953_v9 = vpop.f32.mrb[90].mxu0  ;;  %v2994_v10 = vpop.f32.mrb[90].mxu1 }
 0xffc   :  { %v3528_v11 = vmul.f32 -1.442695, %v2997_v22  ;;  %v2954_v12 = vpop.f32.mrb[91].mxu0  ;;  %v2995_v57 = vpop.f32.mrb[91].mxu1 }
 0xffd   :  { %v3529_v32 = vmul.f32 -1.442695, %v2998_v59  ;;  %v3530_v15 = vmul.f32 -1.442695, %v3000_v3 }
 0xffe   :  { %3964 = vpow2.f32 %v3528_v11 }
 0xfff   :  { %3966 = vpow2.f32 %v3529_v32 }
0x1000   :  { %3968 = vpow2.f32 %v3530_v15 }
0x1001   :  { %3970 = vtanh.f32 %v2999_v33 }
0x1008   :  { %v3965_v16 = vpop.eup %3964 }
0x1009   :  { %v3967_v42 = vpop.eup %3966  ;;  %v3004_v45 = vadd.f32 1.0, %v3965_v16 }
0x100a   :  { %v3010_v46 = vadd.f32 1.0, %v3967_v42  ;;  %v3969_v47 = vpop.eup %3968 }
0x100b   :  { %3972 = vrcp.f32 %v3004_v45  ;;  %v3971_v27 = vpop.eup %3970  ;;  %v3017_v26 = vadd.f32 1.0, %v3969_v47 }
0x100c   :  { %3974 = vrcp.f32 %v3010_v46 }
0x100d   :  { %3976 = vrcp.f32 %v3017_v26 }
0x1015   :  { %v3973_v18 = vpop.eup %3972 }
0x1016   :  { %v3975_v37 = vpop.eup %3974  ;;  %v3021_v20 = vmul.f32 %v3973_v18, %v3971_v27 }
0x1017   :  { %v3020_v29 = vmul.f32 %v3975_v37, %v5578_v5  ;;  %v3977_v54 = vpop.eup %3976  ;;  %v5760_v5 = vld [vmem:[#allocation64_spill] sm:$0xff] }
0x1019   :  { %v3022_v63 = vadd.f32 %v3021_v20, %v3020_v29 }
0x101b   :  { %3978 = vtanh.f32 %v3022_v63 }
0x1025   :  { %v3979_v62 = vpop.eup %3978 }
0x1026   :  { %v3024_v17 = vmul.f32 %v3979_v62, %v3977_v54 }
0x1028   :  { %v3029_v43 = vpack.c.bf16 %v3024_v17, %v3024_v17 }
0x102a   :  { %3063 = vmatmul.mubr.bf16.vlgmr.msra.gmra.mrb[92].mxu0 %v3029_v43  ;;  %3104 = vmatmul.mubr.bf16.vlgmr.msra.gmra.mrb[92].mxu1 %v3029_v43 }
0x10fd   :  { %v3064_v1 = vpop.f32.mrb[92].mxu0  ;;  %v3105_v0 = vpop.f32.mrb[92].mxu1 }
0x10fe   :  { %v3112_v36 = vadd.f32 %v3064_v1, %v5757_v6  ;;  %v3114_v53 = vadd.f32 %v3105_v0, %v5758_v55  ;;  %v3066_v61 = vpop.f32.mrb[93].mxu0  ;;  %v3107_v38 = vpop.f32.mrb[93].mxu1 }
0x10ff   :  { %v3113_v39 = vadd.f32 %v3066_v61, %v5759_v7  ;;  %v3115_v8 = vadd.f32 %v3107_v38, %v5760_v5  ;;  %v3068_v49 = vpop.f32.mrb[94].mxu0  ;;  %v3109_v19 = vpop.f32.mrb[94].mxu1 }
0x1100   :  { %v3531_v60 = vmul.f32 -1.442695, %v3112_v36  ;;  %v3069_v13 = vpop.f32.mrb[95].mxu0  ;;  %v3110_v24 = vpop.f32.mrb[95].mxu1 }
0x1101   :  { %v3532_v50 = vmul.f32 -1.442695, %v3113_v39  ;;  %v3533_v56 = vmul.f32 -1.442695, %v3115_v8 }
0x1102   :  { %3980 = vpow2.f32 %v3531_v60 }
0x1103   :  { %3982 = vpow2.f32 %v3532_v50 }
0x1104   :  { %3984 = vpow2.f32 %v3533_v56 }
0x1105   :  { %3986 = vtanh.f32 %v3114_v53 }
0x110c   :  { %v3981_v28 = vpop.eup %3980 }
0x110d   :  { %v3983_v48 = vpop.eup %3982  ;;  %v3119_v31 = vadd.f32 1.0, %v3981_v28 }
0x110e   :  { %v3125_v34 = vadd.f32 1.0, %v3983_v48  ;;  %v3985_v30 = vpop.eup %3984 }
0x110f   :  { %3988 = vrcp.f32 %v3119_v31  ;;  %v3987_v40 = vpop.eup %3986  ;;  %v3132_v44 = vadd.f32 1.0, %v3985_v30 }
0x1110   :  { %3990 = vrcp.f32 %v3125_v34 }
0x1111   :  { %3992 = vrcp.f32 %v3132_v44 }
0x1119   :  { %v3989_v4 = vpop.eup %3988 }
0x111a   :  { %v3991_v35 = vpop.eup %3990  ;;  %v3136_v21 = vmul.f32 %v3989_v4, %v3987_v40 }
0x111b   :  { %v3135_v41 = vmul.f32 %v3991_v35, %v3022_v63  ;;  %v3993_v22 = vpop.eup %3992 }
0x111d   :  { %v3137_v14 = vadd.f32 %v3136_v21, %v3135_v41 }
0x111f   :  { %3994 = vtanh.f32 %v3137_v14 }
0x1129   :  { %v3995_v58 = vpop.eup %3994 }
0x112a   :  { %v5606_v33 = vmul.f32 %v3995_v58, %v3993_v22 }
0x112b   :  { %4128 = dma.done.wait [#allocation9 + $0x2], 2048 }
0x112c   :  { %4129 = vsyncadd [#allocation9 + $0x2], 4294965248 }
0x112d   :  { %4130 = dma.done.wait [#allocation9 + $0x3], 2048 }
0x112e   :  { %4131 = vsyncadd [#allocation9 + $0x3], 4294965248 }
0x112f   :  { %4132 = dma.done.wait [#allocation9 + $0x4], 1024 }
0x1130   :  { %4133 = vsyncadd [#allocation9 + $0x4], 4294966272  ;;  %3235 = vmatprep.mubr.bf16.mxu0 %v5689_v25  ;;  %v3151_v51 = vld [vmem:[#allocation6 + $0x8] sm:$0xff]  ;;  %v3150_v52 = vld [vmem:[#allocation6] sm:$0xff]  ;;  %v3190_v17 = vpack.c.bf16 %v5606_v33, %v5606_v33  ;;  %v4152_v36 = vmov 0.0   ;;  %vm4153_vm0 = vmmov 0  }
0x1131   :  { %v3153_v23 = vld [vmem:[#allocation6 + $0x18] sm:$0xff]  ;;  %3203 = vmatprep.subr.bf16.mxu0 %v3151_v51  ;;  %v3152_v59 = vld [vmem:[#allocation6 + $0x10] sm:$0xff]  ;;  %v3155_v2 = vld [vmem:[#allocation6 + $0x28] sm:$0xff] }
0x1132   :  { %3204 = vmatpush1.bf16.msra.mxu0 %v3150_v52  ;;  %v3174_v3 = vld [vmem:[#allocation7 + $0x40] sm:$0xff]  ;;  %v3175_v10 = vld [vmem:[#allocation7 + $0x48] sm:$0xff]  ;;  %v3157_v12 = vld [vmem:[#allocation6 + $0x38] sm:$0xff] }
0x1133   :  { %3205 = vmatprep.subr.bf16.mxu0 %v3153_v23  ;;  %v3166_v9 = vld [vmem:[#allocation7] sm:$0xff]  ;;  %3541 = vmatprep.subr.bf16.mxu1 %v3174_v3  ;;  %v3167_v57 = vld [vmem:[#allocation7 + $0x8] sm:$0xff]  ;;  %v3176_v25 = vld [vmem:[#allocation7 + $0x50] sm:$0xff] }
0x1134   :  { %v3154_v11 = vld [vmem:[#allocation6 + $0x20] sm:$0xff]  ;;  %3542 = vmatpush3.bf16.msra.mxu1 %v3166_v9  ;;  %v3156_v32 = vld [vmem:[#allocation6 + $0x30] sm:$0xff]  ;;  %v3159_v15 = vld [vmem:[#allocation6 + $0x48] sm:$0xff] }
0x1135   :  { %3543 = vmatprep.subr.bf16.mxu1 %v3175_v10  ;;  %v3168_v16 = vld [vmem:[#allocation7 + $0x10] sm:$0xff]  ;;  %v3177_v42 = vld [vmem:[#allocation7 + $0x58] sm:$0xff]  ;;  %v3158_v45 = vld [vmem:[#allocation6 + $0x40] sm:$0xff] }
0x1136   :  { %3206 = vmatpush1.bf16.msra.mxu0 %v3152_v59  ;;  %v3161_v46 = vld [vmem:[#allocation6 + $0x58] sm:$0xff]  ;;  %v3178_v27 = vld [vmem:[#allocation7 + $0x60] sm:$0xff]  ;;  %v3160_v18 = vld [vmem:[#allocation6 + $0x50] sm:$0xff] }
0x1137   :  { %3207 = vmatprep.subr.bf16.mxu0 %v3155_v2  ;;  %v3169_v47 = vld [vmem:[#allocation7 + $0x18] sm:$0xff]  ;;  %v3163_v37 = vld [vmem:[#allocation6 + $0x68] sm:$0xff]  ;;  %v3170_v20 = vld [vmem:[#allocation7 + $0x20] sm:$0xff] }
0x1138   :  { %3544 = vmatpush3.bf16.msra.mxu1 %v3167_v57  ;;  %v3179_v26 = vld [vmem:[#allocation7 + $0x68] sm:$0xff]  ;;  %v3162_v29 = vld [vmem:[#allocation6 + $0x60] sm:$0xff]  ;;  %v3165_v63 = vld [vmem:[#allocation6 + $0x78] sm:$0xff] }
0x1139   :  { %3545 = vmatprep.subr.bf16.mxu1 %v3176_v25  ;;  %v3171_v54 = vld [vmem:[#allocation7 + $0x28] sm:$0xff]  ;;  %v3164_v62 = vld [vmem:[#allocation6 + $0x70] sm:$0xff]  ;;  %v3181_v0 = vld [vmem:[#allocation7 + $0x78] sm:$0xff] }
0x113a   :  { %3208 = vmatpush1.bf16.msra.mxu0 %v3154_v11  ;;  %v3180_v43 = vld [vmem:[#allocation7 + $0x70] sm:$0xff]  ;;  %v3173_v6 = vld [vmem:[#allocation7 + $0x38] sm:$0xff]  ;;  %v5761_v55 = vld [vmem:[#allocation32_spill] sm:$0xff] }
0x113b   :  { %3209 = vmatprep.subr.bf16.mxu0 %v3157_v12  ;;  %v3172_v1 = vld [vmem:[#allocation7 + $0x30] sm:$0xff]  ;;  %v5764_v38 = vld [vmem:[#allocation35_spill] sm:$0xff]  ;;  %v5765_v7 = vld [vmem:[#allocation36_spill] sm:$0xff] }
0x113c   :  { %3546 = vmatpush3.bf16.msra.mxu1 %v3168_v16  ;;  %v5762_v53 = vld [vmem:[#allocation33_spill] sm:$0xff]  ;;  %v5763_v61 = vld [vmem:[#allocation34_spill] sm:$0xff]  ;;  %v5768_v8 = vld [vmem:[#allocation39_spill] sm:$0xff] }
0x113d   :  { %3547 = vmatprep.subr.bf16.mxu1 %v3177_v42  ;;  %v5766_v39 = vld [vmem:[#allocation37_spill] sm:$0xff]  ;;  %v5767_v5 = vld [vmem:[#allocation38_spill] sm:$0xff]  ;;  %v3191_v49 = vld [vmem:[%s5640_s10] sm:$0x3] }
0x113e   :  { %3210 = vmatpush1.bf16.msra.mxu0 %v3156_v32  ;;  %v5769_v19 = vld [vmem:[#allocation41_spill] sm:$0xff]  ;;  %v5770_v13 = vld [vmem:[#allocation42_spill] sm:$0xff]  ;;  %v3534_v44 = vld [vmem:[%s5642_s12] ss:$0 sm:$0xff] }
0x113f   :  { %3211 = vmatprep.subr.bf16.mxu0 %v3159_v15  ;;  %v3196_v60 = vrot.slane %v3191_v49, %v5769_v19  ;;  %v3200_v24 = vrot.slane %v3191_v49, %v5770_v13  ;;  %v3535_v23 = vld [vmem:[#allocation14] ss:$0 sm:$0xff] }
0x1140   :  { %3548 = vmatpush3.bf16.msra.mxu1 %v3169_v47 }
0x1141   :  { %3549 = vmatprep.subr.bf16.mxu1 %v3178_v27 }
0x1142   :  { %3212 = vmatpush1.bf16.msra.mxu0 %v3158_v45 }
0x1143   :  { %3213 = vmatprep.subr.bf16.mxu0 %v3161_v46 }
0x1144   :  { %3550 = vmatpush3.bf16.msra.mxu1 %v3170_v20 }
0x1145   :  { %3551 = vmatprep.subr.bf16.mxu1 %v3179_v26 }
0x1146   :  { %3214 = vmatpush1.bf16.msra.mxu0 %v3160_v18 }
0x1147   :  { %3215 = vmatprep.subr.bf16.mxu0 %v3163_v37 }
0x1148   :  { %3552 = vmatpush3.bf16.msra.mxu1 %v3171_v54 }
0x1149   :  { %3553 = vmatprep.subr.bf16.mxu1 %v3180_v43 }
0x114a   :  { %3216 = vmatpush1.bf16.msra.mxu0 %v3162_v29 }
0x114b   :  { %3217 = vmatprep.subr.bf16.mxu0 %v3165_v63 }
0x114c   :  { %3554 = vmatpush3.bf16.msra.mxu1 %v3172_v1 }
0x114d   :  { %3555 = vmatprep.subr.bf16.mxu1 %v3181_v0 }
0x114e   :  { %3218 = vmatpush1.bf16.msra.mxu0 %v3164_v62 }
0x114f   :  { %3572 = vmatprep.subr.bf16.mxu0 %v4152_v36 }
0x1150   :  { %3556 = vmatpush3.bf16.msra.mxu1 %v3173_v6 }
0x1151   :  { %3236 = vmatmul.mubr.bf16.vlgmr.msra.gmra.mrb[96].mxu0 %v3190_v17 }
0x1152   :  { %3573 = vmatpush3.bf16.msra.mxu0 %v5761_v55  ;;  %3588 = vmatprep.mubr.msk.bf16.mxu0 %vm4153_vm0, %v4152_v36 }
0x1153   :  { %3574 = vmatprep.subr.bf16.mxu0 %v4152_v36 }
0x1156   :  { %3575 = vmatpush3.bf16.msra.mxu0 %v5762_v53 }
0x1157   :  { %3576 = vmatprep.subr.bf16.mxu0 %v4152_v36 }
0x115a   :  { %3577 = vmatpush3.bf16.msra.mxu0 %v5763_v61 }
0x115b   :  { %3578 = vmatprep.subr.bf16.mxu0 %v4152_v36 }
0x115e   :  { %3579 = vmatpush3.bf16.msra.mxu0 %v5764_v38 }
0x115f   :  { %3580 = vmatprep.subr.bf16.mxu0 %v4152_v36 }
0x1162   :  { %3581 = vmatpush3.bf16.msra.mxu0 %v5765_v7 }
0x1163   :  { %3582 = vmatprep.subr.bf16.mxu0 %v4152_v36 }
0x1166   :  { %3583 = vmatpush3.bf16.msra.mxu0 %v5766_v39 }
0x1167   :  { %3584 = vmatprep.subr.bf16.mxu0 %v4152_v36 }
0x116a   :  { %3585 = vmatpush3.bf16.msra.mxu0 %v5767_v5 }
0x116b   :  { %3586 = vmatprep.subr.bf16.mxu0 %v4152_v36 }
0x116e   :  { %3587 = vmatpush3.bf16.msra.mxu0 %v5768_v8 }
0x1224   :  { %v3237_v50 = vpop.f32.mrb[96].mxu0 }
0x1225   :  { %v3238_v56 = vadd.f32 %v3237_v50, %v3196_v60  ;;  %v3239_v28 = vpop.f32.mrb[97].mxu0 }
0x1226   :  { %v3240_v48 = vadd.f32 %v3239_v28, %v3200_v24  ;;  %v3241_v31 = vpop.f32.mrb[98].mxu0 }
0x1227   :  { %v3244_v34 = vmax.f32 %v3238_v56, 0.0  ;;  %v3242_v30 = vpop.f32.mrb[99].mxu0 }
0x1228   :  { %v3245_v40 = vmax.f32 %v3240_v48, 0.0 }
0x1229   :  { %v3246_v35 = vpack.c.bf16 %v3244_v34, %v3244_v34 }
0x122a   :  { %v3247_v4 = vpack.c.bf16 %v3245_v40, %v3245_v40 }
0x122c   :  { %3287 = vmatprep.mubr.bf16.mxu1 %v3247_v4 }
0x122d   :  { %3288 = vmatmul.mubr.bf16.vlgmr.msra.gmra.mrb[96].mxu1 %v3246_v35 }
0x1300   :  { %v3557_v21 = vpop.f32.mrb[96].mxu1 }
0x1301   :  { %v3558_v41 = vpop.f32.mrb[97].mxu1 }
0x1302   :  { %v3559_v14 = vadd.f32 %v3558_v41, %v3557_v21  ;;  %v3560_v22 = vpop.f32.mrb[98].mxu1 }
0x1303   :  { %v3561_v58 = vpop.f32.mrb[99].mxu1 }
0x1304   :  { %v3290_v33 = vadd.f32 %v3559_v14, %v3534_v44 }
0x1306   :  { %v3295_v51 = vmax.f32 %v3290_v33, 0.0 }
0x1308   :  { %v3296_v52 = vpack.c.bf16 %v3295_v51, %v3295_v51 }
0x130a   :  { %3589 = vmatmul.mubr.bf16.vlgmr.msra.gmra.mrb[100].mxu0 %v3296_v52 }
0x13dd   :  { %v3338_v59 = vpop.f32.mrb[100].mxu0 }
0x13de   :  { %v3339_v2 = vadd.f32 %v3535_v23, %v3338_v59  ;;  %v3590_v3 = vpop.f32.mrb[101].mxu0 }
0x13df   :  { %v3341_v9 = vpop.f32.mrb[102].mxu0 }
0x13e0   :  { %3344 = vmax.xlane.f32.xlu0 %v3339_v2  ;;  %v3591_v10 = vpop.f32.mrb[103].mxu0 }
0x146d   :  { %v3345_v11 = vpop.xlane.xlu0 %3344 }
0x146e   :  { %v3346_v12 = vsub.f32 %v3339_v2, %v3345_v11 }
0x1470   :  { %v3347_v57 = vmul.f32 1.442695, %v3346_v12 }
0x1472   :  { %4028 = vpow2.f32 %v3347_v57 }
0x147c   :  { %v4029_v25 = vpop.eup %4028 }
0x147d   :  { %3349 = vadd.xlane.f32.xlu0 %v4029_v25 }
0x150a   :  { %v3350_v32 = vpop.xlane.xlu0 %3349 }
0x150b   :  { %4030 = vrcp.f32 %v3350_v32 }
0x1515   :  { %v4031_v15 = vpop.eup %4030 }
0x1516   :  { %v3352_v16 = vmul.f32 %v4031_v15, %v4029_v25 }
0x1518   :  { %3353 = vst [vmem:[%s5645_s15] sm:$0xff] %v3352_v16 }
0x1519   :  { %3358 = vsyncpa [#allocation11], 1 }
0x151a   :  { %3359 = vsyncpa [#allocation13], 1 }
0x151b   :  { %3360 = vsyncmov [#allocation9] }
0x151e   :  { %s3361_s4 = vpop.sfrf %3360 }
0x151f   :  { %p3536_p4 = scmp.ne.s32.totalorder %s3361_s4, 0 }
0x1521   :  { %3365 = shalt.err (%p3536_p4)  }
0x1522   :  { %3367 = vsyncmov [#allocation9 + $0x1] }
0x1525   :  { %s3368_s13 = vpop.sfrf %3367 }
0x1526   :  { %p3537_p5 = scmp.ne.s32.totalorder %s3368_s13, 0 }
0x1528   :  { %3372 = shalt.err (%p3537_p5)  }
0x1529   :  { %3374 = vsyncmov [#allocation9 + $0x2] }
0x152c   :  { %s3375_s3 = vpop.sfrf %3374 }
0x152d   :  { %p3538_p6 = scmp.ne.s32.totalorder %s3375_s3, 0 }
0x152f   :  { %3379 = shalt.err (%p3538_p6)  }
0x1530   :  { %3381 = vsyncmov [#allocation9 + $0x3] }
0x1533   :  { %s3382_s26 = vpop.sfrf %3381 }
0x1534   :  { %p3539_p7 = scmp.ne.s32.totalorder %s3382_s26, 0 }
0x1536   :  { %3386 = shalt.err (%p3539_p7)  }
0x1537   :  { %3388 = vsyncmov [#allocation9 + $0x4] }
0x153a   :  { %s3389_s15 = vpop.sfrf %3388 }
0x153b   :  { %p3540_p8 = scmp.ne.s32.totalorder %s3389_s15, 0 }
0x153d   :  { %3393 = shalt.err (%p3540_p8)  }

</bundles_post_ra>
